<compile_context>
chip_gen: v6e
topology: v6e:2x2x1
jax: 0.10.0
libtpu: 0.0.40
codegen_flags: <defaults>
</compile_context>

<pallas_src>
import jax
import jax.numpy as jnp
from jax import lax
from jax.experimental import pallas as pl
from jax.experimental.pallas import tpu as pltpu

# ----- hyperparameters (mirroring the module at a small, deterministic config)
B = 2            # batch
N = 16           # sequence length
DIM = 64         # model dim
DEPTH = 2        # must be even
HEADS = 4
DIM_HEAD = 16
HD_TOT = HEADS * DIM_HEAD          # 64
FF_MULT = 4
FF_INNER = DIM * FF_MULT           # 256
MAX_SEQ_LEN = 32
SOFTCLAMP = 50.0                   # x_transformers default logit_softclamp_value
ROTARY_THETA = 10000.0

GLOBAL_REF_COUNT = 8               # x, pos, cos, sin, perm, gl_g, gl_w, final_g
LAYER_BASE_REFS = 9                # attn_g, wqkvg, bqkvg, wo, ff_g, w1, b1, w2, b2


# -------------------------------------------------------------------------
# in-kernel helpers
# -------------------------------------------------------------------------
def _rmsnorm(x, g_scaled):
    # x_transformers RMSNorm: F.normalize(x, -1) * sqrt(dim) * g
    # sqrt(dim) is folded into g host-side; rsqrt goes to the EUP slot.
    ss = jnp.sum(x * x, axis=-1, keepdims=True)
    return x * lax.rsqrt(jnp.maximum(ss, 1e-24)) * g_scaled


# -------------------------------------------------------------------------
# fused whole-forward kernel (one program per batch element)
# -------------------------------------------------------------------------
def make_transformer_kernel(depth):
    half_depth = depth // 2
    f32 = jnp.float32

    def kernel(*args):
        o_ref = args[-1]
        (x_ref, pos_ref, cos_ref, sin_ref, perm_ref,
         glg_ref, glw_ref, fng_ref) = args[:GLOBAL_REF_COUNT]
        rest = args[GLOBAL_REF_COUNT:-1]

        x = x_ref[...]
        cos = cos_ref[...]
        sin = sin_ref[...]
        perm = perm_ref[...]

        # ---------------- gateloop layer (prenorm -> qkva proj -> scan) + residual
        xn = _rmsnorm(x, glg_ref[...])
        qkva = jnp.dot(xn, glw_ref[...], preferred_element_type=f32)
        q_gl = qkva[:, :DIM]
        kv = qkva[:, DIM:2 * DIM]
        a = jax.nn.sigmoid(qkva[:, 2 * DIM:])
        # Hillis-Steele inclusive scan of h_t = a_t*h_{t-1} + kv_t
        # (log2(N) vectorized steps, fully register-resident).
        A, Bv = a, kv
        off = 1
        while off < N:
            shA = jnp.concatenate(
                [jnp.ones((off, DIM), f32), A[:N - off, :]], axis=0)
            shB = jnp.concatenate(
                [jnp.zeros((off, DIM), f32), Bv[:N - off, :]], axis=0)
            Bv = Bv + A * shB          # uses pre-update A (right-operand gate)
            A = A * shA
            off *= 2
        x = x + q_gl * Bv

        # ---------------- absolute positional embedding
        x = x + pos_ref[...]

        # ---------------- transformer layers (UNet-style concat skips)
        skips = []
        idx = 0
        for ind in range(depth):
            is_first_half = (ind + 1) <= half_depth
            nrefs = LAYER_BASE_REFS + (0 if is_first_half else 1)
            lrefs = rest[idx:idx + nrefs]
            idx += nrefs

            if is_first_half:
                (ag_ref, wqkvg_ref, bqkvg_ref, wo_ref,
                 fg_ref, w1_ref, b1_ref, w2_ref, b2_ref) = lrefs
                skips.append(x)
            else:
                (ag_ref, wqkvg_ref, bqkvg_ref, wo_ref,
                 fg_ref, w1_ref, b1_ref, w2_ref, b2_ref, skipw_ref) = lrefs
                skip = skips.pop()
                # concat + Linear(2*dim, dim, bias=False): one K=128 matmul
                x = jnp.dot(jnp.concatenate([x, skip], axis=-1), skipw_ref[...],
                            preferred_element_type=f32)

            # ---- attention block: prenorm -> fused qkv+gate proj -> rope ->
            #      softclamped softmax -> per-head value gate -> wo, + residual
            xn = _rmsnorm(x, ag_ref[...])
            proj = (jnp.dot(xn, wqkvg_ref[...], preferred_element_type=f32)
                    + bqkvg_ref[...])
            q = proj[:, :HD_TOT]                     # scale folded into wq
            k = proj[:, HD_TOT:2 * HD_TOT]
            v = proj[:, 2 * HD_TOT:3 * HD_TOT]
            gate = jax.nn.sigmoid(proj[:, 3 * HD_TOT:])     # (n, heads)

            # rope for all heads at once: rotate_half via sign-folded perm matmul
            q = q * cos + jnp.dot(q, perm, preferred_element_type=f32) * sin
            k = k * cos + jnp.dot(k, perm, preferred_element_type=f32) * sin

            wo = wo_ref[...]
            attn_out = jnp.zeros((N, DIM), f32)
            for h in range(HEADS):
                sl = slice(h * DIM_HEAD, (h + 1) * DIM_HEAD)
                s = lax.dot_general(q[:, sl], k[:, sl],
                                    (((1,), (1,)), ((), ())),
                                    preferred_element_type=f32)
                # softclamp_logits=True
                s = jnp.tanh(s * (1.0 / SOFTCLAMP)) * SOFTCLAMP
                s = s - jnp.max(s, axis=-1, keepdims=True)
                p = jnp.exp(s)
                p = p * pl.reciprocal(jnp.sum(p, axis=-1, keepdims=True),
                                      approx=True)
                oh = jnp.dot(p, v[:, sl], preferred_element_type=f32)
                oh = oh * gate[:, h:h + 1]
                # accumulate through per-head slice of W_o (no lane concat)
                attn_out = attn_out + jnp.dot(oh, wo[sl, :],
                                              preferred_element_type=f32)
            x = attn_out + x

            # ---- feedforward block: prenorm -> GLU(gelu gate) -> proj, + residual
            xn = _rmsnorm(x, fg_ref[...])
            hpre = (jnp.dot(xn, w1_ref[...], preferred_element_type=f32)
                    + b1_ref[...])
            hidden = hpre[:, :FF_INNER] * jax.nn.gelu(hpre[:, FF_INNER:],
                                                      approximate=True)
            x = (jnp.dot(hidden, w2_ref[...], preferred_element_type=f32)
                 + b2_ref[...] + x)

        # ---------------- final RMSNorm
        o_ref[...] = _rmsnorm(x, fng_ref[...])

    return kernel


# -------------------------------------------------------------------------
# single fused pallas_call wrapper
# -------------------------------------------------------------------------
def transformer_forward(x, prep):
    b, n, d = x.shape
    inputs = [x, prep['pos'], prep['cos'], prep['sin'], prep['perm'],
              prep['gl_g'], prep['gl_w'], prep['final_g']]
    for layer in prep['layers']:
        inputs += list(layer)

    in_specs = [pl.BlockSpec((None, n, d), lambda bb: (bb, 0, 0))]
    for arr in inputs[1:]:
        r, c = arr.shape
        in_specs.append(pl.BlockSpec((r, c), lambda bb: (0, 0)))
    out_spec = pl.BlockSpec((None, n, d), lambda bb: (bb, 0, 0))

    return pl.pallas_call(
        make_transformer_kernel(DEPTH),
        out_shape=jax.ShapeDtypeStruct((b, n, d), jnp.float32),
        grid=(b,),
        in_specs=in_specs,
        out_specs=out_spec,
        compiler_params=pltpu.CompilerParams(
            dimension_semantics=("parallel",)),   # v7x: one TC per batch elem
    )(*inputs)


# -------------------------------------------------------------------------
# parameters, host-side fusion / folding, rotary tables
# -------------------------------------------------------------------------
def init_params(key):
    def nrm(k, shape, std=0.02):
        return jax.random.normal(k, shape, jnp.float32) * std

    keys = iter(jax.random.split(key, 256))
    params = {
        'abs_pos_emb': nrm(next(keys), (MAX_SEQ_LEN, DIM)),
        'gateloop': {
            'gamma': jnp.ones((1, DIM), jnp.float32),
            'w_qkva': nrm(next(keys), (DIM, 3 * DIM)),
        },
        'final_norm_g': jnp.ones((1, DIM), jnp.float32),
        'layers': [],
    }
    for ind in range(DEPTH):
        layer = {
            'attn_norm_g': jnp.ones((1, DIM), jnp.float32),
            'wq': nrm(next(keys), (DIM, HD_TOT)),
            'wk': nrm(next(keys), (DIM, HD_TOT)),
            'wv': nrm(next(keys), (DIM, HD_TOT)),
            'wg': nrm(next(keys), (DIM, HEADS)),
            'bg': jnp.zeros((1, HEADS), jnp.float32),
            'wo': nrm(next(keys), (HD_TOT, DIM)),
            'ff_norm_g': jnp.ones((1, DIM), jnp.float32),
            'ff_w1': nrm(next(keys), (DIM, 2 * FF_INNER)),
            'ff_b1': jnp.zeros((1, 2 * FF_INNER), jnp.float32),
            'ff_w2': nrm(next(keys), (FF_INNER, DIM)),
            'ff_b2': jnp.zeros((1, DIM), jnp.float32),
        }
        if (ind + 1) > DEPTH // 2:      # skip projection only in later half
            layer['skip_w'] = nrm(next(keys), (2 * DIM, DIM))
        params['layers'].append(layer)
    return params


def rotary_cos_sin(seq_len, dim_head, theta=ROTARY_THETA):
    inv_freq = 1.0 / (theta ** (jnp.arange(0, dim_head, 2, dtype=jnp.float32)
                                / dim_head))
    t = jnp.arange(seq_len, dtype=jnp.float32)
    freqs = jnp.einsum('i,j->ij', t, inv_freq)           # (n, dh/2)
    freqs = jnp.concatenate([freqs, freqs], axis=-1)      # (n, dh)
    return jnp.cos(freqs), jnp.sin(freqs)


def build_rope_perm(heads, dim_head):
    # P such that (x @ P)[:, d] == rotate_half(x per head)[:, d]
    # rotate_half: [x1, x2] -> [-x2, x1] within each head block.
    hd = heads * dim_head
    half = dim_head // 2
    d_idx = jnp.arange(hd)
    j_d = d_idx % dim_head
    src_for_d = jnp.where(j_d < half, d_idx + half, d_idx - half)
    sign_for_d = jnp.where(j_d < half, -1.0, 1.0).astype(jnp.float32)
    P = (jnp.arange(hd)[:, None] == src_for_d[None, :]).astype(jnp.float32)
    return P * sign_for_d[None, :]


def prepare_params(params, seq_len):
    assert seq_len <= MAX_SEQ_LEN, f'{seq_len} exceeds max_seq_len {MAX_SEQ_LEN}'
    sqrt_dim = float(DIM) ** 0.5
    scale = float(DIM_HEAD) ** -0.5
    cos, sin = rotary_cos_sin(seq_len, DIM_HEAD)
    prep = {
        'pos': params['abs_pos_emb'][:seq_len],
        'cos': jnp.tile(cos, (1, HEADS)),          # (n, heads*dim_head)
        'sin': jnp.tile(sin, (1, HEADS)),
        'perm': build_rope_perm(HEADS, DIM_HEAD),
        'gl_g': params['gateloop']['gamma'] * sqrt_dim,
        'gl_w': params['gateloop']['w_qkva'],
        'final_g': params['final_norm_g'] * sqrt_dim,
        'layers': [],
    }
    for ind, layer in enumerate(params['layers']):
        # fused q|k|v|gate projection; attention scale folded into wq,
        # gate bias folded into the fused bias row.
        wqkvg = jnp.concatenate(
            [layer['wq'] * scale, layer['wk'], layer['wv'], layer['wg']], axis=1)
        bqkvg = jnp.concatenate(
            [jnp.zeros((1, 3 * HD_TOT), jnp.float32), layer['bg']], axis=1)
        lrefs = [layer['attn_norm_g'] * sqrt_dim, wqkvg, bqkvg, layer['wo'],
                 layer['ff_norm_g'] * sqrt_dim, layer['ff_w1'], layer['ff_b1'],
                 layer['ff_w2'], layer['ff_b2']]
        if (ind + 1) > DEPTH // 2:
            lrefs.append(layer['skip_w'])
        prep['layers'].append(lrefs)
    return prep


if __name__ == "__main__":
    key = jax.random.PRNGKey(0)
    x = jax.random.normal(key, (B, N, DIM), dtype=jnp.float32)
    params = init_params(jax.random.PRNGKey(1))
    prep = prepare_params(params, N)

    fwd = jax.jit(transformer_forward)
    out = fwd(x, prep)
    jax.block_until_ready(out)

    assert out.shape == (B, N, DIM)
    assert bool(jnp.all(jnp.isfinite(out)))
    print("KERNEL_OK")
</pallas_src>

<mosaic_0001>
module attributes {stable_mosaic.version = 11 : i64} {
  func.func @kernel(%arg0: i32, %arg1: memref<1x16x64xf32, #tpu.memory_space<vmem>>, %arg2: memref<16x64xf32, #tpu.memory_space<vmem>>, %arg3: memref<16x64xf32, #tpu.memory_space<vmem>>, %arg4: memref<16x64xf32, #tpu.memory_space<vmem>>, %arg5: memref<64x64xf32, #tpu.memory_space<vmem>>, %arg6: memref<1x64xf32, #tpu.memory_space<vmem>>, %arg7: memref<64x192xf32, #tpu.memory_space<vmem>>, %arg8: memref<1x64xf32, #tpu.memory_space<vmem>>, %arg9: memref<1x64xf32, #tpu.memory_space<vmem>>, %arg10: memref<64x196xf32, #tpu.memory_space<vmem>>, %arg11: memref<1x196xf32, #tpu.memory_space<vmem>>, %arg12: memref<64x64xf32, #tpu.memory_space<vmem>>, %arg13: memref<1x64xf32, #tpu.memory_space<vmem>>, %arg14: memref<64x512xf32, #tpu.memory_space<vmem>>, %arg15: memref<1x512xf32, #tpu.memory_space<vmem>>, %arg16: memref<256x64xf32, #tpu.memory_space<vmem>>, %arg17: memref<1x64xf32, #tpu.memory_space<vmem>>, %arg18: memref<1x64xf32, #tpu.memory_space<vmem>>, %arg19: memref<64x196xf32, #tpu.memory_space<vmem>>, %arg20: memref<1x196xf32, #tpu.memory_space<vmem>>, %arg21: memref<64x64xf32, #tpu.memory_space<vmem>>, %arg22: memref<1x64xf32, #tpu.memory_space<vmem>>, %arg23: memref<64x512xf32, #tpu.memory_space<vmem>>, %arg24: memref<1x512xf32, #tpu.memory_space<vmem>>, %arg25: memref<256x64xf32, #tpu.memory_space<vmem>>, %arg26: memref<1x64xf32, #tpu.memory_space<vmem>>, %arg27: memref<128x64xf32, #tpu.memory_space<vmem>>, %arg28: memref<1x16x64xf32, #tpu.memory_space<vmem>>) attributes {dimension_semantics = [#tpu.dimension_semantics<parallel>], iteration_bounds = array<i64: 2>, scalar_prefetch = 0 : i64, scratch_operands = 0 : i64, tpu.core_type = #tpu.core_type<tc>, window_params = [{transform_indices = @transform_0, window_bounds = array<i64: 1, 16, 64>}, {pipeline_mode = #tpu.pipeline_mode<synchronous>, transform_indices = @transform_1, window_bounds = array<i64: 16, 64>}, {pipeline_mode = #tpu.pipeline_mode<synchronous>, transform_indices = @transform_2, window_bounds = array<i64: 16, 64>}, {pipeline_mode = #tpu.pipeline_mode<synchronous>, transform_indices = @transform_3, window_bounds = array<i64: 16, 64>}, {pipeline_mode = #tpu.pipeline_mode<synchronous>, transform_indices = @transform_4, window_bounds = array<i64: 64, 64>}, {pipeline_mode = #tpu.pipeline_mode<synchronous>, transform_indices = @transform_5, window_bounds = array<i64: 1, 64>}, {pipeline_mode = #tpu.pipeline_mode<synchronous>, transform_indices = @transform_6, window_bounds = array<i64: 64, 192>}, {pipeline_mode = #tpu.pipeline_mode<synchronous>, transform_indices = @transform_7, window_bounds = array<i64: 1, 64>}, {pipeline_mode = #tpu.pipeline_mode<synchronous>, transform_indices = @transform_8, window_bounds = array<i64: 1, 64>}, {pipeline_mode = #tpu.pipeline_mode<synchronous>, transform_indices = @transform_9, window_bounds = array<i64: 64, 196>}, {pipeline_mode = #tpu.pipeline_mode<synchronous>, transform_indices = @transform_10, window_bounds = array<i64: 1, 196>}, {pipeline_mode = #tpu.pipeline_mode<synchronous>, transform_indices = @transform_11, window_bounds = array<i64: 64, 64>}, {pipeline_mode = #tpu.pipeline_mode<synchronous>, transform_indices = @transform_12, window_bounds = array<i64: 1, 64>}, {pipeline_mode = #tpu.pipeline_mode<synchronous>, transform_indices = @transform_13, window_bounds = array<i64: 64, 512>}, {pipeline_mode = #tpu.pipeline_mode<synchronous>, transform_indices = @transform_14, window_bounds = array<i64: 1, 512>}, {pipeline_mode = #tpu.pipeline_mode<synchronous>, transform_indices = @transform_15, window_bounds = array<i64: 256, 64>}, {pipeline_mode = #tpu.pipeline_mode<synchronous>, transform_indices = @transform_16, window_bounds = array<i64: 1, 64>}, {pipeline_mode = #tpu.pipeline_mode<synchronous>, transform_indices = @transform_17, window_bounds = array<i64: 1, 64>}, {pipeline_mode = #tpu.pipeline_mode<synchronous>, transform_indices = @transform_18, window_bounds = array<i64: 64, 196>}, {pipeline_mode = #tpu.pipeline_mode<synchronous>, transform_indices = @transform_19, window_bounds = array<i64: 1, 196>}, {pipeline_mode = #tpu.pipeline_mode<synchronous>, transform_indices = @transform_20, window_bounds = array<i64: 64, 64>}, {pipeline_mode = #tpu.pipeline_mode<synchronous>, transform_indices = @transform_21, window_bounds = array<i64: 1, 64>}, {pipeline_mode = #tpu.pipeline_mode<synchronous>, transform_indices = @transform_22, window_bounds = array<i64: 64, 512>}, {pipeline_mode = #tpu.pipeline_mode<synchronous>, transform_indices = @transform_23, window_bounds = array<i64: 1, 512>}, {pipeline_mode = #tpu.pipeline_mode<synchronous>, transform_indices = @transform_24, window_bounds = array<i64: 256, 64>}, {pipeline_mode = #tpu.pipeline_mode<synchronous>, transform_indices = @transform_25, window_bounds = array<i64: 1, 64>}, {pipeline_mode = #tpu.pipeline_mode<synchronous>, transform_indices = @transform_26, window_bounds = array<i64: 128, 64>}, {transform_indices = @transform_27, window_bounds = array<i64: 1, 16, 64>}]} {
    %c0 = arith.constant 0 : index
    %c0_0 = arith.constant 0 : index
    %c0_1 = arith.constant 0 : index
    %0 = vector.load %arg1[%c0, %c0_0, %c0_1] : memref<1x16x64xf32, #tpu.memory_space<vmem>>, vector<1x16x64xf32>
    %1 = vector.shape_cast %0 : vector<1x16x64xf32> to vector<16x64xf32>
    %c0_2 = arith.constant 0 : index
    %c0_3 = arith.constant 0 : index
    %2 = vector.load %arg3[%c0_2, %c0_3] : memref<16x64xf32, #tpu.memory_space<vmem>>, vector<16x64xf32>
    %c0_4 = arith.constant 0 : index
    %c0_5 = arith.constant 0 : index
    %3 = vector.load %arg4[%c0_4, %c0_5] : memref<16x64xf32, #tpu.memory_space<vmem>>, vector<16x64xf32>
    %c0_6 = arith.constant 0 : index
    %c0_7 = arith.constant 0 : index
    %4 = vector.load %arg5[%c0_6, %c0_7] : memref<64x64xf32, #tpu.memory_space<vmem>>, vector<64x64xf32>
    %c0_8 = arith.constant 0 : index
    %c0_9 = arith.constant 0 : index
    %5 = vector.load %arg6[%c0_8, %c0_9] : memref<1x64xf32, #tpu.memory_space<vmem>>, vector<1x64xf32>
    %6 = arith.mulf %1, %1 : vector<16x64xf32>
    %cst = arith.constant dense<0.000000e+00> : vector<16xf32>
    %7 = vector.multi_reduction <add>, %6, %cst [1] : vector<16x64xf32> to vector<16xf32>
    %8 = vector.shape_cast %7 : vector<16xf32> to vector<16x1xf32>
    %cst_10 = arith.constant 1.000000e-24 : f32
    %9 = vector.broadcast %cst_10 : f32 to vector<16x1xf32>
    %10 = arith.maximumf %8, %9 : vector<16x1xf32>
    %11 = math.rsqrt %10 : vector<16x1xf32>
    %12 = vector.broadcast %11 : vector<16x1xf32> to vector<16x64xf32>
    %13 = arith.mulf %1, %12 : vector<16x64xf32>
    %14 = vector.broadcast %5 : vector<1x64xf32> to vector<16x64xf32>
    %15 = arith.mulf %13, %14 : vector<16x64xf32>
    %c0_11 = arith.constant 0 : index
    %c0_12 = arith.constant 0 : index
    %16 = vector.load %arg7[%c0_11, %c0_12] : memref<64x192xf32, #tpu.memory_space<vmem>>, vector<64x192xf32>
    %cst_13 = arith.constant dense<0.000000e+00> : vector<16x192xf32>
    %17 = tpu.matmul %15, %16, %cst_13 {dimension_numbers = #tpu.dot_dimension_numbers<[1], [0], [0], [1], [0, 0, 1, 1], [], []>} : vector<16x64xf32>, vector<64x192xf32>, vector<16x192xf32> -> vector<16x192xf32>
    %18 = vector.extract_strided_slice %17 {offsets = [0, 0], sizes = [16, 64], strides = [1, 1]} : vector<16x192xf32> to vector<16x64xf32>
    %19 = vector.extract_strided_slice %17 {offsets = [0, 64], sizes = [16, 64], strides = [1, 1]} : vector<16x192xf32> to vector<16x64xf32>
    %20 = vector.extract_strided_slice %17 {offsets = [0, 128], sizes = [16, 64], strides = [1, 1]} : vector<16x192xf32> to vector<16x64xf32>
    %21 = arith.negf %20 : vector<16x64xf32>
    %22 = math.exp %21 : vector<16x64xf32>
    %cst_14 = arith.constant 1.000000e+00 : f32
    %23 = vector.broadcast %cst_14 : f32 to vector<16x64xf32>
    %24 = arith.addf %23, %22 : vector<16x64xf32>
    %25 = arith.divf %23, %24 : vector<16x64xf32>
    %cst_15 = arith.constant 1.000000e+00 : f32
    %26 = vector.broadcast %cst_15 : f32 to vector<1x64xf32>
    %27 = vector.extract_strided_slice %25 {offsets = [0, 0], sizes = [15, 64], strides = [1, 1]} : vector<16x64xf32> to vector<15x64xf32>
    %28 = tpu.concatenate %26, %27 in 0 : vector<1x64xf32>, vector<15x64xf32> -> vector<16x64xf32>
    %cst_16 = arith.constant 0.000000e+00 : f32
    %29 = vector.broadcast %cst_16 : f32 to vector<1x64xf32>
    %30 = vector.extract_strided_slice %19 {offsets = [0, 0], sizes = [15, 64], strides = [1, 1]} : vector<16x64xf32> to vector<15x64xf32>
    %31 = tpu.concatenate %29, %30 in 0 : vector<1x64xf32>, vector<15x64xf32> -> vector<16x64xf32>
    %32 = arith.mulf %25, %31 : vector<16x64xf32>
    %33 = arith.addf %19, %32 : vector<16x64xf32>
    %34 = arith.mulf %25, %28 : vector<16x64xf32>
    %cst_17 = arith.constant 1.000000e+00 : f32
    %35 = vector.broadcast %cst_17 : f32 to vector<2x64xf32>
    %36 = vector.extract_strided_slice %34 {offsets = [0, 0], sizes = [14, 64], strides = [1, 1]} : vector<16x64xf32> to vector<14x64xf32>
    %37 = tpu.concatenate %35, %36 in 0 : vector<2x64xf32>, vector<14x64xf32> -> vector<16x64xf32>
    %cst_18 = arith.constant 0.000000e+00 : f32
    %38 = vector.broadcast %cst_18 : f32 to vector<2x64xf32>
    %39 = vector.extract_strided_slice %33 {offsets = [0, 0], sizes = [14, 64], strides = [1, 1]} : vector<16x64xf32> to vector<14x64xf32>
    %40 = tpu.concatenate %38, %39 in 0 : vector<2x64xf32>, vector<14x64xf32> -> vector<16x64xf32>
    %41 = arith.mulf %34, %40 : vector<16x64xf32>
    %42 = arith.addf %33, %41 : vector<16x64xf32>
    %43 = arith.mulf %34, %37 : vector<16x64xf32>
    %cst_19 = arith.constant 1.000000e+00 : f32
    %44 = vector.broadcast %cst_19 : f32 to vector<4x64xf32>
    %45 = vector.extract_strided_slice %43 {offsets = [0, 0], sizes = [12, 64], strides = [1, 1]} : vector<16x64xf32> to vector<12x64xf32>
    %46 = tpu.concatenate %44, %45 in 0 : vector<4x64xf32>, vector<12x64xf32> -> vector<16x64xf32>
    %cst_20 = arith.constant 0.000000e+00 : f32
    %47 = vector.broadcast %cst_20 : f32 to vector<4x64xf32>
    %48 = vector.extract_strided_slice %42 {offsets = [0, 0], sizes = [12, 64], strides = [1, 1]} : vector<16x64xf32> to vector<12x64xf32>
    %49 = tpu.concatenate %47, %48 in 0 : vector<4x64xf32>, vector<12x64xf32> -> vector<16x64xf32>
    %50 = arith.mulf %43, %49 : vector<16x64xf32>
    %51 = arith.addf %42, %50 : vector<16x64xf32>
    %52 = arith.mulf %43, %46 : vector<16x64xf32>
    %cst_21 = arith.constant 0.000000e+00 : f32
    %53 = vector.broadcast %cst_21 : f32 to vector<8x64xf32>
    %54 = vector.extract_strided_slice %51 {offsets = [0, 0], sizes = [8, 64], strides = [1, 1]} : vector<16x64xf32> to vector<8x64xf32>
    %55 = tpu.concatenate %53, %54 in 0 : vector<8x64xf32>, vector<8x64xf32> -> vector<16x64xf32>
    %56 = arith.mulf %52, %55 : vector<16x64xf32>
    %57 = arith.addf %51, %56 : vector<16x64xf32>
    %58 = arith.mulf %18, %57 : vector<16x64xf32>
    %59 = arith.addf %1, %58 : vector<16x64xf32>
    %c0_22 = arith.constant 0 : index
    %c0_23 = arith.constant 0 : index
    %60 = vector.load %arg2[%c0_22, %c0_23] : memref<16x64xf32, #tpu.memory_space<vmem>>, vector<16x64xf32>
    %61 = arith.addf %59, %60 : vector<16x64xf32>
    %c0_24 = arith.constant 0 : index
    %c0_25 = arith.constant 0 : index
    %62 = vector.load %arg9[%c0_24, %c0_25] : memref<1x64xf32, #tpu.memory_space<vmem>>, vector<1x64xf32>
    %63 = arith.mulf %61, %61 : vector<16x64xf32>
    %cst_26 = arith.constant dense<0.000000e+00> : vector<16xf32>
    %64 = vector.multi_reduction <add>, %63, %cst_26 [1] : vector<16x64xf32> to vector<16xf32>
    %65 = vector.shape_cast %64 : vector<16xf32> to vector<16x1xf32>
    %cst_27 = arith.constant 1.000000e-24 : f32
    %66 = vector.broadcast %cst_27 : f32 to vector<16x1xf32>
    %67 = arith.maximumf %65, %66 : vector<16x1xf32>
    %68 = math.rsqrt %67 : vector<16x1xf32>
    %69 = vector.broadcast %68 : vector<16x1xf32> to vector<16x64xf32>
    %70 = arith.mulf %61, %69 : vector<16x64xf32>
    %71 = vector.broadcast %62 : vector<1x64xf32> to vector<16x64xf32>
    %72 = arith.mulf %70, %71 : vector<16x64xf32>
    %c0_28 = arith.constant 0 : index
    %c0_29 = arith.constant 0 : index
    %73 = vector.load %arg10[%c0_28, %c0_29] : memref<64x196xf32, #tpu.memory_space<vmem>>, vector<64x196xf32>
    %cst_30 = arith.constant dense<0.000000e+00> : vector<16x196xf32>
    %74 = tpu.matmul %72, %73, %cst_30 {dimension_numbers = #tpu.dot_dimension_numbers<[1], [0], [0], [1], [0, 0, 1, 1], [], []>} : vector<16x64xf32>, vector<64x196xf32>, vector<16x196xf32> -> vector<16x196xf32>
    %c0_31 = arith.constant 0 : index
    %c0_32 = arith.constant 0 : index
    %75 = vector.load %arg11[%c0_31, %c0_32] : memref<1x196xf32, #tpu.memory_space<vmem>>, vector<1x196xf32>
    %76 = vector.broadcast %75 : vector<1x196xf32> to vector<16x196xf32>
    %77 = arith.addf %74, %76 : vector<16x196xf32>
    %78 = vector.extract_strided_slice %77 {offsets = [0, 0], sizes = [16, 64], strides = [1, 1]} : vector<16x196xf32> to vector<16x64xf32>
    %79 = vector.extract_strided_slice %77 {offsets = [0, 64], sizes = [16, 64], strides = [1, 1]} : vector<16x196xf32> to vector<16x64xf32>
    %80 = vector.extract_strided_slice %77 {offsets = [0, 128], sizes = [16, 64], strides = [1, 1]} : vector<16x196xf32> to vector<16x64xf32>
    %81 = vector.extract_strided_slice %77 {offsets = [0, 192], sizes = [16, 4], strides = [1, 1]} : vector<16x196xf32> to vector<16x4xf32>
    %82 = arith.negf %81 : vector<16x4xf32>
    %83 = math.exp %82 : vector<16x4xf32>
    %cst_33 = arith.constant 1.000000e+00 : f32
    %84 = vector.broadcast %cst_33 : f32 to vector<16x4xf32>
    %85 = arith.addf %84, %83 : vector<16x4xf32>
    %86 = arith.divf %84, %85 : vector<16x4xf32>
    %87 = arith.mulf %78, %2 : vector<16x64xf32>
    %cst_34 = arith.constant dense<0.000000e+00> : vector<16x64xf32>
    %88 = tpu.matmul %78, %4, %cst_34 {dimension_numbers = #tpu.dot_dimension_numbers<[1], [0], [0], [1], [0, 0, 1, 1], [], []>} : vector<16x64xf32>, vector<64x64xf32>, vector<16x64xf32> -> vector<16x64xf32>
    %89 = arith.mulf %88, %3 : vector<16x64xf32>
    %90 = arith.addf %87, %89 : vector<16x64xf32>
    %91 = arith.mulf %79, %2 : vector<16x64xf32>
    %cst_35 = arith.constant dense<0.000000e+00> : vector<16x64xf32>
    %92 = tpu.matmul %79, %4, %cst_35 {dimension_numbers = #tpu.dot_dimension_numbers<[1], [0], [0], [1], [0, 0, 1, 1], [], []>} : vector<16x64xf32>, vector<64x64xf32>, vector<16x64xf32> -> vector<16x64xf32>
    %93 = arith.mulf %92, %3 : vector<16x64xf32>
    %94 = arith.addf %91, %93 : vector<16x64xf32>
    %c0_36 = arith.constant 0 : index
    %c0_37 = arith.constant 0 : index
    %95 = vector.load %arg12[%c0_36, %c0_37] : memref<64x64xf32, #tpu.memory_space<vmem>>, vector<64x64xf32>
    %cst_38 = arith.constant 0.000000e+00 : f32
    %96 = vector.broadcast %cst_38 : f32 to vector<16x64xf32>
    %97 = vector.extract_strided_slice %90 {offsets = [0, 0], sizes = [16, 16], strides = [1, 1]} : vector<16x64xf32> to vector<16x16xf32>
    %98 = vector.extract_strided_slice %94 {offsets = [0, 0], sizes = [16, 16], strides = [1, 1]} : vector<16x64xf32> to vector<16x16xf32>
    %cst_39 = arith.constant dense<0.000000e+00> : vector<16x16xf32>
    %99 = tpu.matmul %97, %98, %cst_39 {dimension_numbers = #tpu.dot_dimension_numbers<[1], [1], [0], [0], [0, 0, 1, 0], [], []>} : vector<16x16xf32>, vector<16x16xf32>, vector<16x16xf32> -> vector<16x16xf32>
    %cst_40 = arith.constant 2.000000e-02 : f32
    %100 = vector.broadcast %cst_40 : f32 to vector<16x16xf32>
    %101 = arith.mulf %99, %100 : vector<16x16xf32>
    %102 = math.tanh %101 : vector<16x16xf32>
    %cst_41 = arith.constant 5.000000e+01 : f32
    %103 = vector.broadcast %cst_41 : f32 to vector<16x16xf32>
    %104 = arith.mulf %102, %103 : vector<16x16xf32>
    %cst_42 = arith.constant dense<0xFF800000> : vector<16xf32>
    %105 = vector.multi_reduction <maximumf>, %104, %cst_42 [1] : vector<16x16xf32> to vector<16xf32>
    %106 = vector.shape_cast %105 : vector<16xf32> to vector<16x1xf32>
    %107 = vector.broadcast %106 : vector<16x1xf32> to vector<16x16xf32>
    %108 = arith.subf %104, %107 : vector<16x16xf32>
    %109 = math.exp %108 : vector<16x16xf32>
    %cst_43 = arith.constant dense<0.000000e+00> : vector<16xf32>
    %110 = vector.multi_reduction <add>, %109, %cst_43 [1] : vector<16x16xf32> to vector<16xf32>
    %111 = vector.shape_cast %110 : vector<16xf32> to vector<16x1xf32>
    %112 = tpu.reciprocal %111 {approx = true} : vector<16x1xf32> -> vector<16x1xf32>
    %113 = vector.broadcast %112 : vector<16x1xf32> to vector<16x16xf32>
    %114 = arith.mulf %109, %113 : vector<16x16xf32>
    %115 = vector.extract_strided_slice %80 {offsets = [0, 0], sizes = [16, 16], strides = [1, 1]} : vector<16x64xf32> to vector<16x16xf32>
    %cst_44 = arith.constant dense<0.000000e+00> : vector<16x16xf32>
    %116 = tpu.matmul %114, %115, %cst_44 {dimension_numbers = #tpu.dot_dimension_numbers<[1], [0], [0], [1], [0, 0, 1, 1], [], []>} : vector<16x16xf32>, vector<16x16xf32>, vector<16x16xf32> -> vector<16x16xf32>
    %117 = vector.extract_strided_slice %86 {offsets = [0, 0], sizes = [16, 1], strides = [1, 1]} : vector<16x4xf32> to vector<16x1xf32>
    %118 = vector.broadcast %117 : vector<16x1xf32> to vector<16x16xf32>
    %119 = arith.mulf %116, %118 : vector<16x16xf32>
    %120 = vector.extract_strided_slice %95 {offsets = [0, 0], sizes = [16, 64], strides = [1, 1]} : vector<64x64xf32> to vector<16x64xf32>
    %cst_45 = arith.constant dense<0.000000e+00> : vector<16x64xf32>
    %121 = tpu.matmul %119, %120, %cst_45 {dimension_numbers = #tpu.dot_dimension_numbers<[1], [0], [0], [1], [0, 0, 1, 1], [], []>} : vector<16x16xf32>, vector<16x64xf32>, vector<16x64xf32> -> vector<16x64xf32>
    %122 = arith.addf %96, %121 : vector<16x64xf32>
    %123 = vector.extract_strided_slice %90 {offsets = [0, 16], sizes = [16, 16], strides = [1, 1]} : vector<16x64xf32> to vector<16x16xf32>
    %124 = vector.extract_strided_slice %94 {offsets = [0, 16], sizes = [16, 16], strides = [1, 1]} : vector<16x64xf32> to vector<16x16xf32>
    %cst_46 = arith.constant dense<0.000000e+00> : vector<16x16xf32>
    %125 = tpu.matmul %123, %124, %cst_46 {dimension_numbers = #tpu.dot_dimension_numbers<[1], [1], [0], [0], [0, 0, 1, 0], [], []>} : vector<16x16xf32>, vector<16x16xf32>, vector<16x16xf32> -> vector<16x16xf32>
    %cst_47 = arith.constant 2.000000e-02 : f32
    %126 = vector.broadcast %cst_47 : f32 to vector<16x16xf32>
    %127 = arith.mulf %125, %126 : vector<16x16xf32>
    %128 = math.tanh %127 : vector<16x16xf32>
    %cst_48 = arith.constant 5.000000e+01 : f32
    %129 = vector.broadcast %cst_48 : f32 to vector<16x16xf32>
    %130 = arith.mulf %128, %129 : vector<16x16xf32>
    %cst_49 = arith.constant dense<0xFF800000> : vector<16xf32>
    %131 = vector.multi_reduction <maximumf>, %130, %cst_49 [1] : vector<16x16xf32> to vector<16xf32>
    %132 = vector.shape_cast %131 : vector<16xf32> to vector<16x1xf32>
    %133 = vector.broadcast %132 : vector<16x1xf32> to vector<16x16xf32>
    %134 = arith.subf %130, %133 : vector<16x16xf32>
    %135 = math.exp %134 : vector<16x16xf32>
    %cst_50 = arith.constant dense<0.000000e+00> : vector<16xf32>
    %136 = vector.multi_reduction <add>, %135, %cst_50 [1] : vector<16x16xf32> to vector<16xf32>
    %137 = vector.shape_cast %136 : vector<16xf32> to vector<16x1xf32>
    %138 = tpu.reciprocal %137 {approx = true} : vector<16x1xf32> -> vector<16x1xf32>
    %139 = vector.broadcast %138 : vector<16x1xf32> to vector<16x16xf32>
    %140 = arith.mulf %135, %139 : vector<16x16xf32>
    %141 = vector.extract_strided_slice %80 {offsets = [0, 16], sizes = [16, 16], strides = [1, 1]} : vector<16x64xf32> to vector<16x16xf32>
    %cst_51 = arith.constant dense<0.000000e+00> : vector<16x16xf32>
    %142 = tpu.matmul %140, %141, %cst_51 {dimension_numbers = #tpu.dot_dimension_numbers<[1], [0], [0], [1], [0, 0, 1, 1], [], []>} : vector<16x16xf32>, vector<16x16xf32>, vector<16x16xf32> -> vector<16x16xf32>
    %143 = vector.extract_strided_slice %86 {offsets = [0, 1], sizes = [16, 1], strides = [1, 1]} : vector<16x4xf32> to vector<16x1xf32>
    %144 = vector.broadcast %143 : vector<16x1xf32> to vector<16x16xf32>
    %145 = arith.mulf %142, %144 : vector<16x16xf32>
    %146 = vector.extract_strided_slice %95 {offsets = [16, 0], sizes = [16, 64], strides = [1, 1]} : vector<64x64xf32> to vector<16x64xf32>
    %cst_52 = arith.constant dense<0.000000e+00> : vector<16x64xf32>
    %147 = tpu.matmul %145, %146, %cst_52 {dimension_numbers = #tpu.dot_dimension_numbers<[1], [0], [0], [1], [0, 0, 1, 1], [], []>} : vector<16x16xf32>, vector<16x64xf32>, vector<16x64xf32> -> vector<16x64xf32>
    %148 = arith.addf %122, %147 : vector<16x64xf32>
    %149 = vector.extract_strided_slice %90 {offsets = [0, 32], sizes = [16, 16], strides = [1, 1]} : vector<16x64xf32> to vector<16x16xf32>
    %150 = vector.extract_strided_slice %94 {offsets = [0, 32], sizes = [16, 16], strides = [1, 1]} : vector<16x64xf32> to vector<16x16xf32>
    %cst_53 = arith.constant dense<0.000000e+00> : vector<16x16xf32>
    %151 = tpu.matmul %149, %150, %cst_53 {dimension_numbers = #tpu.dot_dimension_numbers<[1], [1], [0], [0], [0, 0, 1, 0], [], []>} : vector<16x16xf32>, vector<16x16xf32>, vector<16x16xf32> -> vector<16x16xf32>
    %cst_54 = arith.constant 2.000000e-02 : f32
    %152 = vector.broadcast %cst_54 : f32 to vector<16x16xf32>
    %153 = arith.mulf %151, %152 : vector<16x16xf32>
    %154 = math.tanh %153 : vector<16x16xf32>
    %cst_55 = arith.constant 5.000000e+01 : f32
    %155 = vector.broadcast %cst_55 : f32 to vector<16x16xf32>
    %156 = arith.mulf %154, %155 : vector<16x16xf32>
    %cst_56 = arith.constant dense<0xFF800000> : vector<16xf32>
    %157 = vector.multi_reduction <maximumf>, %156, %cst_56 [1] : vector<16x16xf32> to vector<16xf32>
    %158 = vector.shape_cast %157 : vector<16xf32> to vector<16x1xf32>
    %159 = vector.broadcast %158 : vector<16x1xf32> to vector<16x16xf32>
    %160 = arith.subf %156, %159 : vector<16x16xf32>
    %161 = math.exp %160 : vector<16x16xf32>
    %cst_57 = arith.constant dense<0.000000e+00> : vector<16xf32>
    %162 = vector.multi_reduction <add>, %161, %cst_57 [1] : vector<16x16xf32> to vector<16xf32>
    %163 = vector.shape_cast %162 : vector<16xf32> to vector<16x1xf32>
    %164 = tpu.reciprocal %163 {approx = true} : vector<16x1xf32> -> vector<16x1xf32>
    %165 = vector.broadcast %164 : vector<16x1xf32> to vector<16x16xf32>
    %166 = arith.mulf %161, %165 : vector<16x16xf32>
    %167 = vector.extract_strided_slice %80 {offsets = [0, 32], sizes = [16, 16], strides = [1, 1]} : vector<16x64xf32> to vector<16x16xf32>
    %cst_58 = arith.constant dense<0.000000e+00> : vector<16x16xf32>
    %168 = tpu.matmul %166, %167, %cst_58 {dimension_numbers = #tpu.dot_dimension_numbers<[1], [0], [0], [1], [0, 0, 1, 1], [], []>} : vector<16x16xf32>, vector<16x16xf32>, vector<16x16xf32> -> vector<16x16xf32>
    %169 = vector.extract_strided_slice %86 {offsets = [0, 2], sizes = [16, 1], strides = [1, 1]} : vector<16x4xf32> to vector<16x1xf32>
    %170 = vector.broadcast %169 : vector<16x1xf32> to vector<16x16xf32>
    %171 = arith.mulf %168, %170 : vector<16x16xf32>
    %172 = vector.extract_strided_slice %95 {offsets = [32, 0], sizes = [16, 64], strides = [1, 1]} : vector<64x64xf32> to vector<16x64xf32>
    %cst_59 = arith.constant dense<0.000000e+00> : vector<16x64xf32>
    %173 = tpu.matmul %171, %172, %cst_59 {dimension_numbers = #tpu.dot_dimension_numbers<[1], [0], [0], [1], [0, 0, 1, 1], [], []>} : vector<16x16xf32>, vector<16x64xf32>, vector<16x64xf32> -> vector<16x64xf32>
    %174 = arith.addf %148, %173 : vector<16x64xf32>
    %175 = vector.extract_strided_slice %90 {offsets = [0, 48], sizes = [16, 16], strides = [1, 1]} : vector<16x64xf32> to vector<16x16xf32>
    %176 = vector.extract_strided_slice %94 {offsets = [0, 48], sizes = [16, 16], strides = [1, 1]} : vector<16x64xf32> to vector<16x16xf32>
    %cst_60 = arith.constant dense<0.000000e+00> : vector<16x16xf32>
    %177 = tpu.matmul %175, %176, %cst_60 {dimension_numbers = #tpu.dot_dimension_numbers<[1], [1], [0], [0], [0, 0, 1, 0], [], []>} : vector<16x16xf32>, vector<16x16xf32>, vector<16x16xf32> -> vector<16x16xf32>
    %cst_61 = arith.constant 2.000000e-02 : f32
    %178 = vector.broadcast %cst_61 : f32 to vector<16x16xf32>
    %179 = arith.mulf %177, %178 : vector<16x16xf32>
    %180 = math.tanh %179 : vector<16x16xf32>
    %cst_62 = arith.constant 5.000000e+01 : f32
    %181 = vector.broadcast %cst_62 : f32 to vector<16x16xf32>
    %182 = arith.mulf %180, %181 : vector<16x16xf32>
    %cst_63 = arith.constant dense<0xFF800000> : vector<16xf32>
    %183 = vector.multi_reduction <maximumf>, %182, %cst_63 [1] : vector<16x16xf32> to vector<16xf32>
    %184 = vector.shape_cast %183 : vector<16xf32> to vector<16x1xf32>
    %185 = vector.broadcast %184 : vector<16x1xf32> to vector<16x16xf32>
    %186 = arith.subf %182, %185 : vector<16x16xf32>
    %187 = math.exp %186 : vector<16x16xf32>
    %cst_64 = arith.constant dense<0.000000e+00> : vector<16xf32>
    %188 = vector.multi_reduction <add>, %187, %cst_64 [1] : vector<16x16xf32> to vector<16xf32>
    %189 = vector.shape_cast %188 : vector<16xf32> to vector<16x1xf32>
    %190 = tpu.reciprocal %189 {approx = true} : vector<16x1xf32> -> vector<16x1xf32>
    %191 = vector.broadcast %190 : vector<16x1xf32> to vector<16x16xf32>
    %192 = arith.mulf %187, %191 : vector<16x16xf32>
    %193 = vector.extract_strided_slice %80 {offsets = [0, 48], sizes = [16, 16], strides = [1, 1]} : vector<16x64xf32> to vector<16x16xf32>
    %cst_65 = arith.constant dense<0.000000e+00> : vector<16x16xf32>
    %194 = tpu.matmul %192, %193, %cst_65 {dimension_numbers = #tpu.dot_dimension_numbers<[1], [0], [0], [1], [0, 0, 1, 1], [], []>} : vector<16x16xf32>, vector<16x16xf32>, vector<16x16xf32> -> vector<16x16xf32>
    %195 = vector.extract_strided_slice %86 {offsets = [0, 3], sizes = [16, 1], strides = [1, 1]} : vector<16x4xf32> to vector<16x1xf32>
    %196 = vector.broadcast %195 : vector<16x1xf32> to vector<16x16xf32>
    %197 = arith.mulf %194, %196 : vector<16x16xf32>
    %198 = vector.extract_strided_slice %95 {offsets = [48, 0], sizes = [16, 64], strides = [1, 1]} : vector<64x64xf32> to vector<16x64xf32>
    %cst_66 = arith.constant dense<0.000000e+00> : vector<16x64xf32>
    %199 = tpu.matmul %197, %198, %cst_66 {dimension_numbers = #tpu.dot_dimension_numbers<[1], [0], [0], [1], [0, 0, 1, 1], [], []>} : vector<16x16xf32>, vector<16x64xf32>, vector<16x64xf32> -> vector<16x64xf32>
    %200 = arith.addf %174, %199 : vector<16x64xf32>
    %201 = arith.addf %200, %61 : vector<16x64xf32>
    %c0_67 = arith.constant 0 : index
    %c0_68 = arith.constant 0 : index
    %202 = vector.load %arg13[%c0_67, %c0_68] : memref<1x64xf32, #tpu.memory_space<vmem>>, vector<1x64xf32>
    %203 = arith.mulf %201, %201 : vector<16x64xf32>
    %cst_69 = arith.constant dense<0.000000e+00> : vector<16xf32>
    %204 = vector.multi_reduction <add>, %203, %cst_69 [1] : vector<16x64xf32> to vector<16xf32>
    %205 = vector.shape_cast %204 : vector<16xf32> to vector<16x1xf32>
    %cst_70 = arith.constant 1.000000e-24 : f32
    %206 = vector.broadcast %cst_70 : f32 to vector<16x1xf32>
    %207 = arith.maximumf %205, %206 : vector<16x1xf32>
    %208 = math.rsqrt %207 : vector<16x1xf32>
    %209 = vector.broadcast %208 : vector<16x1xf32> to vector<16x64xf32>
    %210 = arith.mulf %201, %209 : vector<16x64xf32>
    %211 = vector.broadcast %202 : vector<1x64xf32> to vector<16x64xf32>
    %212 = arith.mulf %210, %211 : vector<16x64xf32>
    %c0_71 = arith.constant 0 : index
    %c0_72 = arith.constant 0 : index
    %213 = vector.load %arg14[%c0_71, %c0_72] : memref<64x512xf32, #tpu.memory_space<vmem>>, vector<64x512xf32>
    %cst_73 = arith.constant dense<0.000000e+00> : vector<16x512xf32>
    %214 = tpu.matmul %212, %213, %cst_73 {dimension_numbers = #tpu.dot_dimension_numbers<[1], [0], [0], [1], [0, 0, 1, 1], [], []>} : vector<16x64xf32>, vector<64x512xf32>, vector<16x512xf32> -> vector<16x512xf32>
    %c0_74 = arith.constant 0 : index
    %c0_75 = arith.constant 0 : index
    %215 = vector.load %arg15[%c0_74, %c0_75] : memref<1x512xf32, #tpu.memory_space<vmem>>, vector<1x512xf32>
    %216 = vector.broadcast %215 : vector<1x512xf32> to vector<16x512xf32>
    %217 = arith.addf %214, %216 : vector<16x512xf32>
    %218 = vector.extract_strided_slice %217 {offsets = [0, 0], sizes = [16, 256], strides = [1, 1]} : vector<16x512xf32> to vector<16x256xf32>
    %219 = vector.extract_strided_slice %217 {offsets = [0, 256], sizes = [16, 256], strides = [1, 1]} : vector<16x512xf32> to vector<16x256xf32>
    %220 = arith.mulf %219, %219 : vector<16x256xf32>
    %221 = arith.mulf %219, %220 : vector<16x256xf32>
    %cst_76 = arith.constant 4.471500e-02 : f32
    %222 = vector.broadcast %cst_76 : f32 to vector<16x256xf32>
    %223 = arith.mulf %222, %221 : vector<16x256xf32>
    %224 = arith.addf %219, %223 : vector<16x256xf32>
    %cst_77 = arith.constant 0.797884583 : f32
    %225 = vector.broadcast %cst_77 : f32 to vector<16x256xf32>
    %226 = arith.mulf %225, %224 : vector<16x256xf32>
    %227 = math.tanh %226 : vector<16x256xf32>
    %cst_78 = arith.constant 1.000000e+00 : f32
    %228 = vector.broadcast %cst_78 : f32 to vector<16x256xf32>
    %229 = arith.addf %228, %227 : vector<16x256xf32>
    %cst_79 = arith.constant 5.000000e-01 : f32
    %230 = vector.broadcast %cst_79 : f32 to vector<16x256xf32>
    %231 = arith.mulf %230, %229 : vector<16x256xf32>
    %232 = arith.mulf %219, %231 : vector<16x256xf32>
    %233 = arith.mulf %218, %232 : vector<16x256xf32>
    %c0_80 = arith.constant 0 : index
    %c0_81 = arith.constant 0 : index
    %234 = vector.load %arg16[%c0_80, %c0_81] : memref<256x64xf32, #tpu.memory_space<vmem>>, vector<256x64xf32>
    %cst_82 = arith.constant dense<0.000000e+00> : vector<16x64xf32>
    %235 = tpu.matmul %233, %234, %cst_82 {dimension_numbers = #tpu.dot_dimension_numbers<[1], [0], [0], [1], [0, 0, 1, 1], [], []>} : vector<16x256xf32>, vector<256x64xf32>, vector<16x64xf32> -> vector<16x64xf32>
    %c0_83 = arith.constant 0 : index
    %c0_84 = arith.constant 0 : index
    %236 = vector.load %arg17[%c0_83, %c0_84] : memref<1x64xf32, #tpu.memory_space<vmem>>, vector<1x64xf32>
    %237 = vector.broadcast %236 : vector<1x64xf32> to vector<16x64xf32>
    %238 = arith.addf %235, %237 : vector<16x64xf32>
    %239 = arith.addf %238, %201 : vector<16x64xf32>
    %240 = tpu.concatenate %239, %61 in 1 : vector<16x64xf32>, vector<16x64xf32> -> vector<16x128xf32>
    %c0_85 = arith.constant 0 : index
    %c0_86 = arith.constant 0 : index
    %241 = vector.load %arg27[%c0_85, %c0_86] : memref<128x64xf32, #tpu.memory_space<vmem>>, vector<128x64xf32>
    %cst_87 = arith.constant dense<0.000000e+00> : vector<16x64xf32>
    %242 = tpu.matmul %240, %241, %cst_87 {dimension_numbers = #tpu.dot_dimension_numbers<[1], [0], [0], [1], [0, 0, 1, 1], [], []>} : vector<16x128xf32>, vector<128x64xf32>, vector<16x64xf32> -> vector<16x64xf32>
    %c0_88 = arith.constant 0 : index
    %c0_89 = arith.constant 0 : index
    %243 = vector.load %arg18[%c0_88, %c0_89] : memref<1x64xf32, #tpu.memory_space<vmem>>, vector<1x64xf32>
    %244 = arith.mulf %242, %242 : vector<16x64xf32>
    %cst_90 = arith.constant dense<0.000000e+00> : vector<16xf32>
    %245 = vector.multi_reduction <add>, %244, %cst_90 [1] : vector<16x64xf32> to vector<16xf32>
    %246 = vector.shape_cast %245 : vector<16xf32> to vector<16x1xf32>
    %cst_91 = arith.constant 1.000000e-24 : f32
    %247 = vector.broadcast %cst_91 : f32 to vector<16x1xf32>
    %248 = arith.maximumf %246, %247 : vector<16x1xf32>
    %249 = math.rsqrt %248 : vector<16x1xf32>
    %250 = vector.broadcast %249 : vector<16x1xf32> to vector<16x64xf32>
    %251 = arith.mulf %242, %250 : vector<16x64xf32>
    %252 = vector.broadcast %243 : vector<1x64xf32> to vector<16x64xf32>
    %253 = arith.mulf %251, %252 : vector<16x64xf32>
    %c0_92 = arith.constant 0 : index
    %c0_93 = arith.constant 0 : index
    %254 = vector.load %arg19[%c0_92, %c0_93] : memref<64x196xf32, #tpu.memory_space<vmem>>, vector<64x196xf32>
    %cst_94 = arith.constant dense<0.000000e+00> : vector<16x196xf32>
    %255 = tpu.matmul %253, %254, %cst_94 {dimension_numbers = #tpu.dot_dimension_numbers<[1], [0], [0], [1], [0, 0, 1, 1], [], []>} : vector<16x64xf32>, vector<64x196xf32>, vector<16x196xf32> -> vector<16x196xf32>
    %c0_95 = arith.constant 0 : index
    %c0_96 = arith.constant 0 : index
    %256 = vector.load %arg20[%c0_95, %c0_96] : memref<1x196xf32, #tpu.memory_space<vmem>>, vector<1x196xf32>
    %257 = vector.broadcast %256 : vector<1x196xf32> to vector<16x196xf32>
    %258 = arith.addf %255, %257 : vector<16x196xf32>
    %259 = vector.extract_strided_slice %258 {offsets = [0, 0], sizes = [16, 64], strides = [1, 1]} : vector<16x196xf32> to vector<16x64xf32>
    %260 = vector.extract_strided_slice %258 {offsets = [0, 64], sizes = [16, 64], strides = [1, 1]} : vector<16x196xf32> to vector<16x64xf32>
    %261 = vector.extract_strided_slice %258 {offsets = [0, 128], sizes = [16, 64], strides = [1, 1]} : vector<16x196xf32> to vector<16x64xf32>
    %262 = vector.extract_strided_slice %258 {offsets = [0, 192], sizes = [16, 4], strides = [1, 1]} : vector<16x196xf32> to vector<16x4xf32>
    %263 = arith.negf %262 : vector<16x4xf32>
    %264 = math.exp %263 : vector<16x4xf32>
    %cst_97 = arith.constant 1.000000e+00 : f32
    %265 = vector.broadcast %cst_97 : f32 to vector<16x4xf32>
    %266 = arith.addf %265, %264 : vector<16x4xf32>
    %267 = arith.divf %265, %266 : vector<16x4xf32>
    %268 = arith.mulf %259, %2 : vector<16x64xf32>
    %cst_98 = arith.constant dense<0.000000e+00> : vector<16x64xf32>
    %269 = tpu.matmul %259, %4, %cst_98 {dimension_numbers = #tpu.dot_dimension_numbers<[1], [0], [0], [1], [0, 0, 1, 1], [], []>} : vector<16x64xf32>, vector<64x64xf32>, vector<16x64xf32> -> vector<16x64xf32>
    %270 = arith.mulf %269, %3 : vector<16x64xf32>
    %271 = arith.addf %268, %270 : vector<16x64xf32>
    %272 = arith.mulf %260, %2 : vector<16x64xf32>
    %cst_99 = arith.constant dense<0.000000e+00> : vector<16x64xf32>
    %273 = tpu.matmul %260, %4, %cst_99 {dimension_numbers = #tpu.dot_dimension_numbers<[1], [0], [0], [1], [0, 0, 1, 1], [], []>} : vector<16x64xf32>, vector<64x64xf32>, vector<16x64xf32> -> vector<16x64xf32>
    %274 = arith.mulf %273, %3 : vector<16x64xf32>
    %275 = arith.addf %272, %274 : vector<16x64xf32>
    %c0_100 = arith.constant 0 : index
    %c0_101 = arith.constant 0 : index
    %276 = vector.load %arg21[%c0_100, %c0_101] : memref<64x64xf32, #tpu.memory_space<vmem>>, vector<64x64xf32>
    %cst_102 = arith.constant 0.000000e+00 : f32
    %277 = vector.broadcast %cst_102 : f32 to vector<16x64xf32>
    %278 = vector.extract_strided_slice %271 {offsets = [0, 0], sizes = [16, 16], strides = [1, 1]} : vector<16x64xf32> to vector<16x16xf32>
    %279 = vector.extract_strided_slice %275 {offsets = [0, 0], sizes = [16, 16], strides = [1, 1]} : vector<16x64xf32> to vector<16x16xf32>
    %cst_103 = arith.constant dense<0.000000e+00> : vector<16x16xf32>
    %280 = tpu.matmul %278, %279, %cst_103 {dimension_numbers = #tpu.dot_dimension_numbers<[1], [1], [0], [0], [0, 0, 1, 0], [], []>} : vector<16x16xf32>, vector<16x16xf32>, vector<16x16xf32> -> vector<16x16xf32>
    %cst_104 = arith.constant 2.000000e-02 : f32
    %281 = vector.broadcast %cst_104 : f32 to vector<16x16xf32>
    %282 = arith.mulf %280, %281 : vector<16x16xf32>
    %283 = math.tanh %282 : vector<16x16xf32>
    %cst_105 = arith.constant 5.000000e+01 : f32
    %284 = vector.broadcast %cst_105 : f32 to vector<16x16xf32>
    %285 = arith.mulf %283, %284 : vector<16x16xf32>
    %cst_106 = arith.constant dense<0xFF800000> : vector<16xf32>
    %286 = vector.multi_reduction <maximumf>, %285, %cst_106 [1] : vector<16x16xf32> to vector<16xf32>
    %287 = vector.shape_cast %286 : vector<16xf32> to vector<16x1xf32>
    %288 = vector.broadcast %287 : vector<16x1xf32> to vector<16x16xf32>
    %289 = arith.subf %285, %288 : vector<16x16xf32>
    %290 = math.exp %289 : vector<16x16xf32>
    %cst_107 = arith.constant dense<0.000000e+00> : vector<16xf32>
    %291 = vector.multi_reduction <add>, %290, %cst_107 [1] : vector<16x16xf32> to vector<16xf32>
    %292 = vector.shape_cast %291 : vector<16xf32> to vector<16x1xf32>
    %293 = tpu.reciprocal %292 {approx = true} : vector<16x1xf32> -> vector<16x1xf32>
    %294 = vector.broadcast %293 : vector<16x1xf32> to vector<16x16xf32>
    %295 = arith.mulf %290, %294 : vector<16x16xf32>
    %296 = vector.extract_strided_slice %261 {offsets = [0, 0], sizes = [16, 16], strides = [1, 1]} : vector<16x64xf32> to vector<16x16xf32>
    %cst_108 = arith.constant dense<0.000000e+00> : vector<16x16xf32>
    %297 = tpu.matmul %295, %296, %cst_108 {dimension_numbers = #tpu.dot_dimension_numbers<[1], [0], [0], [1], [0, 0, 1, 1], [], []>} : vector<16x16xf32>, vector<16x16xf32>, vector<16x16xf32> -> vector<16x16xf32>
    %298 = vector.extract_strided_slice %267 {offsets = [0, 0], sizes = [16, 1], strides = [1, 1]} : vector<16x4xf32> to vector<16x1xf32>
    %299 = vector.broadcast %298 : vector<16x1xf32> to vector<16x16xf32>
    %300 = arith.mulf %297, %299 : vector<16x16xf32>
    %301 = vector.extract_strided_slice %276 {offsets = [0, 0], sizes = [16, 64], strides = [1, 1]} : vector<64x64xf32> to vector<16x64xf32>
    %cst_109 = arith.constant dense<0.000000e+00> : vector<16x64xf32>
    %302 = tpu.matmul %300, %301, %cst_109 {dimension_numbers = #tpu.dot_dimension_numbers<[1], [0], [0], [1], [0, 0, 1, 1], [], []>} : vector<16x16xf32>, vector<16x64xf32>, vector<16x64xf32> -> vector<16x64xf32>
    %303 = arith.addf %277, %302 : vector<16x64xf32>
    %304 = vector.extract_strided_slice %271 {offsets = [0, 16], sizes = [16, 16], strides = [1, 1]} : vector<16x64xf32> to vector<16x16xf32>
    %305 = vector.extract_strided_slice %275 {offsets = [0, 16], sizes = [16, 16], strides = [1, 1]} : vector<16x64xf32> to vector<16x16xf32>
    %cst_110 = arith.constant dense<0.000000e+00> : vector<16x16xf32>
    %306 = tpu.matmul %304, %305, %cst_110 {dimension_numbers = #tpu.dot_dimension_numbers<[1], [1], [0], [0], [0, 0, 1, 0], [], []>} : vector<16x16xf32>, vector<16x16xf32>, vector<16x16xf32> -> vector<16x16xf32>
    %cst_111 = arith.constant 2.000000e-02 : f32
    %307 = vector.broadcast %cst_111 : f32 to vector<16x16xf32>
    %308 = arith.mulf %306, %307 : vector<16x16xf32>
    %309 = math.tanh %308 : vector<16x16xf32>
    %cst_112 = arith.constant 5.000000e+01 : f32
    %310 = vector.broadcast %cst_112 : f32 to vector<16x16xf32>
    %311 = arith.mulf %309, %310 : vector<16x16xf32>
    %cst_113 = arith.constant dense<0xFF800000> : vector<16xf32>
    %312 = vector.multi_reduction <maximumf>, %311, %cst_113 [1] : vector<16x16xf32> to vector<16xf32>
    %313 = vector.shape_cast %312 : vector<16xf32> to vector<16x1xf32>
    %314 = vector.broadcast %313 : vector<16x1xf32> to vector<16x16xf32>
    %315 = arith.subf %311, %314 : vector<16x16xf32>
    %316 = math.exp %315 : vector<16x16xf32>
    %cst_114 = arith.constant dense<0.000000e+00> : vector<16xf32>
    %317 = vector.multi_reduction <add>, %316, %cst_114 [1] : vector<16x16xf32> to vector<16xf32>
    %318 = vector.shape_cast %317 : vector<16xf32> to vector<16x1xf32>
    %319 = tpu.reciprocal %318 {approx = true} : vector<16x1xf32> -> vector<16x1xf32>
    %320 = vector.broadcast %319 : vector<16x1xf32> to vector<16x16xf32>
    %321 = arith.mulf %316, %320 : vector<16x16xf32>
    %322 = vector.extract_strided_slice %261 {offsets = [0, 16], sizes = [16, 16], strides = [1, 1]} : vector<16x64xf32> to vector<16x16xf32>
    %cst_115 = arith.constant dense<0.000000e+00> : vector<16x16xf32>
    %323 = tpu.matmul %321, %322, %cst_115 {dimension_numbers = #tpu.dot_dimension_numbers<[1], [0], [0], [1], [0, 0, 1, 1], [], []>} : vector<16x16xf32>, vector<16x16xf32>, vector<16x16xf32> -> vector<16x16xf32>
    %324 = vector.extract_strided_slice %267 {offsets = [0, 1], sizes = [16, 1], strides = [1, 1]} : vector<16x4xf32> to vector<16x1xf32>
    %325 = vector.broadcast %324 : vector<16x1xf32> to vector<16x16xf32>
    %326 = arith.mulf %323, %325 : vector<16x16xf32>
    %327 = vector.extract_strided_slice %276 {offsets = [16, 0], sizes = [16, 64], strides = [1, 1]} : vector<64x64xf32> to vector<16x64xf32>
    %cst_116 = arith.constant dense<0.000000e+00> : vector<16x64xf32>
    %328 = tpu.matmul %326, %327, %cst_116 {dimension_numbers = #tpu.dot_dimension_numbers<[1], [0], [0], [1], [0, 0, 1, 1], [], []>} : vector<16x16xf32>, vector<16x64xf32>, vector<16x64xf32> -> vector<16x64xf32>
    %329 = arith.addf %303, %328 : vector<16x64xf32>
    %330 = vector.extract_strided_slice %271 {offsets = [0, 32], sizes = [16, 16], strides = [1, 1]} : vector<16x64xf32> to vector<16x16xf32>
    %331 = vector.extract_strided_slice %275 {offsets = [0, 32], sizes = [16, 16], strides = [1, 1]} : vector<16x64xf32> to vector<16x16xf32>
    %cst_117 = arith.constant dense<0.000000e+00> : vector<16x16xf32>
    %332 = tpu.matmul %330, %331, %cst_117 {dimension_numbers = #tpu.dot_dimension_numbers<[1], [1], [0], [0], [0, 0, 1, 0], [], []>} : vector<16x16xf32>, vector<16x16xf32>, vector<16x16xf32> -> vector<16x16xf32>
    %cst_118 = arith.constant 2.000000e-02 : f32
    %333 = vector.broadcast %cst_118 : f32 to vector<16x16xf32>
    %334 = arith.mulf %332, %333 : vector<16x16xf32>
    %335 = math.tanh %334 : vector<16x16xf32>
    %cst_119 = arith.constant 5.000000e+01 : f32
    %336 = vector.broadcast %cst_119 : f32 to vector<16x16xf32>
    %337 = arith.mulf %335, %336 : vector<16x16xf32>
    %cst_120 = arith.constant dense<0xFF800000> : vector<16xf32>
    %338 = vector.multi_reduction <maximumf>, %337, %cst_120 [1] : vector<16x16xf32> to vector<16xf32>
    %339 = vector.shape_cast %338 : vector<16xf32> to vector<16x1xf32>
    %340 = vector.broadcast %339 : vector<16x1xf32> to vector<16x16xf32>
    %341 = arith.subf %337, %340 : vector<16x16xf32>
    %342 = math.exp %341 : vector<16x16xf32>
    %cst_121 = arith.constant dense<0.000000e+00> : vector<16xf32>
    %343 = vector.multi_reduction <add>, %342, %cst_121 [1] : vector<16x16xf32> to vector<16xf32>
    %344 = vector.shape_cast %343 : vector<16xf32> to vector<16x1xf32>
    %345 = tpu.reciprocal %344 {approx = true} : vector<16x1xf32> -> vector<16x1xf32>
    %346 = vector.broadcast %345 : vector<16x1xf32> to vector<16x16xf32>
    %347 = arith.mulf %342, %346 : vector<16x16xf32>
    %348 = vector.extract_strided_slice %261 {offsets = [0, 32], sizes = [16, 16], strides = [1, 1]} : vector<16x64xf32> to vector<16x16xf32>
    %cst_122 = arith.constant dense<0.000000e+00> : vector<16x16xf32>
    %349 = tpu.matmul %347, %348, %cst_122 {dimension_numbers = #tpu.dot_dimension_numbers<[1], [0], [0], [1], [0, 0, 1, 1], [], []>} : vector<16x16xf32>, vector<16x16xf32>, vector<16x16xf32> -> vector<16x16xf32>
    %350 = vector.extract_strided_slice %267 {offsets = [0, 2], sizes = [16, 1], strides = [1, 1]} : vector<16x4xf32> to vector<16x1xf32>
    %351 = vector.broadcast %350 : vector<16x1xf32> to vector<16x16xf32>
    %352 = arith.mulf %349, %351 : vector<16x16xf32>
    %353 = vector.extract_strided_slice %276 {offsets = [32, 0], sizes = [16, 64], strides = [1, 1]} : vector<64x64xf32> to vector<16x64xf32>
    %cst_123 = arith.constant dense<0.000000e+00> : vector<16x64xf32>
    %354 = tpu.matmul %352, %353, %cst_123 {dimension_numbers = #tpu.dot_dimension_numbers<[1], [0], [0], [1], [0, 0, 1, 1], [], []>} : vector<16x16xf32>, vector<16x64xf32>, vector<16x64xf32> -> vector<16x64xf32>
    %355 = arith.addf %329, %354 : vector<16x64xf32>
    %356 = vector.extract_strided_slice %271 {offsets = [0, 48], sizes = [16, 16], strides = [1, 1]} : vector<16x64xf32> to vector<16x16xf32>
    %357 = vector.extract_strided_slice %275 {offsets = [0, 48], sizes = [16, 16], strides = [1, 1]} : vector<16x64xf32> to vector<16x16xf32>
    %cst_124 = arith.constant dense<0.000000e+00> : vector<16x16xf32>
    %358 = tpu.matmul %356, %357, %cst_124 {dimension_numbers = #tpu.dot_dimension_numbers<[1], [1], [0], [0], [0, 0, 1, 0], [], []>} : vector<16x16xf32>, vector<16x16xf32>, vector<16x16xf32> -> vector<16x16xf32>
    %cst_125 = arith.constant 2.000000e-02 : f32
    %359 = vector.broadcast %cst_125 : f32 to vector<16x16xf32>
    %360 = arith.mulf %358, %359 : vector<16x16xf32>
    %361 = math.tanh %360 : vector<16x16xf32>
    %cst_126 = arith.constant 5.000000e+01 : f32
    %362 = vector.broadcast %cst_126 : f32 to vector<16x16xf32>
    %363 = arith.mulf %361, %362 : vector<16x16xf32>
    %cst_127 = arith.constant dense<0xFF800000> : vector<16xf32>
    %364 = vector.multi_reduction <maximumf>, %363, %cst_127 [1] : vector<16x16xf32> to vector<16xf32>
    %365 = vector.shape_cast %364 : vector<16xf32> to vector<16x1xf32>
    %366 = vector.broadcast %365 : vector<16x1xf32> to vector<16x16xf32>
    %367 = arith.subf %363, %366 : vector<16x16xf32>
    %368 = math.exp %367 : vector<16x16xf32>
    %cst_128 = arith.constant dense<0.000000e+00> : vector<16xf32>
    %369 = vector.multi_reduction <add>, %368, %cst_128 [1] : vector<16x16xf32> to vector<16xf32>
    %370 = vector.shape_cast %369 : vector<16xf32> to vector<16x1xf32>
    %371 = tpu.reciprocal %370 {approx = true} : vector<16x1xf32> -> vector<16x1xf32>
    %372 = vector.broadcast %371 : vector<16x1xf32> to vector<16x16xf32>
    %373 = arith.mulf %368, %372 : vector<16x16xf32>
    %374 = vector.extract_strided_slice %261 {offsets = [0, 48], sizes = [16, 16], strides = [1, 1]} : vector<16x64xf32> to vector<16x16xf32>
    %cst_129 = arith.constant dense<0.000000e+00> : vector<16x16xf32>
    %375 = tpu.matmul %373, %374, %cst_129 {dimension_numbers = #tpu.dot_dimension_numbers<[1], [0], [0], [1], [0, 0, 1, 1], [], []>} : vector<16x16xf32>, vector<16x16xf32>, vector<16x16xf32> -> vector<16x16xf32>
    %376 = vector.extract_strided_slice %267 {offsets = [0, 3], sizes = [16, 1], strides = [1, 1]} : vector<16x4xf32> to vector<16x1xf32>
    %377 = vector.broadcast %376 : vector<16x1xf32> to vector<16x16xf32>
    %378 = arith.mulf %375, %377 : vector<16x16xf32>
    %379 = vector.extract_strided_slice %276 {offsets = [48, 0], sizes = [16, 64], strides = [1, 1]} : vector<64x64xf32> to vector<16x64xf32>
    %cst_130 = arith.constant dense<0.000000e+00> : vector<16x64xf32>
    %380 = tpu.matmul %378, %379, %cst_130 {dimension_numbers = #tpu.dot_dimension_numbers<[1], [0], [0], [1], [0, 0, 1, 1], [], []>} : vector<16x16xf32>, vector<16x64xf32>, vector<16x64xf32> -> vector<16x64xf32>
    %381 = arith.addf %355, %380 : vector<16x64xf32>
    %382 = arith.addf %381, %242 : vector<16x64xf32>
    %c0_131 = arith.constant 0 : index
    %c0_132 = arith.constant 0 : index
    %383 = vector.load %arg22[%c0_131, %c0_132] : memref<1x64xf32, #tpu.memory_space<vmem>>, vector<1x64xf32>
    %384 = arith.mulf %382, %382 : vector<16x64xf32>
    %cst_133 = arith.constant dense<0.000000e+00> : vector<16xf32>
    %385 = vector.multi_reduction <add>, %384, %cst_133 [1] : vector<16x64xf32> to vector<16xf32>
    %386 = vector.shape_cast %385 : vector<16xf32> to vector<16x1xf32>
    %cst_134 = arith.constant 1.000000e-24 : f32
    %387 = vector.broadcast %cst_134 : f32 to vector<16x1xf32>
    %388 = arith.maximumf %386, %387 : vector<16x1xf32>
    %389 = math.rsqrt %388 : vector<16x1xf32>
    %390 = vector.broadcast %389 : vector<16x1xf32> to vector<16x64xf32>
    %391 = arith.mulf %382, %390 : vector<16x64xf32>
    %392 = vector.broadcast %383 : vector<1x64xf32> to vector<16x64xf32>
    %393 = arith.mulf %391, %392 : vector<16x64xf32>
    %c0_135 = arith.constant 0 : index
    %c0_136 = arith.constant 0 : index
    %394 = vector.load %arg23[%c0_135, %c0_136] : memref<64x512xf32, #tpu.memory_space<vmem>>, vector<64x512xf32>
    %cst_137 = arith.constant dense<0.000000e+00> : vector<16x512xf32>
    %395 = tpu.matmul %393, %394, %cst_137 {dimension_numbers = #tpu.dot_dimension_numbers<[1], [0], [0], [1], [0, 0, 1, 1], [], []>} : vector<16x64xf32>, vector<64x512xf32>, vector<16x512xf32> -> vector<16x512xf32>
    %c0_138 = arith.constant 0 : index
    %c0_139 = arith.constant 0 : index
    %396 = vector.load %arg24[%c0_138, %c0_139] : memref<1x512xf32, #tpu.memory_space<vmem>>, vector<1x512xf32>
    %397 = vector.broadcast %396 : vector<1x512xf32> to vector<16x512xf32>
    %398 = arith.addf %395, %397 : vector<16x512xf32>
    %399 = vector.extract_strided_slice %398 {offsets = [0, 0], sizes = [16, 256], strides = [1, 1]} : vector<16x512xf32> to vector<16x256xf32>
    %400 = vector.extract_strided_slice %398 {offsets = [0, 256], sizes = [16, 256], strides = [1, 1]} : vector<16x512xf32> to vector<16x256xf32>
    %401 = arith.mulf %400, %400 : vector<16x256xf32>
    %402 = arith.mulf %400, %401 : vector<16x256xf32>
    %cst_140 = arith.constant 4.471500e-02 : f32
    %403 = vector.broadcast %cst_140 : f32 to vector<16x256xf32>
    %404 = arith.mulf %403, %402 : vector<16x256xf32>
    %405 = arith.addf %400, %404 : vector<16x256xf32>
    %cst_141 = arith.constant 0.797884583 : f32
    %406 = vector.broadcast %cst_141 : f32 to vector<16x256xf32>
    %407 = arith.mulf %406, %405 : vector<16x256xf32>
    %408 = math.tanh %407 : vector<16x256xf32>
    %cst_142 = arith.constant 1.000000e+00 : f32
    %409 = vector.broadcast %cst_142 : f32 to vector<16x256xf32>
    %410 = arith.addf %409, %408 : vector<16x256xf32>
    %cst_143 = arith.constant 5.000000e-01 : f32
    %411 = vector.broadcast %cst_143 : f32 to vector<16x256xf32>
    %412 = arith.mulf %411, %410 : vector<16x256xf32>
    %413 = arith.mulf %400, %412 : vector<16x256xf32>
    %414 = arith.mulf %399, %413 : vector<16x256xf32>
    %c0_144 = arith.constant 0 : index
    %c0_145 = arith.constant 0 : index
    %415 = vector.load %arg25[%c0_144, %c0_145] : memref<256x64xf32, #tpu.memory_space<vmem>>, vector<256x64xf32>
    %cst_146 = arith.constant dense<0.000000e+00> : vector<16x64xf32>
    %416 = tpu.matmul %414, %415, %cst_146 {dimension_numbers = #tpu.dot_dimension_numbers<[1], [0], [0], [1], [0, 0, 1, 1], [], []>} : vector<16x256xf32>, vector<256x64xf32>, vector<16x64xf32> -> vector<16x64xf32>
    %c0_147 = arith.constant 0 : index
    %c0_148 = arith.constant 0 : index
    %417 = vector.load %arg26[%c0_147, %c0_148] : memref<1x64xf32, #tpu.memory_space<vmem>>, vector<1x64xf32>
    %418 = vector.broadcast %417 : vector<1x64xf32> to vector<16x64xf32>
    %419 = arith.addf %416, %418 : vector<16x64xf32>
    %420 = arith.addf %419, %382 : vector<16x64xf32>
    %c0_149 = arith.constant 0 : index
    %c0_150 = arith.constant 0 : index
    %421 = vector.load %arg8[%c0_149, %c0_150] : memref<1x64xf32, #tpu.memory_space<vmem>>, vector<1x64xf32>
    %422 = arith.mulf %420, %420 : vector<16x64xf32>
    %cst_151 = arith.constant dense<0.000000e+00> : vector<16xf32>
    %423 = vector.multi_reduction <add>, %422, %cst_151 [1] : vector<16x64xf32> to vector<16xf32>
    %424 = vector.shape_cast %423 : vector<16xf32> to vector<16x1xf32>
    %cst_152 = arith.constant 1.000000e-24 : f32
    %425 = vector.broadcast %cst_152 : f32 to vector<16x1xf32>
    %426 = arith.maximumf %424, %425 : vector<16x1xf32>
    %427 = math.rsqrt %426 : vector<16x1xf32>
    %428 = vector.broadcast %427 : vector<16x1xf32> to vector<16x64xf32>
    %429 = arith.mulf %420, %428 : vector<16x64xf32>
    %430 = vector.broadcast %421 : vector<1x64xf32> to vector<16x64xf32>
    %431 = arith.mulf %429, %430 : vector<16x64xf32>
    %c0_153 = arith.constant 0 : index
    %c0_154 = arith.constant 0 : index
    %c0_155 = arith.constant 0 : index
    %432 = vector.load %arg28[%c0_153, %c0_154, %c0_155] : memref<1x16x64xf32, #tpu.memory_space<vmem>>, vector<1x16x64xf32>
    %433 = vector.shape_cast %432 : vector<1x16x64xf32> to vector<16x64xf32>
    %434 = vector.shape_cast %431 : vector<16x64xf32> to vector<1x16x64xf32>
    tpu.vector_store %arg28[%c0_153, %c0_154, %c0_155], %434 {strides = array<i32>} : memref<1x16x64xf32, #tpu.memory_space<vmem>>, vector<1x16x64xf32>,
    return
  }
  func.func @transform_0(%arg0: i32) -> (i32, i32, i32) {
    %c0_i32 = arith.constant 0 : i32
    %c0_i32_0 = arith.constant 0 : i32
    %c0_i32_1 = arith.constant 0 : i32
    return %arg0, %c0_i32, %c0_i32_0 : i32, i32, i32
  }
  func.func @transform_1(%arg0: i32) -> (i32, i32) {
    %c0_i32 = arith.constant 0 : i32
    %c0_i32_0 = arith.constant 0 : i32
    %c0_i32_1 = arith.constant 0 : i32
    return %c0_i32, %c0_i32_0 : i32, i32
  }
  func.func @transform_2(%arg0: i32) -> (i32, i32) {
    %c0_i32 = arith.constant 0 : i32
    %c0_i32_0 = arith.constant 0 : i32
    %c0_i32_1 = arith.constant 0 : i32
    return %c0_i32, %c0_i32_0 : i32, i32
  }
  func.func @transform_3(%arg0: i32) -> (i32, i32) {
    %c0_i32 = arith.constant 0 : i32
    %c0_i32_0 = arith.constant 0 : i32
    %c0_i32_1 = arith.constant 0 : i32
    return %c0_i32, %c0_i32_0 : i32, i32
  }
  func.func @transform_4(%arg0: i32) -> (i32, i32) {
    %c0_i32 = arith.constant 0 : i32
    %c0_i32_0 = arith.constant 0 : i32
    %c0_i32_1 = arith.constant 0 : i32
    return %c0_i32, %c0_i32_0 : i32, i32
  }
  func.func @transform_5(%arg0: i32) -> (i32, i32) {
    %c0_i32 = arith.constant 0 : i32
    %c0_i32_0 = arith.constant 0 : i32
    %c0_i32_1 = arith.constant 0 : i32
    return %c0_i32, %c0_i32_0 : i32, i32
  }
  func.func @transform_6(%arg0: i32) -> (i32, i32) {
    %c0_i32 = arith.constant 0 : i32
    %c0_i32_0 = arith.constant 0 : i32
    %c0_i32_1 = arith.constant 0 : i32
    return %c0_i32, %c0_i32_0 : i32, i32
  }
  func.func @transform_7(%arg0: i32) -> (i32, i32) {
    %c0_i32 = arith.constant 0 : i32
    %c0_i32_0 = arith.constant 0 : i32
    %c0_i32_1 = arith.constant 0 : i32
    return %c0_i32, %c0_i32_0 : i32, i32
  }
  func.func @transform_8(%arg0: i32) -> (i32, i32) {
    %c0_i32 = arith.constant 0 : i32
    %c0_i32_0 = arith.constant 0 : i32
    %c0_i32_1 = arith.constant 0 : i32
    return %c0_i32, %c0_i32_0 : i32, i32
  }
  func.func @transform_9(%arg0: i32) -> (i32, i32) {
    %c0_i32 = arith.constant 0 : i32
    %c0_i32_0 = arith.constant 0 : i32
    %c0_i32_1 = arith.constant 0 : i32
    return %c0_i32, %c0_i32_0 : i32, i32
  }
  func.func @transform_10(%arg0: i32) -> (i32, i32) {
    %c0_i32 = arith.constant 0 : i32
    %c0_i32_0 = arith.constant 0 : i32
    %c0_i32_1 = arith.constant 0 : i32
    return %c0_i32, %c0_i32_0 : i32, i32
  }
  func.func @transform_11(%arg0: i32) -> (i32, i32) {
    %c0_i32 = arith.constant 0 : i32
    %c0_i32_0 = arith.constant 0 : i32
    %c0_i32_1 = arith.constant 0 : i32
    return %c0_i32, %c0_i32_0 : i32, i32
  }
  func.func @transform_12(%arg0: i32) -> (i32, i32) {
    %c0_i32 = arith.constant 0 : i32
    %c0_i32_0 = arith.constant 0 : i32
    %c0_i32_1 = arith.constant 0 : i32
    return %c0_i32, %c0_i32_0 : i32, i32
  }
  func.func @transform_13(%arg0: i32) -> (i32, i32) {
    %c0_i32 = arith.constant 0 : i32
    %c0_i32_0 = arith.constant 0 : i32
    %c0_i32_1 = arith.constant 0 : i32
    return %c0_i32, %c0_i32_0 : i32, i32
  }
  func.func @transform_14(%arg0: i32) -> (i32, i32) {
    %c0_i32 = arith.constant 0 : i32
    %c0_i32_0 = arith.constant 0 : i32
    %c0_i32_1 = arith.constant 0 : i32
    return %c0_i32, %c0_i32_0 : i32, i32
  }
  func.func @transform_15(%arg0: i32) -> (i32, i32) {
    %c0_i32 = arith.constant 0 : i32
    %c0_i32_0 = arith.constant 0 : i32
    %c0_i32_1 = arith.constant 0 : i32
    return %c0_i32, %c0_i32_0 : i32, i32
  }
  func.func @transform_16(%arg0: i32) -> (i32, i32) {
    %c0_i32 = arith.constant 0 : i32
    %c0_i32_0 = arith.constant 0 : i32
    %c0_i32_1 = arith.constant 0 : i32
    return %c0_i32, %c0_i32_0 : i32, i32
  }
  func.func @transform_17(%arg0: i32) -> (i32, i32) {
    %c0_i32 = arith.constant 0 : i32
    %c0_i32_0 = arith.constant 0 : i32
    %c0_i32_1 = arith.constant 0 : i32
    return %c0_i32, %c0_i32_0 : i32, i32
  }
  func.func @transform_18(%arg0: i32) -> (i32, i32) {
    %c0_i32 = arith.constant 0 : i32
    %c0_i32_0 = arith.constant 0 : i32
    %c0_i32_1 = arith.constant 0 : i32
    return %c0_i32, %c0_i32_0 : i32, i32
  }
  func.func @transform_19(%arg0: i32) -> (i32, i32) {
    %c0_i32 = arith.constant 0 : i32
    %c0_i32_0 = arith.constant 0 : i32
    %c0_i32_1 = arith.constant 0 : i32
    return %c0_i32, %c0_i32_0 : i32, i32
  }
  func.func @transform_20(%arg0: i32) -> (i32, i32) {
    %c0_i32 = arith.constant 0 : i32
    %c0_i32_0 = arith.constant 0 : i32
    %c0_i32_1 = arith.constant 0 : i32
    return %c0_i32, %c0_i32_0 : i32, i32
  }
  func.func @transform_21(%arg0: i32) -> (i32, i32) {
    %c0_i32 = arith.constant 0 : i32
    %c0_i32_0 = arith.constant 0 : i32
    %c0_i32_1 = arith.constant 0 : i32
    return %c0_i32, %c0_i32_0 : i32, i32
  }
  func.func @transform_22(%arg0: i32) -> (i32, i32) {
    %c0_i32 = arith.constant 0 : i32
    %c0_i32_0 = arith.constant 0 : i32
    %c0_i32_1 = arith.constant 0 : i32
    return %c0_i32, %c0_i32_0 : i32, i32
  }
  func.func @transform_23(%arg0: i32) -> (i32, i32) {
    %c0_i32 = arith.constant 0 : i32
    %c0_i32_0 = arith.constant 0 : i32
    %c0_i32_1 = arith.constant 0 : i32
    return %c0_i32, %c0_i32_0 : i32, i32
  }
  func.func @transform_24(%arg0: i32) -> (i32, i32) {
    %c0_i32 = arith.constant 0 : i32
    %c0_i32_0 = arith.constant 0 : i32
    %c0_i32_1 = arith.constant 0 : i32
    return %c0_i32, %c0_i32_0 : i32, i32
  }
  func.func @transform_25(%arg0: i32) -> (i32, i32) {
    %c0_i32 = arith.constant 0 : i32
    %c0_i32_0 = arith.constant 0 : i32
    %c0_i32_1 = arith.constant 0 : i32
    return %c0_i32, %c0_i32_0 : i32, i32
  }
  func.func @transform_26(%arg0: i32) -> (i32, i32) {
    %c0_i32 = arith.constant 0 : i32
    %c0_i32_0 = arith.constant 0 : i32
    %c0_i32_1 = arith.constant 0 : i32
    return %c0_i32, %c0_i32_0 : i32, i32
  }
  func.func @transform_27(%arg0: i32) -> (i32, i32, i32) {
    %c0_i32 = arith.constant 0 : i32
    %c0_i32_0 = arith.constant 0 : i32
    %c0_i32_1 = arith.constant 0 : i32
    return %arg0, %c0_i32, %c0_i32_0 : i32, i32, i32
  }
}

</mosaic_0001>

<bundles_post_ra>
// kernel: transformer_forward.1
= control target key start
LH: loop header
LB: loop body
LE: loop exit
PB: predicated region body
PF: predicated region fallthrough
CT: control target
= control target key end

     0   :  { %s8870_s0 = inlined_call_operand.hbm [shape: f32[2,16,64], index: 0, kind: input, shape index: {}]   ;;  %s8871_s1 = inlined_call_operand.vmem [shape: f32[16,64], index: 1, kind: input, shape index: {}]   ;;  %s8872_s2 = inlined_call_operand.hbm [shape: f32[16,64], index: 2, kind: input, shape index: {}]   ;;  %s8873_s3 = inlined_call_operand.vmem [shape: f32[16,64], index: 3, kind: input, shape index: {}]   ;;  %s8874_s4 = inlined_call_operand.vmem [shape: f32[64,64], index: 4, kind: input, shape index: {}]   ;;  %s8875_s5 = inlined_call_operand.hbm [shape: f32[1,64], index: 5, kind: input, shape index: {}]   ;;  %s8876_s6 = inlined_call_operand.vmem [shape: f32[64,192], index: 6, kind: input, shape index: {}]   ;;  %s8877_s7 = inlined_call_operand.hbm [shape: f32[1,64], index: 7, kind: input, shape index: {}]   ;;  %s8878_s8 = inlined_call_operand.hbm [shape: f32[1,64], index: 8, kind: input, shape index: {}]   ;;  %s8879_s9 = inlined_call_operand.hbm [shape: f32[64,196], index: 9, kind: input, shape index: {}]   ;;  %s8880_s10 = inlined_call_operand.hbm [shape: f32[1,196], index: 10, kind: input, shape index: {}]   ;;  %s8881_s11 = inlined_call_operand.hbm [shape: f32[64,64], index: 11, kind: input, shape index: {}]   ;;  %s8882_s12 = inlined_call_operand.hbm [shape: f32[1,64], index: 12, kind: input, shape index: {}]   ;;  %s8883_s13 = inlined_call_operand.vmem [shape: f32[64,512], index: 13, kind: input, shape index: {}]   ;;  %s8884_s14 = inlined_call_operand.hbm [shape: f32[1,512], index: 14, kind: input, shape index: {}]   ;;  %s8885_s15 = inlined_call_operand.vmem [shape: f32[256,64], index: 15, kind: input, shape index: {}]   ;;  %s8886_s16 = inlined_call_operand.hbm [shape: f32[1,64], index: 16, kind: input, shape index: {}]   ;;  %s8887_s17 = inlined_call_operand.hbm [shape: f32[1,64], index: 17, kind: input, shape index: {}]   ;;  %s8888_s18 = inlined_call_operand.hbm [shape: f32[64,196], index: 18, kind: input, shape index: {}]   ;;  %s8889_s19 = inlined_call_operand.hbm [shape: f32[1,196], index: 19, kind: input, shape index: {}]   ;;  %s8890_s20 = inlined_call_operand.hbm [shape: f32[64,64], index: 20, kind: input, shape index: {}]   ;;  %s8891_s21 = inlined_call_operand.hbm [shape: f32[1,64], index: 21, kind: input, shape index: {}]   ;;  %s8892_s22 = inlined_call_operand.vmem [shape: f32[64,512], index: 22, kind: input, shape index: {}]   ;;  %s8893_s23 = inlined_call_operand.hbm [shape: f32[1,512], index: 23, kind: input, shape index: {}]   ;;  %s8894_s24 = inlined_call_operand.vmem [shape: f32[256,64], index: 24, kind: input, shape index: {}]   ;;  %s8895_s25 = inlined_call_operand.hbm [shape: f32[1,64], index: 25, kind: input, shape index: {}]   ;;  %s8896_s26 = inlined_call_operand.vmem [shape: f32[128,64], index: 26, kind: input, shape index: {}]   ;;  %s8897_s27 = inlined_call_operand.hbm [shape: f32[2,16,64], index: 27, kind: output, shape index: {}]  }
   0x1   :  { %8936 = sst [smem:[#allocation43_spill]] %s8870_s0 }
   0x2   :  { %8937 = sst [smem:[#allocation44_spill]] %s8871_s1 }
   0x3   :  { %8938 = sst [smem:[#allocation45_spill]] %s8872_s2 }
   0x4   :  { %8939 = sst [smem:[#allocation46_spill]] %s8873_s3 }
   0x5   :  { %8940 = sst [smem:[#allocation47_spill]] %s8874_s4 }
   0x6   :  { %8941 = sst [smem:[#allocation48_spill]] %s8875_s5 }
   0x7   :  { %8942 = sst [smem:[#allocation49_spill]] %s8876_s6 }
   0x8   :  { %8943 = sst [smem:[#allocation50_spill]] %s8877_s7 }
   0x9   :  { %8944 = sst [smem:[#allocation51_spill]] %s8878_s8 }
   0xa   :  { %8945 = sst [smem:[#allocation52_spill]] %s8879_s9 }
   0xb   :  { %8946 = sst [smem:[#allocation53_spill]] %s8880_s10 }
   0xc   :  { %8947 = sst [smem:[#allocation54_spill]] %s8881_s11 }
   0xd   :  { %8948 = sst [smem:[#allocation55_spill]] %s8882_s12 }
   0xe   :  { %8949 = sst [smem:[#allocation56_spill]] %s8883_s13 }
   0xf   :  { %8950 = sst [smem:[#allocation57_spill]] %s8884_s14 }
  0x10   :  { %8951 = sst [smem:[#allocation58_spill]] %s8885_s15 }
  0x11   :  { %8952 = sst [smem:[#allocation59_spill]] %s8886_s16 }
  0x12   :  { %8953 = sst [smem:[#allocation60_spill]] %s8887_s17 }
  0x13   :  { %8954 = sst [smem:[#allocation61_spill]] %s8888_s18 }
  0x14   :  { %8955 = sst [smem:[#allocation62_spill]] %s8889_s19 }
  0x15   :  { %8956 = sst [smem:[#allocation63_spill]] %s8892_s22 }
  0x16   :  { %8957 = sst [smem:[#allocation64_spill]] %s8894_s24 }
  0x17   :  { %8958 = sst [smem:[#allocation65_spill]] %s8896_s26 }
  0x18   :  { %8959 = sst [smem:[#allocation66_spill]] %s8897_s27 }
  0x19   :  { %32 = vsyncpa [#allocation3], 0 }
  0x1a   :  { %34 = vsyncpa [#allocation3 + $0x1], 0 }
  0x1b   :  { %35 = vsyncpa [#allocation6], 0 }
  0x1c   :  { %36 = vsyncpa [#allocation9], 0 }
  0x1d   :  { %37 = vsyncpa [#allocation12], 0 }
  0x1e   :  { %38 = vsyncpa [#allocation15], 0 }
  0x1f   :  { %39 = vsyncpa [#allocation18], 0 }
  0x20   :  { %40 = vsyncpa [#allocation21], 0 }
  0x21   :  { %41 = vsyncpa [#allocation24], 0 }
  0x22   :  { %42 = vsyncpa [#allocation27], 0 }
  0x23   :  { %43 = vsyncpa [#allocation30], 0 }
  0x24   :  { %44 = vsyncpa [#allocation4], 0 }
  0x25   :  { %46 = vsyncpa [#allocation4 + $0x1], 0  ;;  %s7409_s7 = smov 0   ;;  %s7411_s4 = smov 0  }
  0x26   :  { %s7413_s8 = smov 0   ;;  %s7415_s30 = smov 0  }
  0x27 LB: > { %s7232_s9 = smov [#allocation5]   ;;  %s7430_s28 = sadd.s32 4294967295, %s7230_s30   ;;  %s7230_s30 = sphi %s7415_s30, %s9028_s30   ;;  %s7226_s8 = sphi %s7413_s8, %s9027_s8   ;;  %s7222_s4 = sphi %s7411_s4, %s9026_s4   ;;  %s7218_s7 = sphi %s7409_s7, %s9025_s7  }
  0x28   : > { %s670_s5 = sshll.u32 %s7232_s9, 4  ;;  %p5577_p0 = scmp.ge.s32.totalorder %s7230_s30, 1  ;;  %s671_s5 = int_to_ptr.vmem [resolvable:$true] %s670_s5 }
  0x29   : > { %p8909_p1 = scmp.eq.s32.totalorder %s7430_s28, 0  ;;  %p655_p2 = scmp.lt.s32.totalorder %s7230_s30, 3 }
  0x2a   : > { %s7233_s10 = smov [#allocation8]   ;;  %s7234_s6 = smov [#allocation11]  }
  0x2b   : > { %p7435_p3 = pnand %p5577_p0, %p655_p2  ;;  %s704_s29 = sshll.u32 %s7233_s10, 4  ;;  %s705_s29 = int_to_ptr.vmem [resolvable:$true] %s704_s29 }
  0x2c   : > { %s725_s11 = sshll.u32 %s7234_s6, 4  ;;  %s6671_s3 = scalar_lea.vmem %s671_s5, 256  ;;  %s7448_s11 = int_to_ptr.vmem [resolvable:$true] %s725_s11 }
  0x2d   : > { %s8960_s0 = scalar_select %p7435_p3, 1, 0 }
  0x2e   : > { %p6307_p5 = pneg %p7435_p3  ;;  %p6672_p8 = scmp.ne.s32.totalorder %s671_s5, %s6671_s3 }
  0x2f   : > { %p6679_p11 = scmp.lt.s32.totalorder %s671_s5, %s671_s5  ;;  %p6680_p12 = scmp.lt.s32.totalorder %s6671_s3, %s6671_s3 }
  0x30   : > { %p7444_p6 = pnand %p6307_p5, %p8909_p1 }
  0x31   : > { %p6681_p13 = por %p6680_p12, %p6679_p11 }
  0x32   : > { %p7452_p7 = pneg %p7444_p6 }
  0x34   : > { %p6674_p9 = pnand %p6672_p8, %p7452_p7 }
  0x36   : > { %p6675_p10 = pneg %p6674_p9 }
  0x38   : > { %p6682_p0 = pnand %p6681_p13, %p6675_p10 }
  0x3a   : > { %6685 = shalt.err (!%p6682_p0)
}
  0x3b   : > { %s8911_s9 = smov 128   ;;  %s8913_s10 = smov 8  }
  0x3c   : > { %s8963_s24 = sld [smem:[#allocation45_spill]]  ;;  %s6697_s22 = scalar_lea.vmem %s705_s29, 16 }
  0x3d   : > { %p6698_p2 = scmp.ne.s32.totalorder %s705_s29, %s6697_s22  ;;  %s6704_s3 = scalar_lea.vmem %s705_s29, 32 }
  0x3e   : > { %p6705_p9 = scmp.lt.s32.totalorder %s705_s29, %s705_s29  ;;  %p6706_p10 = scmp.lt.s32.totalorder %s6704_s3, %s6697_s22 }
  0x3f   : > { %p6700_p5 = pnand %p6698_p2, %p7452_p7 }
  0x40   : > { %p6707_p11 = por %p6706_p10, %p6705_p9 }
  0x41   : > { %p6701_p8 = pneg %p6700_p5 }
  0x42   : > { %6310 = dma.hbm_to_vmem [thread:$0]  (!%p7444_p6), %s8963_s24, 256, %s671_s5, [#allocation6], %s8911_s9, %s8911_s9, %s8913_s10  }
  0x43   : > { %p6708_p12 = pnand %p6707_p11, %p6701_p8 }
  0x45   : > { %6711 = shalt.err (!%p6708_p12)
}
  0x46   : > { %s8964_s13 = sld [smem:[#allocation50_spill]]  ;;  %s6723_s24 = scalar_lea.vmem %s7448_s11, 2048 }
  0x47   : > { %p6724_p13 = scmp.ne.s32.totalorder %s7448_s11, %s6723_s24  ;;  %p6731_p5 = scmp.lt.s32.totalorder %s7448_s11, %s7448_s11 }
  0x48   : > { %p6732_p9 = scmp.lt.s32.totalorder %s6723_s24, %s6723_s24 }
  0x49   : > { %p6726_p0 = pnand %p6724_p13, %p7452_p7 }
  0x4a   : > { %p6733_p8 = por %p6732_p9, %p6731_p5 }
  0x4b   : > { %p6727_p2 = pneg %p6726_p0 }
  0x4c   : > { %6316 = dma.hbm_to_vmem [thread:$0]  (!%p7444_p6), %s8964_s13, 16, %s705_s29, [#allocation9]  }
  0x4d   : > { %p6734_p10 = pnand %p6733_p8, %p6727_p2 }
  0x4f   : > { %6737 = shalt.err (!%p6734_p10)
}
  0x50   : > { %s7237_s22 = smov 256   ;;  %s7238_s15 = smov 16  }
  0x51   : > { %s8965_s27 = sld [smem:[#allocation52_spill]]  ;;  %s7239_s5 = smov [#allocation14]  }
  0x52   : > { %s749_s29 = sshll.u32 %s7239_s5, 4  ;;  %s7240_s6 = smov [#allocation17]   ;;  %s750_s29 = int_to_ptr.vmem [resolvable:$true] %s749_s29 }
  0x53   : > { %s777_s3 = sshll.u32 %s7240_s6, 4  ;;  %s6749_s24 = scalar_lea.vmem %s750_s29, 1024  ;;  %s778_s3 = int_to_ptr.vmem [resolvable:$true] %s777_s3 }
  0x54   : > { %p6750_p11 = scmp.ne.s32.totalorder %s750_s29, %s6749_s24  ;;  %p6757_p0 = scmp.lt.s32.totalorder %s750_s29, %s750_s29 }
  0x55   : > { %p6758_p2 = scmp.lt.s32.totalorder %s6749_s24, %s6749_s24 }
  0x56   : > { %p6752_p12 = pnand %p6750_p11, %p7452_p7 }
  0x57   : > { %6322 = dma.hbm_to_vmem [thread:$0]  (!%p7444_p6), %s8965_s27, 2048, %s7448_s11, [#allocation12], %s7237_s22, %s7237_s22, %s7238_s15  }
  0x58   : > { %p6753_p13 = pneg %p6752_p12  ;;  %p6759_p5 = por %p6758_p2, %p6757_p0 }
  0x5a   : > { %p6760_p9 = pnand %p6759_p5, %p6753_p13 }
  0x5c   : > { %6763 = shalt.err (!%p6760_p9)
}
  0x5d   : > { %s8966_s26 = sld [smem:[#allocation54_spill]]  ;;  %s6775_s27 = scalar_lea.vmem %s778_s3, 64 }
  0x5e   : > { %p6776_p8 = scmp.ne.s32.totalorder %s778_s3, %s6775_s27  ;;  %p6783_p12 = scmp.lt.s32.totalorder %s778_s3, %s778_s3 }
  0x5f   : > { %p6784_p0 = scmp.lt.s32.totalorder %s6775_s27, %s6775_s27 }
  0x60   : > { %p6778_p10 = pnand %p6776_p8, %p7452_p7 }
  0x61   : > { %p6785_p13 = por %p6784_p0, %p6783_p12 }
  0x62   : > { %p6779_p11 = pneg %p6778_p10 }
  0x63   : > { %6328 = dma.hbm_to_vmem [thread:$0]  (!%p7444_p6), %s8966_s26, 1024, %s750_s29, [#allocation15], %s8911_s9, %s8911_s9, %s8913_s10  }
  0x64   : > { %p6786_p2 = pnand %p6785_p13, %p6779_p11 }
  0x66   : > { %6789 = shalt.err (!%p6786_p2)
}
  0x67   : > { %s8967_s14 = sld [smem:[#allocation57_spill]]  ;;  %s7241_s24 = smov [#allocation20]  }
  0x68   : > { %s802_s29 = sshll.u32 %s7241_s24, 4  ;;  %s7242_s11 = smov [#allocation23]   ;;  %s803_s29 = int_to_ptr.vmem [resolvable:$true] %s802_s29 }
  0x69   : > { %s826_s13 = sshll.u32 %s7242_s11, 4  ;;  %s6801_s26 = scalar_lea.vmem %s803_s29, 16  ;;  %s827_s13 = int_to_ptr.vmem [resolvable:$true] %s826_s13 }
  0x6a   : > { %p6802_p5 = scmp.ne.s32.totalorder %s803_s29, %s6801_s26  ;;  %s6808_s27 = scalar_lea.vmem %s803_s29, 32 }
  0x6b   : > { %p6809_p10 = scmp.lt.s32.totalorder %s803_s29, %s803_s29  ;;  %p6810_p11 = scmp.lt.s32.totalorder %s6808_s27, %s6801_s26 }
  0x6c   : > { %p6804_p9 = pnand %p6802_p5, %p7452_p7 }
  0x6d   : > { %6334 = dma.hbm_to_vmem [thread:$0]  (!%p7444_p6), %s8967_s14, 64, %s778_s3, [#allocation18]  }
  0x6e   : > { %p6805_p8 = pneg %p6804_p9  ;;  %p6811_p12 = por %p6810_p11, %p6809_p10 }
  0x70   : > { %p6812_p0 = pnand %p6811_p12, %p6805_p8 }
  0x72   : > { %6815 = shalt.err (!%p6812_p0)
}
  0x73   : > { %s8968_s17 = sld [smem:[#allocation60_spill]]  ;;  %s6827_s6 = scalar_lea.vmem %s827_s13, 32 }
  0x74   : > { %p6828_p13 = scmp.ne.s32.totalorder %s827_s13, %s6827_s6  ;;  %p6835_p9 = scmp.lt.s32.totalorder %s827_s13, %s827_s13 }
  0x75   : > { %p6836_p4 = scmp.lt.s32.totalorder %s6827_s6, %s6827_s6 }
  0x76   : > { %p6830_p2 = pnand %p6828_p13, %p7452_p7 }
  0x77   : > { %p6837_p1 = por %p6836_p4, %p6835_p9 }
  0x78   : > { %p6831_p5 = pneg %p6830_p2 }
  0x79   : > { %6340 = dma.hbm_to_vmem [thread:$0]  (!%p7444_p6), %s8968_s17, 16, %s803_s29, [#allocation21]  }
  0x7a   : > { %p6838_p3 = pnand %p6837_p1, %p6831_p5 }
  0x7c   : > { %6841 = shalt.err (!%p6838_p3)
}
  0x7d   : > { %s8969_s19 = sld [smem:[#allocation62_spill]]  ;;  %s7243_s26 = smov [#allocation26]  }
  0x7e   : > { %s850_s29 = sshll.u32 %s7243_s26, 4  ;;  %s7244_s27 = smov [#allocation7]   ;;  %s851_s29 = int_to_ptr.vmem [resolvable:$true] %s850_s29 }
  0x7f   : > { %s690_s5 = sshll.u32 %s7244_s27, 4  ;;  %s6853_s3 = scalar_lea.vmem %s851_s29, 16  ;;  %s691_s5 = int_to_ptr.vmem [resolvable:$true] %s690_s5 }
  0x80   : > { %p6854_p8 = scmp.ne.s32.totalorder %s851_s29, %s6853_s3  ;;  %s6860_s6 = scalar_lea.vmem %s851_s29, 32 }
  0x81   : > { %p6861_p1 = scmp.lt.s32.totalorder %s851_s29, %s851_s29  ;;  %p6862_p3 = scmp.lt.s32.totalorder %s6860_s6, %s6853_s3 }
  0x82   : > { %p6856_p10 = pnand %p6854_p8, %p7452_p7 }
  0x83   : > { %6346 = dma.hbm_to_vmem [thread:$0]  (!%p7444_p6), %s8969_s19, 32, %s827_s13, [#allocation24]  }
  0x84   : > { %p6857_p11 = pneg %p6856_p10  ;;  %p6863_p4 = por %p6862_p3, %p6861_p1 }
  0x86   : > { %p6864_p12 = pnand %p6863_p4, %p6857_p11 }
  0x88   : > { %6867 = shalt.err (!%p6864_p12)
}
  0x89   : > { %6352 = dma.hbm_to_vmem [thread:$0]  (!%p7444_p6), %s8891_s21, 16, %s851_s29, [#allocation27]  }
  0x8a   : > { %s6879_s11 = scalar_lea.vmem %s691_s5, 16  ;;  %s6886_s26 = scalar_lea.vmem %s691_s5, 32 }
  0x8b   : > { %p6880_p0 = scmp.ne.s32.totalorder %s691_s5, %s6879_s11  ;;  %p6887_p5 = scmp.lt.s32.totalorder %s691_s5, %s691_s5 }
  0x8c   : > { %p6888_p9 = scmp.lt.s32.totalorder %s6886_s26, %s6879_s11 }
  0x8d   : > { %p6882_p13 = pnand %p6880_p0, %p7452_p7 }
  0x8e   : > { %p6889_p8 = por %p6888_p9, %p6887_p5 }
  0x8f   : > { %p6883_p2 = pneg %p6882_p13 }
  0x91   : > { %p6890_p10 = pnand %p6889_p8, %p6883_p2 }
  0x93   : > { %6893 = shalt.err (!%p6890_p10)
}
  0x94   : > { %s8970_s6 = sld [smem:[#allocation48_spill]]  ;;  %s7245_s29 = smov [#allocation10]  }
  0x95   : > { %s715_s24 = sshll.u32 %s7245_s29, 4  ;;  %s7246_s13 = smov [#allocation13]   ;;  %s716_s24 = int_to_ptr.vmem [resolvable:$true] %s715_s24 }
  0x96   : > { %s739_s9 = sshll.u32 %s7246_s13, 4  ;;  %s6905_s10 = scalar_lea.vmem %s716_s24, 16  ;;  %s740_s9 = int_to_ptr.vmem [resolvable:$true] %s739_s9 }
  0x97   : > { %p6906_p11 = scmp.ne.s32.totalorder %s716_s24, %s6905_s10  ;;  %s6912_s11 = scalar_lea.vmem %s716_s24, 32 }
  0x98   : > { %p6913_p4 = scmp.lt.s32.totalorder %s716_s24, %s716_s24  ;;  %p6914_p12 = scmp.lt.s32.totalorder %s6912_s11, %s6905_s10 }
  0x99   : > { %p6908_p1 = pnand %p6906_p11, %p7452_p7 }
  0x9a   : > { %6313 = dma.hbm_to_vmem [thread:$0]  (!%p7444_p6), %s8970_s6, 16, %s691_s5, [#allocation6]  }
  0x9b   : > { %p6909_p3 = pneg %p6908_p1  ;;  %p6915_p0 = por %p6914_p12, %p6913_p4 }
  0x9d   : > { %p6916_p13 = pnand %p6915_p0, %p6909_p3 }
  0x9f   : > { %6919 = shalt.err (!%p6916_p13)
}
  0xa0   : > { %s8971_s27 = sld [smem:[#allocation51_spill]]  ;;  %s6931_s3 = scalar_lea.vmem %s740_s9, 32 }
  0xa1   : > { %p6932_p2 = scmp.ne.s32.totalorder %s740_s9, %s6931_s3  ;;  %p6939_p8 = scmp.lt.s32.totalorder %s740_s9, %s740_s9 }
  0xa2   : > { %p6940_p10 = scmp.lt.s32.totalorder %s6931_s3, %s6931_s3 }
  0xa3   : > { %p6934_p5 = pnand %p6932_p2, %p7452_p7 }
  0xa4   : > { %p6941_p11 = por %p6940_p10, %p6939_p8 }
  0xa5   : > { %p6935_p9 = pneg %p6934_p5 }
  0xa6   : > { %6319 = dma.hbm_to_vmem [thread:$0]  (!%p7444_p6), %s8971_s27, 16, %s716_s24, [#allocation9]  }
  0xa7   : > { %p6942_p1 = pnand %p6941_p11, %p6935_p9 }
  0xa9   : > { %6945 = shalt.err (!%p6942_p1)
}
  0xaa   : > { %s8972_s29 = sld [smem:[#allocation53_spill]]  ;;  %s7247_s13 = smov [#allocation16]  }
  0xab   : > { %s763_s24 = sshll.u32 %s7247_s13, 4  ;;  %s7248_s11 = smov [#allocation19]   ;;  %s764_s24 = int_to_ptr.vmem [resolvable:$true] %s763_s24 }
  0xac   : > { %s791_s26 = sshll.u32 %s7248_s11, 4  ;;  %s6957_s5 = scalar_lea.vmem %s764_s24, 16  ;;  %s792_s26 = int_to_ptr.vmem [resolvable:$true] %s791_s26 }
  0xad   : > { %p6958_p3 = scmp.ne.s32.totalorder %s764_s24, %s6957_s5  ;;  %s6964_s27 = scalar_lea.vmem %s764_s24, 32 }
  0xae   : > { %p6965_p0 = scmp.lt.s32.totalorder %s764_s24, %s764_s24  ;;  %p6966_p13 = scmp.lt.s32.totalorder %s6964_s27, %s6957_s5 }
  0xaf   : > { %p6960_p4 = pnand %p6958_p3, %p7452_p7 }
  0xb0   : > { %6325 = dma.hbm_to_vmem [thread:$0]  (!%p7444_p6), %s8972_s29, 32, %s740_s9, [#allocation12]  }
  0xb1   : > { %p6961_p12 = pneg %p6960_p4  ;;  %p6967_p2 = por %p6966_p13, %p6965_p0 }
  0xb3   : > { %p6968_p5 = pnand %p6967_p2, %p6961_p12 }
  0xb5   : > { %6971 = shalt.err (!%p6968_p5)
}
  0xb6   : > { %s8973_s12 = sld [smem:[#allocation55_spill]]  ;;  %s6983_s10 = scalar_lea.vmem %s792_s26, 16 }
  0xb7   : > { %p6984_p9 = scmp.ne.s32.totalorder %s792_s26, %s6983_s10  ;;  %s6990_s6 = scalar_lea.vmem %s792_s26, 32 }
  0xb8   : > { %p6991_p11 = scmp.lt.s32.totalorder %s792_s26, %s792_s26  ;;  %p6992_p1 = scmp.lt.s32.totalorder %s6990_s6, %s6983_s10 }
  0xb9   : > { %p6986_p8 = pnand %p6984_p9, %p7452_p7 }
  0xba   : > { %p6993_p3 = por %p6992_p1, %p6991_p11 }
  0xbb   : > { %p6987_p10 = pneg %p6986_p8 }
  0xbc   : > { %6331 = dma.hbm_to_vmem [thread:$0]  (!%p7444_p6), %s8973_s12, 16, %s764_s24, [#allocation15]  }
  0xbd   : > { %p6994_p4 = pnand %p6993_p3, %p6987_p10 }
  0xbf   : > { %6997 = shalt.err (!%p6994_p4)
}
  0xc0   : > { %s8974_s16 = sld [smem:[#allocation59_spill]]  ;;  %s7249_s24 = smov [#allocation22]  }
  0xc1   : > { %s812_s11 = sshll.u32 %s7249_s24, 4  ;;  %s7250_s5 = smov [#allocation25]   ;;  %s813_s11 = int_to_ptr.vmem [resolvable:$true] %s812_s11 }
  0xc2   : > { %s836_s27 = sshll.u32 %s7250_s5, 4  ;;  %s7009_s3 = scalar_lea.vmem %s813_s11, 2048  ;;  %s837_s27 = int_to_ptr.vmem [resolvable:$true] %s836_s27 }
  0xc3   : > { %p7010_p12 = scmp.ne.s32.totalorder %s813_s11, %s7009_s3  ;;  %p7017_p2 = scmp.lt.s32.totalorder %s813_s11, %s813_s11 }
  0xc4   : > { %p7018_p5 = scmp.lt.s32.totalorder %s7009_s3, %s7009_s3 }
  0xc5   : > { %p7012_p0 = pnand %p7010_p12, %p7452_p7 }
  0xc6   : > { %6337 = dma.hbm_to_vmem [thread:$0]  (!%p7444_p6), %s8974_s16, 16, %s792_s26, [#allocation18]  }
  0xc7   : > { %p7013_p13 = pneg %p7012_p0  ;;  %p7019_p9 = por %p7018_p5, %p7017_p2 }
  0xc9   : > { %p7020_p8 = pnand %p7019_p9, %p7013_p13 }
  0xcb   : > { %7023 = shalt.err (!%p7020_p8)
}
  0xcc   : > { %s8975_s18 = sld [smem:[#allocation61_spill]]  ;;  %s7035_s10 = scalar_lea.vmem %s837_s27, 1024 }
  0xcd   : > { %p7036_p10 = scmp.ne.s32.totalorder %s837_s27, %s7035_s10  ;;  %p7043_p3 = scmp.lt.s32.totalorder %s837_s27, %s837_s27 }
  0xce   : > { %p7044_p4 = scmp.lt.s32.totalorder %s7035_s10, %s7035_s10 }
  0xcf   : > { %p7038_p11 = pnand %p7036_p10, %p7452_p7 }
  0xd0   : > { %p7045_p12 = por %p7044_p4, %p7043_p3 }
  0xd1   : > { %p7039_p1 = pneg %p7038_p11 }
  0xd2   : > { %6343 = dma.hbm_to_vmem [thread:$0]  (!%p7444_p6), %s8975_s18, 2048, %s813_s11, [#allocation21], %s7237_s22, %s7237_s22, %s7238_s15  }
  0xd3   : > { %p7046_p0 = pnand %p7045_p12, %p7039_p1 }
  0xd5   : > { %7049 = shalt.err (!%p7046_p0)
}
  0xd6   : > { %s8976_s6 = smov 8   ;;  %s8977_s29 = smov 128  }
  0xd7   : > { %6349 = dma.hbm_to_vmem [thread:$0]  (!%p7444_p6), %s8890_s20, 1024, %s837_s27, [#allocation24], %s8977_s29, %s8977_s29, %s8976_s6  }
  0xd8   : > { %s7251_s22 = smov [#allocation28]   ;;  %s7252_s11 = smov [#allocation29]  }
  0xd9   : > { %s864_s15 = sshll.u32 %s7251_s22, 4  ;;  %s878_s5 = sshll.u32 %s7252_s11, 4  ;;  %s865_s15 = int_to_ptr.vmem [resolvable:$true] %s864_s15  ;;  %s879_s5 = int_to_ptr.vmem [resolvable:$true] %s878_s5 }
  0xda   : > { %s7061_s3 = scalar_lea.vmem %s865_s15, 64  ;;  %p7069_p9 = scmp.lt.s32.totalorder %s865_s15, %s865_s15 }
  0xdb   : > { %p7062_p13 = scmp.ne.s32.totalorder %s865_s15, %s7061_s3  ;;  %p7070_p8 = scmp.lt.s32.totalorder %s7061_s3, %s7061_s3 }
  0xdd   : > { %p7064_p2 = pnand %p7062_p13, %p7452_p7  ;;  %p7071_p10 = por %p7070_p8, %p7069_p9 }
  0xdf   : > { %p7065_p5 = pneg %p7064_p2 }
  0xe1   : > { %p7072_p11 = pnand %p7071_p10, %p7065_p5 }
  0xe3   : > { %7075 = shalt.err (!%p7072_p11)
}
  0xe4   : > { %6355 = dma.hbm_to_vmem [thread:$0]  (!%p7444_p6), %s8893_s23, 64, %s865_s15, [#allocation27]  }
  0xe5   : > { %s7087_s27 = scalar_lea.vmem %s879_s5, 16  ;;  %s7094_s10 = scalar_lea.vmem %s879_s5, 32 }
  0xe6   : > { %p7088_p1 = scmp.ne.s32.totalorder %s879_s5, %s7087_s27  ;;  %p7095_p12 = scmp.lt.s32.totalorder %s879_s5, %s879_s5 }
  0xe7   : > { %p7096_p0 = scmp.lt.s32.totalorder %s7094_s10, %s7087_s27 }
  0xe8   : > { %p7090_p3 = pnand %p7088_p1, %p7452_p7 }
  0xe9   : > { %p7097_p13 = por %p7096_p0, %p7095_p12 }
  0xea   : > { %p7091_p4 = pneg %p7090_p3 }
  0xec   : > { %p7098_p2 = pnand %p7097_p13, %p7091_p4 }
  0xee   : > { %7101 = shalt.err (!%p7098_p2)
}
  0xef   : > { %6358 = dma.hbm_to_vmem [thread:$0]  (!%p7444_p6), %s8895_s25, 16, %s879_s5, [#allocation30]  }
  0xf0   : > { %s5576_s2 = sadd.s32 4294967294, %s7230_s30   ;;  %s7597_s1 = sadd.s32 1, %s7230_s30  }
  0xf1   : > { %s59_s22 = sadd.s32 1, %s7226_s8  ;;  %s56_s15 = ssub.s32 %s7230_s30, %s7597_s1 }
  0xf2   : > { %p66_p7 = scmp.ne.s32.totalorder %s7226_s8, %s7222_s4  ;;  %p57_p5 = scmp.eq.s32.totalorder %s56_s15, 0 }
  0xf3   : > { %p67_p9 = scmp.eq.s32.totalorder %s7230_s30, 0  ;;  %p72_p8 = scmp.ne.s32.totalorder %s7222_s4, %s7218_s7 }
  0xf4   : > { %p642_p10 = scmp.eq.s32.totalorder %s7430_s28, 1  ;;  %p8978_p1 = scmp.eq.s32.totalorder %s7430_s28, 0 }
  0xf5   : > { %s7609_s11 = scalar_select %p57_p5, %s7226_s8, %s59_s22  }
  0xf6   : > { %p68_p11 = por %p67_p9, %p66_p7  ;;  %p7613_p3 = por %p8978_p1, %p72_p8 }
  0xf7   : > { %p7617_p6 = por %p642_p10, %p66_p7  ;;  %p648_p4 = scmp.eq.s32.totalorder %s5576_s2, 1 }
  0xf8   : > { %s8979_s3 = scalar_select %p7613_p3, 1, 0 }
  0xf9   : > { %s8980_s5 = scalar_select %p7617_p6, 1, 0 }
  0xfa   : > { %p6384_p12 = scmp.lt.s32.totalorder %s7230_s30, 2  ;;  %s892_s26 = sand.u32 1, %s7226_s8  }
  0xfb   : > { %p7623_p0 = por %p648_p4, %p72_p8  ;;  %s5596_s27 = sshll.u32 %s892_s26, 4 }
  0xfc   : > { %s5724_s10 = sshll.u32 %s7230_s30, 8  ;;  %s8982_s22 = sld [smem:[#allocation43_spill]] }
  0xfd   : > { %s8981_s9 = scalar_select %p7623_p0, 1, 0 }
  0xfe   : > { %s896_s12 = scalar_lea.vmem [#allocation2], %s5596_s27  ;;  %p7633_p13 = pnand %p6384_p12, %p68_p11 }
  0xff   : > { %s903_s14 = sshll.u32 %s896_s12, 4  ;;  %s7639_s16 = scalar_lea.sflag [#allocation3], %s892_s26  ;;  %s7637_s14 = int_to_ptr.vmem [resolvable:$true] %s903_s14 }
 0x100   : > { %p7104_p7 = pneg %p7633_p13 }
 0x102   : > { %s7631_s15 = scalar_lea.hbm %s8982_s22, %s5724_s10  ;;  %s7107_s27 = scalar_lea.hbm %s8982_s22, 512 }
 0x103   : > { %s7102_s17 = scalar_lea.hbm %s7631_s15, 256  ;;  %p7108_p8 = scmp.lt.s32.totalorder %s7631_s15, %s8982_s22 }
 0x104   : > { %p7103_p2 = scmp.ne.s32.totalorder %s7631_s15, %s7102_s17  ;;  %p7109_p10 = scmp.lt.s32.totalorder %s7107_s27, %s7102_s17 }
 0x106   : > { %p7105_p5 = pnand %p7104_p7, %p7103_p2  ;;  %p7110_p11 = por %p7109_p10, %p7108_p8 }
 0x108   : > { %p7106_p9 = pneg %p7105_p5 }
 0x10a   : > { %p7111_p1 = pnand %p7110_p11, %p7106_p9 }
 0x10c   : > { %7114 = shalt.err (!%p7111_p1)
}
 0x10d   : > { %s7115_s26 = scalar_lea.vmem %s7637_s14, 256  ;;  %s7253_s18 = smov [#allocation2]  }
 0x10e   : > { %p7116_p4 = scmp.ne.s32.totalorder %s7637_s14, %s7115_s26  ;;  %s7120_s19 = sshll.u32 %s7253_s18, 4  ;;  %s7121_s19 = int_to_ptr.vmem [resolvable:$false] %s7120_s19 }
 0x10f   : > { %s7122_s10 = scalar_lea.vmem %s7121_s19, 512  ;;  %p7123_p5 = scmp.lt.s32.totalorder %s7637_s14, %s7121_s19 }
 0x110   : > { %p7118_p12 = pnand %p7116_p4, %p7104_p7  ;;  %p7124_p0 = scmp.lt.s32.totalorder %s7122_s10, %s7115_s26 }
 0x112   : > { %p7119_p2 = pneg %p7118_p12  ;;  %p7125_p6 = por %p7124_p0, %p7123_p5 }
 0x114   : > { %p7126_p3 = pnand %p7125_p6, %p7119_p2 }
 0x116   : > { %7129 = shalt.err (!%p7126_p3)
}
 0x117   : > { %6362 = dma.hbm_to_vmem [thread:$0]  (!%p7633_p13), %s7631_s15, 256, %s7637_s14, %s7639_s16, %s8977_s29, %s8977_s29, %s8976_s6  }
 0x118   : > { %p8984_p7 = scmp.ne.s32.totalorder %s8960_s0, 0 }
 0x119   : > { %s7666_s17 = sand.u32 (!%p8984_p7), 1, %s7222_s4   ;;  %p8985_p3 = scmp.ne.s32.totalorder (!%p8984_p7), %s8979_s3, 0 }
 0x11a   : > { %915 = sbr.rel (%p8984_p7) target bundleno = 9934 (0x26ce), region = 128  ;;  %s8917_s18 = sshll.u32 (!%p8984_p7), %s7666_s17, 4 }
 0x11b   : > { %s918_s19 = scalar_lea.sflag (!%p8984_p7), [#allocation3], %s7666_s17  ;;  %s921_s2 = scalar_lea.vmem (!%p8984_p7), [#allocation2], %s8917_s18 }
 0x11f   : > { %7173 = dma.done.wait (%p8985_p3), %s918_s19, 256  }
 0x120   : > { %7175 = vsyncadd (%p8985_p3), %s918_s19, 4294967040  ;;  %p8986_p6 = scmp.eq.s32.totalorder %s7430_s28, 0 }
 0x122   : > { %7177 = dma.done.wait (%p8986_p6), [#allocation6], 272   ;;  %p8987_p0 = pmov %p8986_p6 }
 0x124   : > { %7179 = vsyncadd (%p8987_p0), [#allocation6], 4294967024  ;;  %p8988_p13 = pmov %p8987_p0 }
 0x125   : > { %p8989_p9 = pmov %p8987_p0 }
 0x126   : > { %7181 = dma.done.wait (%p8988_p13), [#allocation9], 32  }
 0x127   : > { %7183 = vsyncadd (%p8989_p9), [#allocation9], 4294967264  ;;  %p8990_p8 = pmov %p8987_p0 }
 0x128   : > { %p8991_p10 = pmov %p8987_p0 }
 0x129   : > { %7185 = dma.done.wait (%p8990_p8), [#allocation12], 2080  }
 0x12a   : > { %7187 = vsyncadd (%p8991_p10), [#allocation12], 4294965216  ;;  %p8992_p11 = pmov %p8987_p0 }
 0x12b   : > { %p8993_p1 = pmov %p8987_p0 }
 0x12c   : > { %7189 = dma.done.wait (%p8992_p11), [#allocation15], 1040  }
 0x12d   : > { %7191 = vsyncadd (%p8993_p1), [#allocation15], 4294966256  ;;  %p8994_p4 = pmov %p8987_p0 }
 0x12e   : > { %p8995_p12 = pmov %p8987_p0 }
 0x12f   : > { %7193 = dma.done.wait (%p8994_p4), [#allocation18], 80  }
 0x130   : > { %7195 = vsyncadd (%p8995_p12), [#allocation18], 4294967216  ;;  %p8996_p2 = pmov %p8987_p0 }
 0x131   : > { %p8997_p5 = pmov %p8987_p0 }
 0x132   : > { %7197 = dma.done.wait (%p8996_p2), [#allocation21], 2064  }
 0x133   : > { %7199 = vsyncadd (%p8997_p5), [#allocation21], 4294965232  ;;  %p8998_p7 = pmov %p8987_p0 }
 0x134   : > { %p8999_p3 = pmov %p8987_p0 }
 0x135   : > { %7201 = dma.done.wait (%p8998_p7), [#allocation24], 1056  }
 0x136   : > { %7203 = vsyncadd (%p8999_p3), [#allocation24], 4294966240  ;;  %p9000_p6 = pmov %p8987_p0 }
 0x138   : > { %7205 = dma.done.wait (%p9000_p6), [#allocation27], 80  }
 0x139   : > { %7207 = vsyncadd (%p8987_p0), [#allocation27], 4294967216  ;;  %p9001_p13 = pmov %p8987_p0 }
 0x13a   : > { %p9002_p9 = pmov %p8987_p0 }
 0x13b   : > { %7209 = dma.done.wait (%p9001_p13), [#allocation30], 16  }
 0x13c   : > { %7211 = vsyncadd (%p9002_p9), [#allocation30], 4294967280  ;;  %v7712_v0 = vld [vmem:[%s921_s2] sm:$0xff]  ;;  %vm1077_vm0 = vcmask 523264   ;;  %v7714_v1 = vld [vmem:[%s921_s2 + $0x8] sm:$0xff]  ;;  %s9003_s0 = sld [smem:[#allocation49_spill]] }
 0x13d   : > { %v1075_v2 = vmul.f32 %v7712_v0, %v7712_v0  ;;  %v1076_v3 = vmul.f32 %v7714_v1, %v7714_v1  ;;  %v7254_v13 = vmov 0.0   ;;  %v5619_v28 = vld [vmem:[#allocation7] ss:$0 sm:$0xff]  ;;  %s8930_s3 = smov 64   ;;  %vm1211_vm1 = vcmask 1040384   ;;  %s9004_s27 = sld [smem:[#allocation44_spill]] }
 0x13e   : > { %1184 = vmatprep.mubr.f32.mxu1 %v7254_v13  ;;  %vm1246_vm2 = vcmask 1041408   ;;  %vm1281_vm3 = vcmask 1043456   ;;  %s9005_s19 = sld [smem:[#allocation47_spill]]  ;;  %vm1698_vm4 = vcmask 130048   ;;  %s8928_s24 = smov 48  }
 0x13f   : > { %v1078_v4 = vsel %vm1077_vm0, %v1075_v2, 0.0  ;;  %v1081_v5 = vsel %vm1077_vm0, %v1076_v3, 0.0  ;;  %s9006_s15 = sld [smem:[#allocation46_spill]]  ;;  %s8926_s26 = smov 112  }
 0x140   : > { %1079 = vadd.xlane.f32.xlu0 %v1078_v4  ;;  %s8924_s10 = smov 32   ;;  %s8922_s2 = smov 96  }
 0x141   : > { %s8920_s14 = smov 16   ;;  %s8918_s16 = smov 80  }
 0x142   : > { %v1113_v6 = vld [vmem:[%s9003_s0 + $0x78] sm:$0xff]  ;;  %v1112_v7 = vld [vmem:[%s9003_s0 + $0x70] sm:$0xff]  ;;  %v1111_v8 = vld [vmem:[%s9003_s0 + $0x68] sm:$0xff]  ;;  %s9007_s13 = sld [smem:[#allocation56_spill]]  ;;  %s9012_s6 = smov 112  }
 0x143   : > { %1136 = vmatprep.subr.mxu1 %v1113_v6  ;;  %v1110_v9 = vld [vmem:[%s9003_s0 + $0x60] sm:$0xff]  ;;  %v1109_v10 = vld [vmem:[%s9003_s0 + $0x58] sm:$0xff]  ;;  %v1108_v11 = vld [vmem:[%s9003_s0 + $0x50] sm:$0xff]  ;;  %s9009_s18 = sld [smem:[#allocation65_spill]]  ;;  %s9013_s29 = smov 32  }
 0x144   : > { %1082 = vadd.xlane.f32.xlu0 %v1081_v5  ;;  %1137 = vmatpush1.msra.mxu1 %v1112_v7  ;;  %v1107_v12 = vld [vmem:[%s9003_s0 + $0x48] sm:$0xff]  ;;  %v1106_v14 = vld [vmem:[%s9003_s0 + $0x40] sm:$0xff]  ;;  %v1105_v15 = vld [vmem:[%s9003_s0 + $0x38] sm:$0xff]  ;;  %p9021_p10 = scmp.ne.s32.totalorder %s8980_s5, 0 }
 0x145   : > { %1138 = vmatprep.subr.mxu1 %v1111_v8  ;;  %v1104_v16 = vld [vmem:[%s9003_s0 + $0x30] sm:$0xff]  ;;  %v1103_v17 = vld [vmem:[%s9003_s0 + $0x28] sm:$0xff]  ;;  %v1102_v18 = vld [vmem:[%s9003_s0 + $0x20] sm:$0xff] }
 0x146   : > { %1139 = vmatpush1.msra.mxu1 %v1110_v9  ;;  %v1101_v19 = vld [vmem:[%s9003_s0 + $0x18] sm:$0xff]  ;;  %v1100_v20 = vld [vmem:[%s9003_s0 + $0x10] sm:$0xff]  ;;  %v1099_v21 = vld [vmem:[%s9003_s0 + $0x8] sm:$0xff] }
 0x147   : > { %1140 = vmatprep.subr.mxu1 %v1109_v10  ;;  %v1098_v22 = vld [vmem:[%s9003_s0] sm:$0xff]  ;;  %s7266_s0 = smov [#allocation31]  }
 0x148   : > { %1141 = vmatpush1.msra.mxu1 %v1108_v11 }
 0x149   : > { %1142 = vmatprep.subr.mxu1 %v1107_v12 }
 0x14a   : > { %1143 = vmatpush1.msra.mxu1 %v1106_v14 }
 0x14b   : > { %1144 = vmatprep.subr.mxu1 %v1105_v15 }
 0x14c   : > { %1145 = vmatpush1.msra.mxu1 %v1104_v16 }
 0x14d   : > { %1146 = vmatprep.subr.mxu1 %v1103_v17 }
 0x14e   : > { %1147 = vmatpush1.msra.mxu1 %v1102_v18 }
 0x14f   : > { %1148 = vmatprep.subr.mxu1 %v1101_v19 }
 0x150   : > { %1149 = vmatpush1.msra.mxu1 %v1100_v20 }
 0x151   : > { %1150 = vmatprep.subr.mxu1 %v1099_v21 }
 0x152   : > { %1151 = vmatpush1.msra.mxu1 %v1098_v22 }
 0x1c9   : > { %v1080_v23 = vpop.xlane.xlu0 %1079 }
 0x1ca   : > { %v1084_v24 = vmax.f32 %v1080_v23, 1e-24 }
 0x1cc   : > { %6488 = vrsqrt.f32 %v1084_v24 }
 0x1cd   : > { %v1083_v25 = vpop.xlane.xlu0 %1082 }
 0x1ce   : > { %v1085_v26 = vmax.f32 %v1083_v25, 1e-24 }
 0x1d0   : > { %6490 = vrsqrt.f32 %v1085_v26 }
 0x1d9   : > { %v6489_v27 = vpop.eup %6488 }
 0x1da   : > { %v1088_v29 = vmul.f32 %v6489_v27, %v7712_v0 }
 0x1dc   : > { %v1096_v30 = vmul.f32 %v5619_v28, %v1088_v29 }
 0x1dd   : > { %v6491_v31 = vpop.eup %6490 }
 0x1de   : > { %5620 = vmatmul.mubr.msk.f32.vlgmr.msra.gmra.mxu1 %vm1077_vm0, %v1096_v30  ;;  %v1089_v32 = vmul.f32 %v6491_v31, %v7714_v1 }
 0x1df   : > { %1190 = vmatprep.mubr.f32.mxu1 %v7254_v13 }
 0x1e0   : > { %v1097_v33 = vmul.f32 %v5619_v28, %v1089_v32 }
 0x1e2   : > { %5621 = vmatmul.mubr.msk.f32.gmra.mxu1 %vm1077_vm0, %v1097_v33 }
 0x1e3   : > { %1467 = vmatprep.mubr.f32.mxu1 %v7254_v13 }
 0x29e   : > { %v7777_v34 = vpop.f32.mrf.mxu1 }
 0x29f   : > { %v1220_v35 = vrot.slane %v7777_v34, 7 }
 0x2a0   : > { %v1188_v36 = vpop.f32.mrf.mxu1 }
 0x2a1   : > { %1223 = vrot.lane.b32.xlu1 %v1220_v35, %s8930_s3  ;;  %v5622_v40 = vmul.f32 -1.442695, %v1188_v36 }
 0x2a2   : > { %v7781_v37 = vpop.f32.mrf.mxu1 }
 0x2a3   : > { %v1221_v38 = vrot.slane %v7781_v37, 7  ;;  %6492 = vpow2.f32 %v5622_v40 }
 0x2a4   : > { %v1194_v47 = vpop.f32.mrf.mxu1 }
 0x2a5   : > { %v1222_v39 = vsel %vm1211_vm1, %v1220_v35, %v1221_v38  ;;  %v5623_v48 = vmul.f32 -1.442695, %v1194_v47  ;;  %v1342_v47 = vld [vmem:[%s9004_s27] sm:$0xff] }
 0x2a6   : > { %1225 = vrot.lane.b32.xlu0 %v1222_v39, %s8930_s3 }
 0x2b0   : > { %v6493_v41 = vpop.eup %6492 }
 0x2b1   : > { %v1203_v42 = vadd.f32 1.0, %v6493_v41 }
 0x2b3   : > { %6494 = vrcp.f32 %v1203_v42 }
 0x2b4   : > { %6496 = vpow2.f32 %v5623_v48 }
 0x2c0   : > { %v6495_v44 = vpop.eup %6494 }
 0x2c1   : > { %v6497_v49 = vpop.eup %6496  ;;  %v1212_v57 = vrot.slane %v6495_v44, 7 }
 0x2c2   : > { %v1204_v50 = vadd.f32 1.0, %v6497_v49 }
 0x2c3   : > { %v1217_v58 = vsel %vm1211_vm1, 1.0, %v1212_v57 }
 0x2c4   : > { %6498 = vrcp.f32 %v1204_v50  ;;  %v1242_v60 = vmul.f32 %v6495_v44, %v1217_v58  ;;  %v1376_v58 = vld [vmem:[#allocation11 + $0x38] sm:$0xff] }
 0x2c6   : > { %v1247_v14 = vrot.slane %v1242_v60, 6 }
 0x2c8   : > { %v1252_v15 = vsel %vm1246_vm2, 1.0, %v1247_v14 }
 0x2c9   : > { %v1277_v16 = vmul.f32 %v1252_v15, %v1242_v60 }
 0x2cb   : > { %v1282_v19 = vrot.slane %v1277_v16, 4 }
 0x2cd   : > { %v1287_v23 = vsel %vm1281_vm3, 1.0, %v1282_v19 }
 0x2ce   : > { %v1312_v25 = vmul.f32 %v1287_v23, %v1277_v16 }
 0x2d0   : > { %v1318_v27 = vmul.f32 0.0, %v1312_v25  ;;  %v1072_v25 = vld [vmem:[%s9005_s19 + $0x30] sm:$0xff] }
 0x2d1   : > { %v6499_v55 = vpop.eup %6498 }
 0x2d2   : > { %v1213_v5 = vrot.slane %v6499_v55, 7 }
 0x2d4   : > { %v1214_v8 = vsel %vm1211_vm1, %v1212_v57, %v1213_v5  ;;  %v1377_v57 = vld [vmem:[#allocation11 + $0x40] sm:$0xff] }
 0x2d5   : > { %v1243_v10 = vmul.f32 %v6499_v55, %v1214_v8 }
 0x2d7   : > { %v1248_v28 = vrot.slane %v1243_v10, 6 }
 0x2d9   : > { %v1249_v31 = vsel %vm1246_vm2, %v1247_v14, %v1248_v28  ;;  %v1071_v28 = vld [vmem:[%s9005_s19 + $0x28] sm:$0xff] }
 0x2da   : > { %v1278_v32 = vmul.f32 %v1249_v31, %v1243_v10  ;;  %v1069_v31 = vld [vmem:[%s9005_s19 + $0x18] sm:$0xff] }
 0x2dc   : > { %v1283_v39 = vrot.slane %v1278_v32, 4 }
 0x2de   : > { %v1284_v40 = vsel %vm1281_vm3, %v1282_v19, %v1283_v39 }
 0x2df   : > { %v1313_v41 = vmul.f32 %v1284_v40, %v1278_v32 }
 0x313   : > { %v1224_v43 = vpop.permute.xlu1 %1223 }
 0x314   : > { %v1229_v45 = vsel %vm1211_vm1, 0.0, %v1224_v43 }
 0x315   : > { %v1230_v46 = vmul.f32 %v6495_v44, %v1229_v45 }
 0x317   : > { %1234 = vrot.lane.b32.xlu1 %v1230_v46, %s8930_s3 }
 0x318   : > { %v1226_v54 = vpop.permute.xlu0 %1225 }
 0x319   : > { %v1231_v56 = vmul.f32 %v6499_v55, %v1226_v54  ;;  %v1382_v54 = vld [vmem:[#allocation11 + $0x68] sm:$0xff]  ;;  %v1380_v55 = vld [vmem:[#allocation11 + $0x58] sm:$0xff] }
 0x389   : > { %v1235_v51 = vpop.permute.xlu1 %1234 }
 0x38a   : > { %v1240_v52 = vadd.f32 %v1235_v51, %v7777_v34 }
 0x38c   : > { %v1255_v53 = vrot.slane %v1240_v52, 6 }
 0x38e   : > { %1258 = vrot.lane.b32.xlu1 %v1255_v53, %s8930_s3 }
 0x392   : > { %1236 = vrot.lane.b32.xlu1 %v1231_v56, %s8930_s3  ;;  %v1379_v56 = vld [vmem:[#allocation11 + $0x50] sm:$0xff] }
 0x400   : > { %v1259_v59 = vpop.permute.xlu1 %1258 }
 0x401   : > { %v1264_v61 = vsel %vm1246_vm2, 0.0, %v1259_v59  ;;  %v1375_v59 = vld [vmem:[#allocation11 + $0x30] sm:$0xff] }
 0x402   : > { %v1265_v62 = vmul.f32 %v1264_v61, %v1242_v60  ;;  %v1374_v60 = vld [vmem:[#allocation11 + $0x28] sm:$0xff]  ;;  %v1373_v61 = vld [vmem:[#allocation11 + $0x20] sm:$0xff] }
 0x404   : > { %1269 = vrot.lane.b32.xlu1 %v1265_v62, %s8930_s3  ;;  %v1237_v63 = vpop.permute.xlu1 %1236  ;;  %v1372_v62 = vld [vmem:[#allocation11 + $0x18] sm:$0xff] }
 0x405   : > { %v1241_v2 = vadd.f32 %v1237_v63, %v7781_v37  ;;  %v1371_v63 = vld [vmem:[#allocation11 + $0x10] sm:$0xff] }
 0x407   : > { %v1256_v3 = vrot.slane %v1241_v2, 6 }
 0x409   : > { %v1257_v4 = vsel %vm1246_vm2, %v1255_v53, %v1256_v3  ;;  %v1383_v53 = vld [vmem:[#allocation11 + $0x70] sm:$0xff]  ;;  %v1369_v3 = vld [vmem:[#allocation11] sm:$0xff] }
 0x40a   : > { %1260 = vrot.lane.b32.xlu1 %v1257_v4, %s8930_s3 }
 0x476   : > { %v1270_v6 = vpop.permute.xlu1 %1269 }
 0x477   : > { %v1275_v7 = vadd.f32 %v1270_v6, %v1240_v52  ;;  %v1384_v52 = vld [vmem:[#allocation11 + $0x78] sm:$0xff] }
 0x478   : > { %1419 = vmatprep.subr.mxu1 %v1384_v52 }
 0x479   : > { %v1290_v9 = vrot.slane %v1275_v7, 4  ;;  %1420 = vmatpush1.msra.mxu1 %v1383_v53 }
 0x47a   : > { %1421 = vmatprep.subr.mxu1 %v1382_v54  ;;  %v1065_v54 = vld [vmem:[%s9006_s15 + $0x8] sm:$0xff] }
 0x47b   : > { %1293 = vrot.lane.b32.xlu1 %v1290_v9, %s8930_s3 }
 0x47c   : > { %v1261_v11 = vpop.permute.xlu1 %1260 }
 0x47d   : > { %v1266_v12 = vmul.f32 %v1261_v11, %v1243_v10  ;;  %v7828_v10 = vld [vmem:[#allocation10] ss:$0 sm:$0xff] }
 0x47f   : > { %1271 = vrot.lane.b32.xlu1 %v1266_v12, %s8930_s3 }
 0x4ed   : > { %v1294_v17 = vpop.permute.xlu1 %1293 }
 0x4ee   : > { %v1299_v18 = vsel %vm1281_vm3, 0.0, %v1294_v17 }
 0x4ef   : > { %v1300_v20 = vmul.f32 %v1299_v18, %v1277_v16  ;;  %v1343_v16 = vld [vmem:[%s9004_s27 + $0x8] sm:$0xff] }
 0x4f1   : > { %1304 = vrot.lane.b32.xlu0 %v1300_v20, %s8930_s3  ;;  %v1272_v21 = vpop.permute.xlu1 %1271 }
 0x4f2   : > { %v7803_v22 = vadd.f32 %v1272_v21, %v1241_v2  ;;  %v1370_v2 = vld [vmem:[#allocation11 + $0x8] sm:$0xff]  ;;  %v1387_v21 = vlaneseq }
 0x4f4   : > { %v1291_v24 = vrot.slane %v7803_v22, 4 }
 0x4f6   : > { %v1292_v26 = vsel %vm1281_vm3, %v1290_v9, %v1291_v24 }
 0x4f7   : > { %1295 = vrot.lane.b32.xlu1 %v1292_v26, %s8930_s3 }
 0x4fb   : > { %1322 = vrot.lane.b32.xlu1 %v1318_v27, %s8930_s3 }
 0x563   : > { %v1305_v29 = vpop.permute.xlu0 %1304 }
 0x564   : > { %v1310_v30 = vadd.f32 %v1305_v29, %v1275_v7  ;;  %v1070_v29 = vld [vmem:[%s9005_s19 + $0x20] sm:$0xff] }
 0x566   : > { %1315 = vrot.lane.b32.xlu0 %v1310_v30, %s8930_s3 }
 0x569   : > { %v1296_v33 = vpop.permute.xlu1 %1295 }
 0x56a   : > { %v1301_v35 = vmul.f32 %v1296_v33, %v1278_v32  ;;  %v1068_v32 = vld [vmem:[%s9005_s19 + $0x10] sm:$0xff]  ;;  %v1067_v33 = vld [vmem:[%s9005_s19 + $0x8] sm:$0xff] }
 0x56c   : > { %1306 = vrot.lane.b32.xlu0 %v1301_v35, %s8930_s3  ;;  %v1062_v35 = vld [vmem:[#allocation5] sm:$0xff] }
 0x56d   : > { %v1323_v36 = vpop.permute.xlu1 %1322 }
 0x56e   : > { %v1328_v38 = vadd.f32 %v1323_v36, %v1310_v30  ;;  %v1063_v30 = vld [vmem:[#allocation5 + $0x8] sm:$0xff] }
 0x570   : > { %1332 = vrot.lane.b32.xlu0 %v1328_v38, %s8930_s3 }
 0x5d8   : > { %v1316_v42 = vpop.permute.xlu0 %1315 }
 0x5d9   : > { %v1319_v43 = vmul.f32 %v1316_v42, %v1313_v41  ;;  %v1066_v42 = vld [vmem:[%s9005_s19] sm:$0xff] }
 0x5db   : > { %1324 = vrot.lane.b32.xlu1 %v1319_v43, %s8930_s3 }
 0x5de   : > { %v1307_v44 = vpop.permute.xlu0 %1306 }
 0x5df   : > { %v1311_v4 = vadd.f32 %v1307_v44, %v7803_v22  ;;  %v7844_v22 = vshrl.u32 %v1387_v21, 7 }
 0x5e1   : > { %v7847_v23 = vsub.s32 0, %v7844_v22  ;;  %v7887_v44 = vsub.s32 1, %v7844_v22 }
 0x5e2   : > { %v1333_v45 = vpop.permute.xlu0 %1332 }
 0x5e3   : > { %v1338_v46 = vmul.f32 %v1333_v45, %v7777_v34  ;;  %v1381_v34 = vld [vmem:[#allocation11 + $0x60] sm:$0xff] }
 0x5e4   : > { %1422 = vmatpush1.msra.mxu1 %v1381_v34 }
 0x5e5   : > { %v1340_v48 = vadd.f32 %v1338_v46, %v7712_v0  ;;  %1423 = vmatprep.subr.mxu1 %v1380_v55  ;;  %v1378_v0 = vld [vmem:[#allocation11 + $0x48] sm:$0xff] }
 0x5e6   : > { %1424 = vmatpush1.msra.mxu1 %v1379_v56  ;;  %v1064_v55 = vld [vmem:[%s9006_s15] sm:$0xff] }
 0x5e7   : > { %v7821_v49 = vadd.f32 %v1342_v47, %v1340_v48  ;;  %1425 = vmatprep.subr.mxu1 %v1378_v0 }
 0x5e8   : > { %1426 = vmatpush1.msra.mxu1 %v1377_v57 }
 0x5e9   : > { %v1347_v50 = vmul.f32 %v7821_v49, %v7821_v49  ;;  %1427 = vmatprep.subr.mxu1 %v1376_v58 }
 0x5ea   : > { %1428 = vmatpush1.msra.mxu1 %v1375_v59 }
 0x5eb   : > { %v1349_v51 = vsel %vm1077_vm0, %v1347_v50, 0.0  ;;  %1429 = vmatprep.subr.mxu1 %v1374_v60 }
 0x5ec   : > { %1350 = vadd.xlane.f32.xlu0 %v1349_v51  ;;  %1430 = vmatpush1.msra.mxu1 %v1373_v61 }
 0x5ed   : > { %1431 = vmatprep.subr.mxu1 %v1372_v62 }
 0x5ee   : > { %1432 = vmatpush1.msra.mxu1 %v1371_v63 }
 0x5ef   : > { %1433 = vmatprep.subr.mxu1 %v1370_v2 }
 0x5f0   : > { %1434 = vmatpush1.msra.mxu1 %v1369_v3 }
 0x64d   : > { %v1325_v5 = vpop.permute.xlu1 %1324 }
 0x64e   : > { %v1329_v6 = vadd.f32 %v1325_v5, %v1311_v4 }
 0x650   : > { %1334 = vrot.lane.b32.xlu1 %v1329_v6, %s8930_s3 }
 0x675   : > { %v1351_v7 = vpop.xlane.xlu0 %1350 }
 0x676   : > { %v1355_v8 = vmax.f32 %v1351_v7, 1e-24 }
 0x678   : > { %6500 = vrsqrt.f32 %v1355_v8 }
 0x685   : > { %v6501_v9 = vpop.eup %6500 }
 0x686   : > { %v1359_v11 = vmul.f32 %v6501_v9, %v7821_v49 }
 0x688   : > { %v1367_v12 = vmul.f32 %v7828_v10, %v1359_v11 }
 0x68a   : > { %5625 = vmatmul.mubr.msk.f32.vlgmr.msra.gmra.mxu1 %vm1077_vm0, %v1367_v12 }
 0x68b   : > { %1473 = vmatprep.mubr.f32.mxu1 %v7254_v13 }
 0x6c2   : > { %v1335_v14 = vpop.permute.xlu1 %1334 }
 0x6c3   : > { %v1339_v15 = vmul.f32 %v1335_v14, %v7781_v37  ;;  %v1385_v37 = vld [vmem:[#allocation13] sm:$0x3] }
 0x6c4   : > { %v1390_v24 = vrot.slane %v1385_v37, %v7847_v23  ;;  %v1394_v47 = vrot.slane %v1385_v37, %v7887_v44 }
 0x6c5   : > { %v1341_v17 = vadd.f32 %v1339_v15, %v7714_v1  ;;  %v1073_v1 = vld [vmem:[%s9005_s19 + $0x38] sm:$0xff] }
 0x6c6   : > { %5956 = vmatprep.subr.mxu0 %v1073_v1  ;;  %5975 = vmatprep.subr.mxu1 %v1073_v1 }
 0x6c7   : > { %v7839_v18 = vadd.f32 %v1343_v16, %v1341_v17  ;;  %5957 = vmatpush3.msra.mxu0 %v1073_v1  ;;  %5976 = vmatpush3.msra.mxu1 %v1073_v1 }
 0x6c8   : > { %5958 = vmatprep.subr.mxu0 %v1072_v25  ;;  %5977 = vmatprep.subr.mxu1 %v1072_v25 }
 0x6c9   : > { %v1348_v19 = vmul.f32 %v7839_v18, %v7839_v18  ;;  %5959 = vmatpush3.msra.mxu0 %v1072_v25  ;;  %5978 = vmatpush3.msra.mxu1 %v1072_v25 }
 0x6ca   : > { %5960 = vmatprep.subr.mxu0 %v1071_v28  ;;  %5979 = vmatprep.subr.mxu1 %v1071_v28 }
 0x6cb   : > { %v1352_v20 = vsel %vm1077_vm0, %v1348_v19, 0.0  ;;  %5961 = vmatpush3.msra.mxu0 %v1071_v28  ;;  %5980 = vmatpush3.msra.mxu1 %v1071_v28 }
 0x6cc   : > { %1353 = vadd.xlane.f32.xlu1 %v1352_v20  ;;  %5962 = vmatprep.subr.mxu0 %v1070_v29 }
 0x6cd   : > { %5981 = vmatprep.subr.mxu1 %v1070_v29  ;;  %5963 = vmatpush3.msra.mxu0 %v1070_v29 }
 0x6ce   : > { %5964 = vmatprep.subr.mxu0 %v1069_v31  ;;  %5982 = vmatpush3.msra.mxu1 %v1070_v29 }
 0x6cf   : > { %5965 = vmatpush3.msra.mxu0 %v1069_v31  ;;  %5983 = vmatprep.subr.mxu1 %v1069_v31 }
 0x6d0   : > { %5966 = vmatprep.subr.mxu0 %v1068_v32  ;;  %5984 = vmatpush3.msra.mxu1 %v1069_v31 }
 0x6d1   : > { %5967 = vmatpush3.msra.mxu0 %v1068_v32  ;;  %5985 = vmatprep.subr.mxu1 %v1068_v32 }
 0x6d2   : > { %5968 = vmatprep.subr.mxu0 %v1067_v33  ;;  %5986 = vmatpush3.msra.mxu1 %v1068_v32 }
 0x6d3   : > { %5969 = vmatpush3.msra.mxu0 %v1067_v33  ;;  %5987 = vmatprep.subr.mxu1 %v1067_v33 }
 0x6d4   : > { %5988 = vmatpush3.msra.mxu1 %v1067_v33  ;;  %5970 = vmatprep.subr.mxu0 %v1066_v42 }
 0x6d5   : > { %5989 = vmatprep.subr.mxu1 %v1066_v42  ;;  %5971 = vmatpush3.msra.mxu0 %v1066_v42 }
 0x6d6   : > { %5990 = vmatpush3.msra.mxu1 %v1066_v42 }
 0x74a   : > { %v1469_v26 = vpop.f32.mrf.mxu1 }
 0x74b   : > { %v7856_v27 = vadd.f32 %v1469_v26, %v1390_v24 }
 0x74c   : > { %v1471_v45 = vpop.f32.mrf.mxu1 }
 0x74d   : > { %1589 = vrot.lane.b32.xlu0 %v7856_v27, %s8930_s3  ;;  %5972 = vmatprep.mubr.msk.f32.mxu0 %vm1077_vm0, %v7856_v27  ;;  %v7895_v53 = vadd.f32 %v1471_v45, %v1394_v47  ;;  %v1492_v58 = vmul.f32 %v7856_v27, %v1062_v35 }
 0x751   : > { %1583 = vrot.lane.b32.xlu0 %v1063_v30, %s8930_s3 }
 0x755   : > { %1581 = vrot.lane.b32.xlu0 %v1062_v35, %s8930_s3  ;;  %v1354_v36 = vpop.xlane.xlu1 %1353 }
 0x756   : > { %v1356_v38 = vmax.f32 %v1354_v36, 1e-24 }
 0x758   : > { %6502 = vrsqrt.f32 %v1356_v38 }
 0x765   : > { %v6503_v39 = vpop.eup %6502 }
 0x766   : > { %v1360_v40 = vmul.f32 %v6503_v39, %v7839_v18 }
 0x768   : > { %v1368_v41 = vmul.f32 %v7828_v10, %v1360_v40 }
 0x76a   : > { %5626 = vmatmul.mubr.msk.f32.gmra.mxu1 %vm1077_vm0, %v1368_v41 }
 0x7bf   : > { %v1590_v43 = vpop.permute.xlu0 %1589 }
 0x7c0   : > { %5991 = vmatprep.mubr.msk.f32.mxu1 %vm1077_vm0, %v1590_v43 }
 0x7c3   : > { %v7916_v4 = vpop.permute.xlu0 %1583 }
 0x7c7   : > { %v7919_v6 = vpop.permute.xlu0 %1581 }
 0x7c8   : > { %v1587_v9 = vmul.f32 %v7919_v6, %v7856_v27 }
 0x82a   : > { %v1475_v46 = vpop.f32.mrf.mxu1 }
 0x82b   : > { %v1476_v48 = vadd.f32 %v1475_v46, %v1390_v24 }
 0x82c   : > { %v1477_v50 = vpop.f32.mrf.mxu1 }
 0x82d   : > { %v7890_v51 = vadd.f32 %v1477_v50, %v1394_v47  ;;  %1591 = vrot.lane.b32.xlu1 %v1476_v48, %s8930_s3  ;;  %5973 = vmatmul.mubr.msk.f32.vlgmr.msra.gmra.mxu0 %vm1077_vm0, %v1476_v48  ;;  %v1493_v56 = vmul.f32 %v1476_v48, %v1063_v30  ;;  %v1588_v5 = vmul.f32 %v7916_v4, %v1476_v48  ;;  %v7258_v50 = vmov 65  }
 0x82e   : > { %6470 = vset.pattern.permute.xlu1 %v7258_v50 }
 0x82f   : > { %6001 = vmatprep.subr.mxu1 %v7890_v51 }
 0x89f   : > { %v1592_v52 = vpop.permute.xlu1 %1591 }
 0x8a0   : > { %5992 = vmatmul.mubr.msk.f32.vlgmr.msra.gmra.mxu1 %vm1077_vm0, %v1592_v52 }
 0x8a1   : > { %6002 = vmatpush3.msra.mxu1 %v7890_v51 }
 0x8a2   : > { %6003 = vmatprep.subr.mxu1 %v7895_v53 }
 0x8a3   : > { %6004 = vmatpush3.msra.mxu1 %v7895_v53 }
 0x8ed   : > { %v5974_v34 = vpop.f32.mrf.mxu0 }
 0x8ee   : > { %v1576_v0 = vmul.f32 %v5974_v34, %v1065_v54 }
 0x8ef   : > { %v1566_v57 = vpop.f32.mrf.mxu0 }
 0x8f0   : > { %v7908_v59 = vadd.f32 %v1576_v0, %v1493_v56  ;;  %v1575_v60 = vmul.f32 %v1566_v57, %v1064_v55  ;;  %v5627_v0 = vmul.f32 -1.442695, %v7895_v53 }
 0x8f2   : > { %v7910_v61 = vadd.f32 %v1575_v60, %v1492_v58  ;;  %v5628_v58 = vmul.f32 -1.442695, %v7890_v51 }
 0x8f4   : > { %5998 = vmatprep.mubr.msk.f32.mxu0 %vm1698_vm4, %v7910_v61 }
 0x960   : > { %v5993_v62 = vpop.f32.mrf.mxu1 }
 0x961   : > { %v1673_v63 = vmul.f32 %v5993_v62, %v1065_v54 }
 0x962   : > { %v1663_v2 = vpop.f32.mrf.mxu1 }
 0x963   : > { %1678 = vrot.lane.b32.xlu1 %v1673_v63, %s8930_s3  ;;  %v1672_v3 = vmul.f32 %v1663_v2, %v1064_v55 }
 0x967   : > { %1676 = vrot.lane.b32.xlu1 %v1672_v3, %s8930_s3 }
 0x9d5   : > { %v1679_v7 = vpop.permute.xlu1 %1678 }
 0x9d6   : > { %v7921_v8 = vadd.f32 %v1679_v7, %v1588_v5 }
 0x9d8   : > { %1696 = vrot.lane.b32.xlu0 %v7921_v8, %s8930_s3 }
 0x9d9   : > { %v1677_v10 = vpop.permute.xlu1 %1676 }
 0x9da   : > { %v7927_v11 = vadd.f32 %v1677_v10, %v1587_v9 }
 0x9dc   : > { %1694 = vrot.lane.b32.xlu1 %v7927_v11, %s8930_s3 }
 0xa4a   : > { %v1697_v12 = vpop.permute.xlu0 %1696 }
 0xa4b   : > { %5994 = vmatprep.subr.msk.mxu0 %vm1698_vm4, %v1697_v12 }
 0xa4c   : > { %5995 = vmatpush3.xpose.msk.msra.mxu0 %vm1698_vm4, %v1697_v12 }
 0xa4e   : > { %v1695_v14 = vpop.permute.xlu1 %1694 }
 0xa4f   : > { %5996 = vmatprep.subr.msk.mxu0 %vm1698_vm4, %v1695_v14 }
 0xa50   : > { %5997 = vmatpush3.xpose.msk.msra.mxu0 %vm1698_vm4, %v1695_v14 }
 0xa53   : > { %5999 = vmatmul.mubr.msk.f32.vlgmr.msra.gmra.mxu0 %vm1698_vm4, %v7908_v59 }
 0xb13   : > { %v6000_v15 = vpop.f32.mrf.mxu0 }
 0xb14   : > { %v1785_v16 = vmul.f32 0.02, %v6000_v15 }
 0xb15   : > { %v1775_v17 = vpop.f32.mrf.mxu0 }
 0xb16   : > { %6504 = vtanh.f32 %v1785_v16  ;;  %v1784_v19 = vmul.f32 0.02, %v1775_v17 }
 0xb18   : > { %6506 = vtanh.f32 %v1784_v19 }
 0xb23   : > { %v6505_v20 = vpop.eup %6504 }
 0xb24   : > { %v1789_v21 = vmul.f32 50.0, %v6505_v20 }
 0xb25   : > { %v6507_v37 = vpop.eup %6506 }
 0xb26   : > { %v1793_v24 = vsel %vm1698_vm4, %v1789_v21, -inf  ;;  %v1788_v1 = vmul.f32 50.0, %v6507_v37 }
 0xb27   : > { %1794 = vmax.xlane.f32.xlu1 %v1793_v24 }
 0xb28   : > { %v1790_v25 = vsel %vm1698_vm4, %v1788_v1, -inf }
 0xb29   : > { %1791 = vmax.xlane.f32.xlu0 %v1790_v25 }
 0xb38   : > { %1911 = vrot.lane.b32.xlu1 %v7921_v8, %s8928_s24 }
 0xb3c   : > { %1905 = vrot.lane.b32.xlu1 %v7910_v61, %s8926_s26 }
 0xb40   : > { %1907 = vrot.lane.b32.xlu1 %v7908_v59, %s8926_s26 }
 0xbb0   : > { %v1795_v26 = vpop.xlane.xlu1 %1794 }
 0xbb1   : > { %v1797_v27 = vsub.f32 %v1789_v21, %v1795_v26 }
 0xbb2   : > { %v1792_v28 = vpop.xlane.xlu0 %1791 }
 0xbb3   : > { %v1796_v29 = vsub.f32 %v1788_v1, %v1792_v28  ;;  %v1800_v31 = vmul.f32 1.442695, %v1797_v27 }
 0xbb4   : > { %v1912_v30 = vpop.permute.xlu1 %1911 }
 0xbb5   : > { %v1798_v32 = vmul.f32 1.442695, %v1796_v29  ;;  %6008 = vmatprep.subr.msk.mxu1 %vm1698_vm4, %v1912_v30  ;;  %v1687_v29 = vld [vmem:[#allocation14 + $0x18] sm:$0xff] }
 0xbb7   : > { %6508 = vpow2.f32 %v1798_v32 }
 0xbb8   : > { %6510 = vpow2.f32 %v1800_v31  ;;  %v1906_v46 = vpop.permute.xlu1 %1905 }
 0xbbc   : > { %v1908_v48 = vpop.permute.xlu1 %1907 }
 0xbc4   : > { %v6509_v33 = vpop.eup %6508 }
 0xbc5   : > { %v1802_v35 = vsel %vm1698_vm4, %v6509_v33, 0.0  ;;  %v6511_v36 = vpop.eup %6510 }
 0xbc6   : > { %1803 = vadd.xlane.f32.xlu0 %v1802_v35  ;;  %v1805_v38 = vsel %vm1698_vm4, %v6511_v36, 0.0  ;;  %v1686_v35 = vld [vmem:[#allocation14 + $0x10] sm:$0xff] }
 0xbca   : > { %1806 = vadd.xlane.f32.xlu0 %v1805_v38 }
 0xbe0   : > { %1909 = vrot.lane.b32.xlu0 %v7927_v11, %s8928_s24  ;;  %s9016_s24 = smov 80  }
 0xc4f   : > { %v1804_v39 = vpop.xlane.xlu0 %1803 }
 0xc50   : > { %6512 = vrcp.f32 %v1804_v39 }
 0xc53   : > { %v1807_v40 = vpop.xlane.xlu0 %1806 }
 0xc54   : > { %6514 = vrcp.f32 %v1807_v40 }
 0xc57   : > { %v1910_v47 = vpop.permute.xlu0 %1909 }
 0xc5d   : > { %v6513_v41 = vpop.eup %6512 }
 0xc5e   : > { %v1810_v42 = vmul.f32 %v6513_v41, %v6509_v33 }
 0xc60   : > { %6005 = vmatprep.mubr.msk.f32.mxu1 %vm1698_vm4, %v1810_v42 }
 0xc61   : > { %v6515_v43 = vpop.eup %6514 }
 0xc62   : > { %v1811_v45 = vmul.f32 %v6515_v43, %v6511_v36 }
 0xc64   : > { %6006 = vmatmul.mubr.msk.f32.vlgmr.msra.gmra.mxu1 %vm1698_vm4, %v1811_v45 }
 0xc65   : > { %6009 = vmatpush3.xpose.msk.msra.mxu1 %vm1698_vm4, %v1912_v30  ;;  %6012 = vmatprep.mubr.msk.f32.mxu1 %vm1698_vm4, %v1906_v46 }
 0xc66   : > { %6010 = vmatprep.subr.msk.mxu1 %vm1698_vm4, %v1910_v47 }
 0xc69   : > { %6011 = vmatpush3.xpose.msk.msra.mxu1 %vm1698_vm4, %v1910_v47 }
 0xc6c   : > { %6013 = vmatmul.mubr.msk.f32.vlgmr.msra.gmra.mxu1 %vm1698_vm4, %v1908_v48 }
 0xd24   : > { %v7958_v52 = vpop.f32.mrf.mxu1 }
 0xd26   : > { %v7960_v54 = vpop.f32.mrf.mxu1 }
 0xd2c   : > { %v6014_v34 = vpop.f32.mrf.mxu1 }
 0xd2d   : > { %v1997_v55 = vmul.f32 0.02, %v6014_v34 }
 0xd2e   : > { %v1987_v56 = vpop.f32.mrf.mxu1 }
 0xd2f   : > { %6516 = vtanh.f32 %v1997_v55  ;;  %v1996_v57 = vmul.f32 0.02, %v1987_v56  ;;  %v7263_v55 = vmov 64  }
 0xd30   : > { %6472 = vset.pattern.permute.xlu0 %v7263_v55 }
 0xd31   : > { %6518 = vtanh.f32 %v1996_v57 }
 0xd32   : > { %6520 = vpow2.f32 %v5627_v0 }
 0xd33   : > { %6522 = vpow2.f32 %v5628_v58 }
 0xd3c   : > { %v6517_v60 = vpop.eup %6516 }
 0xd3d   : > { %v2001_v62 = vmul.f32 50.0, %v6517_v60 }
 0xd3e   : > { %v6519_v63 = vpop.eup %6518 }
 0xd3f   : > { %v2005_v2 = vsel %vm1698_vm4, %v2001_v62, -inf  ;;  %v2000_v3 = vmul.f32 50.0, %v6519_v63  ;;  %v6521_v5 = vpop.eup %6520 }
 0xd40   : > { %2006 = vmax.xlane.f32.xlu1 %v2005_v2  ;;  %v1486_v9 = vadd.f32 1.0, %v6521_v5  ;;  %v6523_v10 = vpop.eup %6522 }
 0xd41   : > { %v2002_v7 = vsel %vm1698_vm4, %v2000_v3, -inf  ;;  %v1487_v12 = vadd.f32 1.0, %v6523_v10  ;;  %v1685_v10 = vld [vmem:[#allocation14 + $0x8] sm:$0xff] }
 0xd42   : > { %2003 = vmax.xlane.f32.xlu0 %v2002_v7  ;;  %6524 = vrcp.f32 %v1486_v9  ;;  %6029 = vmatprep.subr.mxu1 %v1685_v10 }
 0xd43   : > { %6526 = vrcp.f32 %v1487_v12  ;;  %6030 = vmatpush3.msra.mxu1 %v1685_v10  ;;  %v1684_v12 = vld [vmem:[#allocation14] sm:$0xff] }
 0xd44   : > { %6031 = vmatprep.subr.mxu1 %v1684_v12 }
 0xd45   : > { %6032 = vmatpush3.msra.mxu1 %v1684_v12 }
 0xd4f   : > { %v7968_v14 = vpop.eup %6524 }
 0xd50   : > { %v7971_v15 = vpop.eup %6526 }
 0xd51   : > { %2028 = vrot.lane.b32.xlu1 %v7890_v51, %s8926_s26 }
 0xd55   : > { %2114 = vperm.xlu1 %6470, %v7968_v14  }
 0xd59   : > { %2118 = vperm.xlu1 %6470, %v7971_v15  }
 0xd5d   : > { %2289 = vrot.lane.b32.xlu1 %v7927_v11, %s8924_s10 }
 0xd5e   : > { %6471 = vset.pattern.permute.xlu1 %v7263_v55 }
 0xd61   : > { %2287 = vrot.lane.b32.xlu1 %v7908_v59, %s8922_s2 }
 0xd65   : > { %2588 = vrot.lane.b32.xlu1 %v7927_v11, %s8920_s14 }
 0xd69   : > { %2586 = vrot.lane.b32.xlu1 %v7908_v59, %s8918_s16 }
 0xdc9   : > { %v2007_v16 = vpop.xlane.xlu1 %2006 }
 0xdca   : > { %v2009_v17 = vsub.f32 %v2001_v62, %v2007_v16  ;;  %v7264_v16 = vmov 66  }
 0xdcb   : > { %v2004_v19 = vpop.xlane.xlu0 %2003 }
 0xdcc   : > { %v2012_v20 = vmul.f32 1.442695, %v2009_v17  ;;  %v2008_v21 = vsub.f32 %v2000_v3, %v2004_v19 }
 0xdcd   : > { %v2029_v37 = vpop.permute.xlu1 %2028 }
 0xdce   : > { %6528 = vpow2.f32 %v2012_v20  ;;  %v2010_v24 = vmul.f32 1.442695, %v2008_v21  ;;  %6015 = vmatprep.subr.mxu0 %v2029_v37 }
 0xdcf   : > { %6016 = vmatpush3.msra.mxu0 %v2029_v37 }
 0xdd0   : > { %6530 = vpow2.f32 %v2010_v24 }
 0xddb   : > { %v6529_v1 = vpop.eup %6528 }
 0xddc   : > { %v2017_v25 = vsel %vm1698_vm4, %v6529_v1, 0.0 }
 0xddd   : > { %v6531_v26 = vpop.eup %6530  ;;  %2018 = vadd.xlane.f32.xlu0 %v2017_v25 }
 0xdde   : > { %v2014_v11 = vsel %vm1698_vm4, %v6531_v26, 0.0 }
 0xde1   : > { %2015 = vadd.xlane.f32.xlu0 %v2014_v11 }
 0xdf7   : > { %2026 = vrot.lane.b32.xlu0 %v7895_v53, %s8926_s26  ;;  %s9011_s26 = smov 48  }
 0xdfb   : > { %2291 = vrot.lane.b32.xlu0 %v7921_v8, %s8924_s10  ;;  %s9008_s10 = sld [smem:[#allocation58_spill]] }
 0xdff   : > { %2285 = vrot.lane.b32.xlu0 %v7910_v61, %s8922_s2 }
 0xe03   : > { %2590 = vrot.lane.b32.xlu0 %v7921_v8, %s8920_s14  ;;  %v2115_v8 = vpop.permute.xlu1 %2114  ;;  %s9014_s14 = smov 96  }
 0xe07   : > { %2584 = vrot.lane.b32.xlu0 %v7910_v61, %s8918_s16  ;;  %v2119_v36 = vpop.permute.xlu1 %2118 }
 0xe0b   : > { %v2290_v41 = vpop.permute.xlu1 %2289 }
 0xe0f   : > { %v2288_v46 = vpop.permute.xlu1 %2287 }
 0xe13   : > { %v2589_v48 = vpop.permute.xlu1 %2588 }
 0xe17   : > { %v2587_v34 = vpop.permute.xlu1 %2586 }
 0xe66   : > { %v2019_v59 = vpop.xlane.xlu0 %2018 }
 0xe67   : > { %6532 = vrcp.f32 %v2019_v59 }
 0xe6a   : > { %v2016_v27 = vpop.xlane.xlu0 %2015 }
 0xe6b   : > { %6534 = vrcp.f32 %v2016_v27 }
 0xe6e   : > { %v2027_v28 = vpop.permute.xlu0 %2026 }
 0xe6f   : > { %6017 = vmatprep.subr.mxu0 %v2027_v28 }
 0xe70   : > { %6018 = vmatpush3.msra.mxu0 %v2027_v28 }
 0xe71   : > { %6022 = vmatprep.subr.mxu0 %v1687_v29 }
 0xe72   : > { %v2292_v61 = vpop.permute.xlu0 %2291 }
 0xe74   : > { %v6533_v30 = vpop.eup %6532 }
 0xe75   : > { %v2023_v33 = vmul.f32 %v6533_v30, %v6529_v1 }
 0xe76   : > { %v2286_v39 = vpop.permute.xlu0 %2285 }
 0xe78   : > { %v6535_v31 = vpop.eup %6534 }
 0xe79   : > { %v2022_v32 = vmul.f32 %v6535_v31, %v6531_v26 }
 0xe7a   : > { %v2591_v45 = vpop.permute.xlu0 %2590 }
 0xe7b   : > { %6019 = vmatprep.mubr.msk.f32.mxu0 %vm1698_vm4, %v2022_v32 }
 0xe7c   : > { %6020 = vmatmul.mubr.msk.f32.vlgmr.msra.gmra.mxu0 %vm1698_vm4, %v2023_v33 }
 0xe7d   : > { %6023 = vmatpush3.msra.mxu0 %v1687_v29 }
 0xe7e   : > { %6024 = vmatprep.subr.mxu0 %v1686_v35  ;;  %v2585_v47 = vpop.permute.xlu0 %2584 }
 0xe7f   : > { %6025 = vmatpush3.msra.mxu0 %v1686_v35 }
 0xe80   : > { %6036 = vmatprep.subr.msk.mxu0 %vm1698_vm4, %v2292_v61 }
 0xf3c   : > { %v6021_v38 = vpop.f32.mrf.mxu0 }
 0xf3d   : > { %v2122_v43 = vmul.f32 %v6021_v38, %v2119_v36  ;;  %v7265_v36 = vmov 67  }
 0xf3e   : > { %v2104_v40 = vpop.f32.mrf.mxu0 }
 0xf3f   : > { %v2121_v42 = vmul.f32 %v2115_v8, %v2104_v40 }
 0xf41   : > { %6026 = vmatprep.mubr.msk.f32.mxu0 %vm1698_vm4, %v2121_v42 }
 0xf42   : > { %6027 = vmatmul.mubr.msk.f32.vlgmr.msra.gmra.mxu0 %vm1698_vm4, %v2122_v43 }
 0xf43   : > { %6037 = vmatpush3.xpose.msk.msra.mxu0 %vm1698_vm4, %v2292_v61  ;;  %6040 = vmatprep.mubr.msk.f32.mxu0 %vm1698_vm4, %v2286_v39 }
 0xf44   : > { %6038 = vmatprep.subr.msk.mxu0 %vm1698_vm4, %v2290_v41 }
 0xf47   : > { %6039 = vmatpush3.xpose.msk.msra.mxu0 %vm1698_vm4, %v2290_v41 }
 0xf48   : > { %6057 = vmatprep.subr.msk.mxu0 %vm1698_vm4, %v2591_v45 }
 0xf4a   : > { %6041 = vmatmul.mubr.msk.f32.vlgmr.msra.gmra.mxu0 %vm1698_vm4, %v2288_v46 }
 0xf4b   : > { %6058 = vmatpush3.xpose.msk.msra.mxu0 %vm1698_vm4, %v2591_v45  ;;  %6061 = vmatprep.mubr.msk.f32.mxu0 %vm1698_vm4, %v2585_v47  ;;  %v1689_v45 = vld [vmem:[#allocation14 + $0x28] sm:$0xff] }
 0xf4c   : > { %6059 = vmatprep.subr.msk.mxu0 %vm1698_vm4, %v2589_v48 }
 0xf4f   : > { %6060 = vmatpush3.xpose.msk.msra.mxu0 %vm1698_vm4, %v2589_v48 }
 0xf52   : > { %6062 = vmatmul.mubr.msk.f32.vlgmr.msra.gmra.mxu0 %vm1698_vm4, %v2587_v34 }
 0xf53   : > { %3032 = vmatprep.mubr.f32.mxu0 %v7254_v13 }
0x1002   : > { %v8013_v56 = vpop.f32.mrf.mxu0 }
0x1004   : > { %v8015_v0 = vpop.f32.mrf.mxu0 }
0x100a   : > { %v6042_v57 = vpop.f32.mrf.mxu0 }
0x100b   : > { %v2377_v58 = vmul.f32 0.02, %v6042_v57 }
0x100c   : > { %v2367_v60 = vpop.f32.mrf.mxu0 }
0x100d   : > { %6536 = vtanh.f32 %v2377_v58  ;;  %v2376_v62 = vmul.f32 0.02, %v2367_v60  ;;  %v1688_v58 = vld [vmem:[#allocation14 + $0x20] sm:$0xff] }
0x100f   : > { %6538 = vtanh.f32 %v2376_v62 }
0x1012   : > { %v6063_v17 = vpop.f32.mrf.mxu0 }
0x1013   : > { %v2676_v35 = vmul.f32 0.02, %v6063_v17 }
0x1014   : > { %v2666_v19 = vpop.f32.mrf.mxu0 }
0x1015   : > { %v2675_v20 = vmul.f32 0.02, %v2666_v19 }
0x1017   : > { %6540 = vtanh.f32 %v2675_v20 }
0x101a   : > { %v6537_v63 = vpop.eup %6536 }
0x101b   : > { %v2381_v2 = vmul.f32 50.0, %v6537_v63 }
0x101c   : > { %v6539_v3 = vpop.eup %6538 }
0x101d   : > { %v2385_v5 = vsel %vm1698_vm4, %v2381_v2, -inf  ;;  %v2380_v7 = vmul.f32 50.0, %v6539_v3 }
0x101e   : > { %2386 = vmax.xlane.f32.xlu1 %v2385_v5 }
0x101f   : > { %v2382_v9 = vsel %vm1698_vm4, %v2380_v7, -inf }
0x1020   : > { %2383 = vmax.xlane.f32.xlu0 %v2382_v9 }
0x1024   : > { %v6541_v21 = vpop.eup %6540 }
0x1025   : > { %v8025_v37 = vmul.f32 50.0, %v6541_v21 }
0x1027   : > { %v2681_v24 = vsel %vm1698_vm4, %v8025_v37, -inf }
0x102f   : > { %1895 = vperm.xlu1 %6471, %v7968_v14  }
0x1033   : > { %2406 = vrot.lane.b32.xlu1 %v7890_v51, %s8922_s2 }
0x1034   : > { %6473 = vset.pattern.permute.xlu1 %v7264_v16 }
0x1037   : > { %2404 = vrot.lane.b32.xlu1 %v7895_v53, %s8922_s2  ;;  %s9017_s2 = sld [smem:[#allocation63_spill]] }
0x105b   : > { %2682 = vmax.xlane.f32.xlu1 %v2681_v24 }
0x106c   : > { %2492 = vperm.xlu1 %6473, %v7968_v14  }
0x1070   : > { %2705 = vrot.lane.b32.xlu1 %v7890_v51, %s8918_s16 }
0x1071   : > { %6475 = vset.pattern.permute.xlu1 %v7265_v36 }
0x10a7   : > { %v2387_v1 = vpop.xlane.xlu1 %2386 }
0x10a8   : > { %v2389_v25 = vsub.f32 %v2381_v2, %v2387_v1 }
0x10a9   : > { %v2384_v26 = vpop.xlane.xlu0 %2383 }
0x10aa   : > { %v2392_v11 = vmul.f32 1.442695, %v2389_v25  ;;  %v2388_v59 = vsub.f32 %v2380_v7, %v2384_v26 }
0x10ab   : > { %v1896_v27 = vpop.permute.xlu1 %1895 }
0x10ac   : > { %6542 = vpow2.f32 %v2392_v11  ;;  %v2390_v28 = vmul.f32 1.442695, %v2388_v59  ;;  %v1903_v29 = vmul.f32 %v1896_v27, %v7960_v54  ;;  %v1691_v11 = vld [vmem:[#allocation14 + $0x38] sm:$0xff]  ;;  %v1690_v59 = vld [vmem:[#allocation14 + $0x30] sm:$0xff] }
0x10ae   : > { %6544 = vpow2.f32 %v2390_v28  ;;  %6033 = vmatprep.mubr.msk.f32.mxu1 %vm1698_vm4, %v1903_v29 }
0x10af   : > { %v2407_v30 = vpop.permute.xlu1 %2406  ;;  %6546 = vtanh.f32 %v2676_v35 }
0x10b0   : > { %6043 = vmatprep.subr.mxu1 %v2407_v30 }
0x10b3   : > { %v2405_v40 = vpop.permute.xlu1 %2404 }
0x10b9   : > { %v6543_v31 = vpop.eup %6542 }
0x10ba   : > { %v2397_v32 = vsel %vm1698_vm4, %v6543_v31, 0.0 }
0x10bb   : > { %v6545_v33 = vpop.eup %6544  ;;  %2398 = vadd.xlane.f32.xlu0 %v2397_v32 }
0x10bc   : > { %v2394_v51 = vsel %vm1698_vm4, %v6545_v33, 0.0  ;;  %v6547_v54 = vpop.eup %6546 }
0x10bd   : > { %v2680_v61 = vmul.f32 50.0, %v6547_v54 }
0x10bf   : > { %2395 = vadd.xlane.f32.xlu0 %v2394_v51  ;;  %v2684_v8 = vsel %vm1698_vm4, %v2680_v61, -inf }
0x10d5   : > { %1900 = vperm.xlu0 %6472, %v7971_v15  }
0x10d9   : > { %6474 = vset.pattern.permute.xlu0 %v7264_v16 }
0x10e4   : > { %v2683_v42 = vpop.xlane.xlu1 %2682 }
0x10e5   : > { %v2687_v60 = vsub.f32 %v8025_v37, %v2683_v42 }
0x10e7   : > { %v2689_v2 = vmul.f32 1.442695, %v2687_v60  ;;  %v2935_v60 = vld [vmem:[%s9007_s13 + $0xd8] sm:$0xff] }
0x10e8   : > { %v2493_v48 = vpop.permute.xlu1 %2492 }
0x10f4   : > { %2685 = vmax.xlane.f32.xlu0 %v2684_v8 }
0x110a   : > { %2496 = vperm.xlu0 %6474, %v7971_v15  }
0x110e   : > { %6483 = vset.pattern.permute.xlu0 %v7263_v55 }
0x1144   : > { %v2399_v38 = vpop.xlane.xlu0 %2398 }
0x1145   : > { %6548 = vrcp.f32 %v2399_v38 }
0x1148   : > { %v2396_v39 = vpop.xlane.xlu0 %2395 }
0x1149   : > { %6550 = vrcp.f32 %v2396_v39 }
0x1150   : > { %v1901_v41 = vpop.permute.xlu0 %1900 }
0x1151   : > { %v1904_v43 = vmul.f32 %v7958_v52, %v1901_v41  ;;  %v2706_v52 = vpop.permute.xlu1 %2705 }
0x1152   : > { %v6549_v46 = vpop.eup %6548 }
0x1153   : > { %6034 = vmatmul.mubr.msk.f32.vlgmr.msra.gmra.mxu1 %vm1698_vm4, %v1904_v43  ;;  %v2403_v57 = vmul.f32 %v6549_v46, %v6543_v31 }
0x1154   : > { %6044 = vmatpush3.msra.mxu1 %v2407_v30 }
0x1155   : > { %6045 = vmatprep.subr.mxu1 %v2405_v40 }
0x1156   : > { %v6551_v47 = vpop.eup %6550  ;;  %6046 = vmatpush3.msra.mxu1 %v2405_v40 }
0x1157   : > { %v2402_v34 = vmul.f32 %v6551_v47, %v6545_v33  ;;  %6050 = vmatprep.subr.mxu1 %v1689_v45  ;;  %v2937_v47 = vld [vmem:[%s9007_s13 + $0xe8] sm:$0xff] }
0x1158   : > { %2984 = vmatprep.subr.mxu0 %v2937_v47  ;;  %v3173_v47 = vld [vmem:[%s9008_s10 + $0x58] sm:$0xff] }
0x1159   : > { %6047 = vmatprep.mubr.msk.f32.mxu1 %vm1698_vm4, %v2402_v34  ;;  %v2936_v34 = vld [vmem:[%s9007_s13 + $0xe0] sm:$0xff] }
0x115a   : > { %6048 = vmatmul.mubr.msk.f32.vlgmr.msra.gmra.mxu1 %vm1698_vm4, %v2403_v57  ;;  %v6476_v57 = vpack.i.bf16 %v7839_v18, %v7821_v49  ;;  %2985 = vmatpush1.msra.mxu0 %v2936_v34  ;;  %v3172_v34 = vld [vmem:[%s9008_s10 + $0x50] sm:$0xff] }
0x115b   : > { %6051 = vmatpush3.msra.mxu1 %v1689_v45 }
0x115c   : > { %6052 = vmatprep.subr.mxu1 %v1688_v58 }
0x115d   : > { %6053 = vmatpush3.msra.mxu1 %v1688_v58  ;;  %v2938_v58 = vld [vmem:[%s9007_s13 + $0xf0] sm:$0xff] }
0x115e   : > { %6064 = vmatprep.subr.mxu1 %v2706_v52 }
0x117d   : > { %v2686_v62 = vpop.xlane.xlu0 %2685 }
0x117e   : > { %v2688_v63 = vsub.f32 %v2680_v61, %v2686_v62  ;;  %v2929_v62 = vld [vmem:[%s9007_s13 + $0xa8] sm:$0xff] }
0x1180   : > { %v2691_v3 = vmul.f32 1.442695, %v2688_v63  ;;  %v2931_v63 = vld [vmem:[%s9007_s13 + $0xb8] sm:$0xff] }
0x1182   : > { %6552 = vpow2.f32 %v2691_v3  ;;  %v2930_v3 = vld [vmem:[%s9007_s13 + $0xb0] sm:$0xff] }
0x1183   : > { %6554 = vpow2.f32 %v2689_v2  ;;  %v2928_v2 = vld [vmem:[%s9007_s13 + $0xa0] sm:$0xff] }
0x1185   : > { %v2497_v37 = vpop.permute.xlu0 %2496 }
0x118f   : > { %v6553_v5 = vpop.eup %6552 }
0x1190   : > { %v2696_v7 = vsel %vm1698_vm4, %v6553_v5, 0.0  ;;  %v6555_v9 = vpop.eup %6554 }
0x1191   : > { %2697 = vadd.xlane.f32.xlu1 %v2696_v7  ;;  %v2693_v10 = vsel %vm1698_vm4, %v6555_v9, 0.0  ;;  %v2927_v7 = vld [vmem:[%s9007_s13 + $0x98] sm:$0xff] }
0x1195   : > { %2694 = vadd.xlane.f32.xlu1 %v2693_v10  ;;  %v2926_v10 = vld [vmem:[%s9007_s13 + $0x90] sm:$0xff] }
0x11a6   : > { %2703 = vrot.lane.b32.xlu1 %v7895_v53, %s8918_s16  ;;  %s9019_s16 = sshll.u32 %s7666_s17, 4 }
0x11a7   : > { %s1059_s12 = scalar_lea.vmem [#allocation31], %s9019_s16  ;;  %s7134_s16 = sshll.u32 %s7266_s0, 4  ;;  %s7135_s16 = int_to_ptr.vmem [resolvable:$false] %s7134_s16 }
0x11aa   : > { %2791 = vperm.xlu1 %6475, %v7968_v14  }
0x11ae   : > { %2795 = vperm.xlu1 %6475, %v7971_v15  }
0x11b2   : > { %6481 = vset.pattern.permute.xlu1 %v7258_v50 }
0x1213   : > { %v6035_v12 = vpop.f32.mrf.mxu1 }
0x1214   : > { %v2282_v27 = vadd.f32 %v6035_v12, %v8013_v56  ;;  %v2921_v12 = vld [vmem:[%s9007_s13 + $0x68] sm:$0xff] }
0x1215   : > { %v2276_v17 = vpop.f32.mrf.mxu1 }
0x1216   : > { %v2277_v29 = vadd.f32 %v2276_v17, %v8015_v0  ;;  %v2923_v17 = vld [vmem:[%s9007_s13 + $0x78] sm:$0xff] }
0x121a   : > { %v6049_v19 = vpop.f32.mrf.mxu1  ;;  %v2698_v20 = vpop.xlane.xlu1 %2697 }
0x121b   : > { %v2500_v1 = vmul.f32 %v6049_v19, %v2497_v37  ;;  %6556 = vrcp.f32 %v2698_v20  ;;  %v2920_v19 = vld [vmem:[%s9007_s13 + $0x60] sm:$0xff]  ;;  %v2922_v20 = vld [vmem:[%s9007_s13 + $0x70] sm:$0xff]  ;;  %v2919_v37 = vld [vmem:[%s9007_s13 + $0x58] sm:$0xff] }
0x121c   : > { %v2482_v21 = vpop.f32.mrf.mxu1 }
0x121d   : > { %v2499_v24 = vmul.f32 %v2493_v48, %v2482_v21  ;;  %v2939_v48 = vld [vmem:[%s9007_s13 + $0xf8] sm:$0xff]  ;;  %v2917_v21 = vld [vmem:[%s9007_s13 + $0x48] sm:$0xff] }
0x121e   : > { %v2695_v25 = vpop.xlane.xlu1 %2694 }
0x121f   : > { %6558 = vrcp.f32 %v2695_v25  ;;  %6054 = vmatprep.mubr.msk.f32.mxu1 %vm1698_vm4, %v2499_v24  ;;  %v2916_v24 = vld [vmem:[%s9007_s13 + $0x40] sm:$0xff]  ;;  %v2913_v25 = vld [vmem:[%s9007_s13 + $0x28] sm:$0xff] }
0x1220   : > { %6055 = vmatmul.mubr.msk.f32.vlgmr.msra.gmra.mxu1 %vm1698_vm4, %v2500_v1  ;;  %v2918_v1 = vld [vmem:[%s9007_s13 + $0x50] sm:$0xff] }
0x1221   : > { %6065 = vmatpush3.msra.mxu1 %v2706_v52  ;;  %v2933_v52 = vld [vmem:[%s9007_s13 + $0xc8] sm:$0xff] }
0x1222   : > { %v2704_v53 = vpop.permute.xlu1 %2703  ;;  %2986 = vmatprep.subr.mxu0 %v2933_v52  ;;  %v3186_v52 = vld [vmem:[%s9008_s10 + $0xc0] sm:$0xff] }
0x1223   : > { %6066 = vmatprep.subr.mxu1 %v2704_v53 }
0x1224   : > { %6067 = vmatpush3.msra.mxu1 %v2704_v53  ;;  %v2915_v53 = vld [vmem:[%s9007_s13 + $0x38] sm:$0xff] }
0x1225   : > { %6071 = vmatprep.subr.mxu1 %v1691_v11 }
0x1226   : > { %v2792_v33 = vpop.permute.xlu1 %2791 }
0x1228   : > { %v6557_v50 = vpop.eup %6556 }
0x1229   : > { %v2702_v26 = vmul.f32 %v6557_v50, %v6553_v5  ;;  %v2925_v5 = vld [vmem:[%s9007_s13 + $0x88] sm:$0xff]  ;;  %v2912_v50 = vld [vmem:[%s9007_s13 + $0x20] sm:$0xff] }
0x122a   : > { %v2796_v54 = vpop.permute.xlu1 %2795 }
0x122c   : > { %v6559_v14 = vpop.eup %6558 }
0x122d   : > { %v2701_v15 = vmul.f32 %v6559_v14, %v6555_v9  ;;  %v2924_v9 = vld [vmem:[%s9007_s13 + $0x80] sm:$0xff]  ;;  %v2914_v14 = vld [vmem:[%s9007_s13 + $0x30] sm:$0xff] }
0x122f   : > { %6068 = vmatprep.mubr.msk.f32.mxu1 %vm1698_vm4, %v2701_v15  ;;  %v2909_v15 = vld [vmem:[%s9007_s13 + $0x8] sm:$0xff] }
0x1230   : > { %6069 = vmatmul.mubr.msk.f32.vlgmr.msra.gmra.mxu1 %vm1698_vm4, %v2702_v26  ;;  %v2911_v26 = vld [vmem:[%s9007_s13 + $0x18] sm:$0xff] }
0x1231   : > { %6072 = vmatpush3.msra.mxu1 %v1691_v11  ;;  %v2908_v11 = vld [vmem:[%s9007_s13] sm:$0xff] }
0x1232   : > { %6073 = vmatprep.subr.mxu1 %v1690_v59 }
0x1233   : > { %6074 = vmatpush3.msra.mxu1 %v1690_v59  ;;  %v2910_v59 = vld [vmem:[%s9007_s13 + $0x10] sm:$0xff] }
0x1234   : > { %3061 = vmatprep.subr.mxu1 %v2939_v48  ;;  %v3188_v48 = vld [vmem:[%s9008_s10 + $0xd0] sm:$0xff] }
0x12e0   : > { %v6056_v28 = vpop.f32.mrf.mxu1 }
0x12e1   : > { %v2583_v30 = vadd.f32 %v6056_v28, %v2282_v27 }
0x12e2   : > { %v2573_v31 = vpop.f32.mrf.mxu1 }
0x12e3   : > { %v2582_v32 = vadd.f32 %v2573_v31, %v2277_v29 }
0x12f0   : > { %v6070_v51 = vpop.f32.mrf.mxu1 }
0x12f1   : > { %v2799_v8 = vmul.f32 %v6070_v51, %v2796_v54  ;;  %v5665_v51 = vld [vmem:[#allocation16] ss:$0 sm:$0xff] }
0x12f2   : > { %v2781_v35 = vpop.f32.mrf.mxu1 }
0x12f3   : > { %v2798_v61 = vmul.f32 %v2792_v33, %v2781_v35 }
0x12f5   : > { %6075 = vmatprep.mubr.msk.f32.mxu1 %vm1698_vm4, %v2798_v61 }
0x12f6   : > { %6076 = vmatmul.mubr.msk.f32.vlgmr.msra.gmra.mxu1 %vm1698_vm4, %v2799_v8  ;;  %v3193_v8 = vld [vmem:[%s9008_s10 + $0xf8] sm:$0xff] }
0x12f7   : > { %3109 = vmatprep.mubr.f32.mxu1 %v7254_v13  ;;  %3062 = vmatpush1.msra.mxu1 %v2938_v58  ;;  %v3171_v58 = vld [vmem:[%s9008_s10 + $0x48] sm:$0xff] }
0x12f8   : > { %3063 = vmatprep.subr.mxu1 %v2935_v60  ;;  %v3170_v60 = vld [vmem:[%s9008_s10 + $0x40] sm:$0xff] }
0x13b6   : > { %v6077_v38 = vpop.f32.mrf.mxu1 }
0x13b7   : > { %v2882_v56 = vadd.f32 %v6077_v38, %v2583_v30  ;;  %v3177_v38 = vld [vmem:[%s9008_s10 + $0x78] sm:$0xff] }
0x13b8   : > { %v2872_v39 = vpop.f32.mrf.mxu1 }
0x13b9   : > { %v8064_v0 = vadd.f32 %v2882_v56, %v7839_v18  ;;  %v2881_v40 = vadd.f32 %v2872_v39, %v2582_v32  ;;  %v2934_v18 = vld [vmem:[%s9007_s13 + $0xd0] sm:$0xff] }
0x13ba   : > { %3064 = vmatpush1.msra.mxu1 %v2934_v18  ;;  %v3192_v56 = vld [vmem:[%s9008_s10 + $0xf0] sm:$0xff]  ;;  %v3169_v18 = vld [vmem:[%s9008_s10 + $0x38] sm:$0xff] }
0x13bb   : > { %v8067_v41 = vadd.f32 %v2881_v40, %v7821_v49  ;;  %v2887_v42 = vmul.f32 %v8064_v0, %v8064_v0  ;;  %v2932_v49 = vld [vmem:[%s9007_s13 + $0xc0] sm:$0xff]  ;;  %3065 = vmatprep.subr.mxu1 %v2931_v63  ;;  %v3176_v39 = vld [vmem:[%s9008_s10 + $0x70] sm:$0xff]  ;;  %v3191_v40 = vld [vmem:[%s9008_s10 + $0xe8] sm:$0xff] }
0x13bc   : > { %2987 = vmatpush1.msra.mxu0 %v2932_v49  ;;  %3066 = vmatpush1.msra.mxu1 %v2930_v3  ;;  %v3185_v49 = vld [vmem:[%s9008_s10 + $0xb8] sm:$0xff]  ;;  %v3168_v63 = vld [vmem:[%s9008_s10 + $0x30] sm:$0xff]  ;;  %v3167_v3 = vld [vmem:[%s9008_s10 + $0x28] sm:$0xff] }
0x13bd   : > { %v2891_v43 = vsel %vm1077_vm0, %v2887_v42, 0.0  ;;  %v2886_v45 = vmul.f32 %v8067_v41, %v8067_v41  ;;  %2988 = vmatprep.subr.mxu0 %v2929_v62  ;;  %3067 = vmatprep.subr.mxu1 %v2927_v7  ;;  %v3175_v42 = vld [vmem:[%s9008_s10 + $0x68] sm:$0xff]  ;;  %v3184_v62 = vld [vmem:[%s9008_s10 + $0xb0] sm:$0xff]  ;;  %v3166_v7 = vld [vmem:[%s9008_s10 + $0x20] sm:$0xff] }
0x13be   : > { %2892 = vadd.xlane.f32.xlu0 %v2891_v43  ;;  %2989 = vmatpush1.msra.mxu0 %v2928_v2  ;;  %v3190_v43 = vld [vmem:[%s9008_s10 + $0xe0] sm:$0xff]  ;;  %v3183_v2 = vld [vmem:[%s9008_s10 + $0xa8] sm:$0xff] }
0x13bf   : > { %v2888_v46 = vsel %vm1077_vm0, %v2886_v45, 0.0  ;;  %2990 = vmatprep.subr.mxu0 %v2925_v5  ;;  %3068 = vmatpush1.msra.mxu1 %v2926_v10  ;;  %v3174_v45 = vld [vmem:[%s9008_s10 + $0x60] sm:$0xff]  ;;  %v3165_v10 = vld [vmem:[%s9008_s10 + $0x18] sm:$0xff] }
0x13c0   : > { %2889 = vadd.xlane.f32.xlu1 %v2888_v46  ;;  %2991 = vmatpush1.msra.mxu0 %v2924_v9  ;;  %v3189_v46 = vld [vmem:[%s9008_s10 + $0xd8] sm:$0xff]  ;;  %v3182_v5 = vld [vmem:[%s9008_s10 + $0xa0] sm:$0xff] }
0x13c1   : > { %2992 = vmatprep.subr.mxu0 %v2921_v12  ;;  %3069 = vmatprep.subr.mxu1 %v2923_v17  ;;  %v3181_v9 = vld [vmem:[%s9008_s10 + $0x98] sm:$0xff]  ;;  %v3180_v12 = vld [vmem:[%s9008_s10 + $0x90] sm:$0xff] }
0x13c2   : > { %2993 = vmatpush1.msra.mxu0 %v2920_v19  ;;  %3070 = vmatpush1.msra.mxu1 %v2922_v20  ;;  %v3164_v17 = vld [vmem:[%s9008_s10 + $0x10] sm:$0xff]  ;;  %v3179_v19 = vld [vmem:[%s9008_s10 + $0x88] sm:$0xff] }
0x13c3   : > { %2994 = vmatprep.subr.mxu0 %v2917_v21  ;;  %3071 = vmatprep.subr.mxu1 %v2919_v37  ;;  %v3163_v20 = vld [vmem:[%s9008_s10 + $0x8] sm:$0xff]  ;;  %v3178_v21 = vld [vmem:[%s9008_s10 + $0x80] sm:$0xff] }
0x13c4   : > { %2995 = vmatpush1.msra.mxu0 %v2916_v24  ;;  %3072 = vmatpush1.msra.mxu1 %v2918_v1  ;;  %v3162_v37 = vld [vmem:[%s9008_s10] sm:$0xff]  ;;  %v3303_v24 = vld [vmem:[%s9009_s18 + $0x78] sm:$0xff]  ;;  %v3302_v1 = vld [vmem:[%s9009_s18 + $0x70] sm:$0xff] }
0x13c5   : > { %2996 = vmatprep.subr.mxu0 %v2913_v25  ;;  %3073 = vmatprep.subr.mxu1 %v2915_v53  ;;  %v3301_v25 = vld [vmem:[%s9009_s18 + $0x68] sm:$0xff]  ;;  %v3300_v53 = vld [vmem:[%s9009_s18 + $0x60] sm:$0xff] }
0x13c6   : > { %2997 = vmatpush1.msra.mxu0 %v2912_v50  ;;  %3074 = vmatpush1.msra.mxu1 %v2914_v14  ;;  %v3299_v50 = vld [vmem:[%s9009_s18 + $0x58] sm:$0xff]  ;;  %v3298_v14 = vld [vmem:[%s9009_s18 + $0x50] sm:$0xff] }
0x13c7   : > { %2998 = vmatprep.subr.mxu0 %v2909_v15  ;;  %3075 = vmatprep.subr.mxu1 %v2911_v26  ;;  %v3297_v15 = vld [vmem:[%s9009_s18 + $0x48] sm:$0xff]  ;;  %v3296_v26 = vld [vmem:[%s9009_s18 + $0x40] sm:$0xff] }
0x13c8   : > { %2999 = vmatpush1.msra.mxu0 %v2908_v11  ;;  %3076 = vmatpush1.msra.mxu1 %v2910_v59  ;;  %v3295_v11 = vld [vmem:[%s9009_s18 + $0x38] sm:$0xff]  ;;  %v2952_v59 = vsub.s32 2, %v7844_v22 }
0x13c9   : > { %5794 = vmatprep.subr.mxu0 %v3193_v8  ;;  %6078 = vmatprep.subr.mxu1 %v3303_v24 }
0x13d1   : > { %6477 = vrot.lane.b32.xlu1 %v6476_v57, %s8930_s3  ;;  %v3187_v57 = vld [vmem:[%s9008_s10 + $0xc8] sm:$0xff]  ;;  %s9010_s3 = smov 64   ;;  %s5725_s10 = sshll.u32 %s7430_s28, 8 }
0x1447   : > { %v2893_v27 = vpop.xlane.xlu0 %2892 }
0x1448   : > { %v2895_v28 = vmax.f32 %v2893_v27, 1e-24  ;;  %v2940_v27 = vld [vmem:[#allocation17] sm:$0xf] }
0x1449   : > { %v2890_v29 = vpop.xlane.xlu1 %2889 }
0x144a   : > { %v2894_v30 = vmax.f32 %v2890_v29, 1e-24  ;;  %6560 = vrsqrt.f32 %v2895_v28  ;;  %v2956_v28 = vsub.s32 3, %v7844_v22  ;;  %v2953_v29 = vrot.slane %v2940_v27, %v2952_v59 }
0x144c   : > { %6562 = vrsqrt.f32 %v2894_v30  ;;  %v2957_v30 = vrot.slane %v2940_v27, %v2956_v28 }
0x1457   : > { %v6561_v31 = vpop.eup %6560 }
0x1458   : > { %v2899_v54 = vmul.f32 %v6561_v31, %v8064_v0 }
0x1459   : > { %v6563_v32 = vpop.eup %6562 }
0x145a   : > { %v2898_v33 = vmul.f32 %v6563_v32, %v8067_v41  ;;  %v2907_v61 = vmul.f32 %v5665_v51, %v2899_v54 }
0x145c   : > { %v2906_v35 = vmul.f32 %v5665_v51, %v2898_v33 }
0x145e   : > { %5666 = vmatmul.mubr.msk.f32.vlgmr.msra.gmra.mxu0 %vm1077_vm0, %v2906_v35  ;;  %5668 = vmatmul.mubr.msk.f32.vlgmr.msra.gmra.mxu1 %vm1077_vm0, %v2906_v35 }
0x145f   : > { %3038 = vmatprep.mubr.f32.mxu0 %v7254_v13  ;;  %3115 = vmatprep.mubr.f32.mxu1 %v7254_v13 }
0x1460   : > { %5795 = vmatpush3.msra.mxu0 %v3177_v38  ;;  %6079 = vmatpush3.msra.mxu1 %v3303_v24 }
0x1461   : > { %5796 = vmatprep.subr.mxu0 %v3192_v56  ;;  %6080 = vmatprep.subr.mxu1 %v3302_v1 }
0x1462   : > { %5667 = vmatmul.mubr.msk.f32.gmra.mxu0 %vm1077_vm0, %v2907_v61  ;;  %5669 = vmatmul.mubr.msk.f32.gmra.mxu1 %vm1077_vm0, %v2907_v61 }
0x1463   : > { %5797 = vmatpush3.msra.mxu0 %v3176_v39  ;;  %6081 = vmatpush3.msra.mxu1 %v3302_v1 }
0x1464   : > { %5798 = vmatprep.subr.mxu0 %v3191_v40  ;;  %6082 = vmatprep.subr.mxu1 %v3301_v25 }
0x1465   : > { %5799 = vmatpush3.msra.mxu0 %v3175_v42  ;;  %6083 = vmatpush3.msra.mxu1 %v3301_v25 }
0x1466   : > { %5800 = vmatprep.subr.mxu0 %v3190_v43  ;;  %6084 = vmatprep.subr.mxu1 %v3300_v53 }
0x1467   : > { %5801 = vmatpush3.msra.mxu0 %v3174_v45  ;;  %6085 = vmatpush3.msra.mxu1 %v3300_v53 }
0x1468   : > { %5802 = vmatprep.subr.mxu0 %v3189_v46  ;;  %6086 = vmatprep.subr.mxu1 %v3299_v50 }
0x1469   : > { %5803 = vmatpush3.msra.mxu0 %v3173_v47  ;;  %6087 = vmatpush3.msra.mxu1 %v3299_v50 }
0x146a   : > { %5804 = vmatprep.subr.mxu0 %v3188_v48  ;;  %6088 = vmatprep.subr.mxu1 %v3298_v14 }
0x146b   : > { %5805 = vmatpush3.msra.mxu0 %v3172_v34  ;;  %6089 = vmatpush3.msra.mxu1 %v3298_v14 }
0x146c   : > { %5806 = vmatprep.subr.mxu0 %v3187_v57  ;;  %6090 = vmatprep.subr.mxu1 %v3297_v15 }
0x146d   : > { %5807 = vmatpush3.msra.mxu0 %v3171_v58  ;;  %6091 = vmatpush3.msra.mxu1 %v3297_v15 }
0x146e   : > { %5808 = vmatprep.subr.mxu0 %v3186_v52  ;;  %6092 = vmatprep.subr.mxu1 %v3296_v26 }
0x146f   : > { %5809 = vmatpush3.msra.mxu0 %v3170_v60  ;;  %6093 = vmatpush3.msra.mxu1 %v3296_v26 }
0x1470   : > { %5810 = vmatprep.subr.mxu0 %v3185_v49  ;;  %6094 = vmatprep.subr.mxu1 %v3295_v11 }
0x1471   : > { %5811 = vmatpush3.msra.mxu0 %v3169_v18  ;;  %6095 = vmatpush3.msra.mxu1 %v3295_v11 }
0x1472   : > { %5812 = vmatprep.subr.mxu0 %v3184_v62 }
0x1473   : > { %5813 = vmatpush3.msra.mxu0 %v3168_v63 }
0x1474   : > { %5814 = vmatprep.subr.mxu0 %v3183_v2 }
0x1475   : > { %5815 = vmatpush3.msra.mxu0 %v3167_v3 }
0x1476   : > { %5816 = vmatprep.subr.mxu0 %v3182_v5 }
0x1477   : > { %5817 = vmatpush3.msra.mxu0 %v3166_v7 }
0x1478   : > { %5818 = vmatprep.subr.mxu0 %v3181_v9 }
0x1479   : > { %5819 = vmatpush3.msra.mxu0 %v3165_v10 }
0x147a   : > { %5820 = vmatprep.subr.mxu0 %v3180_v12 }
0x147b   : > { %5821 = vmatpush3.msra.mxu0 %v3164_v17  ;;  %v2949_v17 = vrot.slane %v2940_v27, %v7887_v44 }
0x147c   : > { %5822 = vmatprep.subr.mxu0 %v3179_v19 }
0x147d   : > { %5823 = vmatpush3.msra.mxu0 %v3163_v20 }
0x147e   : > { %5824 = vmatprep.subr.mxu0 %v3178_v21  ;;  %v2945_v21 = vrot.slane %v2940_v27, %v7847_v23 }
0x147f   : > { %5825 = vmatpush3.msra.mxu0 %v3162_v37 }
0x151e   : > { %v3111_v31 = vpop.f32.mrf.mxu1  ;;  %v3034_v3 = vpop.f32.mrf.mxu0 }
0x151f   : > { %v3112_v32 = vadd.f32 %v3111_v31, %v2953_v29  ;;  %v3035_v26 = vadd.f32 %v3034_v3, %v2945_v21 }
0x1520   : > { %v3113_v33 = vpop.f32.mrf.mxu1  ;;  %v3036_v9 = vpop.f32.mrf.mxu0 }
0x1521   : > { %v3122_v51 = vmul.f32 %v3112_v32, %v3112_v32  ;;  %v3114_v35 = vadd.f32 %v3113_v33, %v2957_v30  ;;  %v3037_v50 = vadd.f32 %v3036_v9, %v2949_v17  ;;  %v8349_v9 = vld [vmem:[%s9005_s19 + $0x30] sm:$0xff] }
0x1522   : > { %v3117_v54 = vpop.f32.mrf.mxu1  ;;  %v3040_v37 = vpop.f32.mrf.mxu0 }
0x1523   : > { %v3126_v61 = vmul.f32 %v3122_v51, %v3112_v32  ;;  %v3123_v8 = vmul.f32 %v3114_v35, %v3114_v35  ;;  %v3118_v38 = vadd.f32 %v3117_v54, %v2953_v29  ;;  %v3041_v27 = vadd.f32 %v3040_v37, %v2945_v21 }
0x1524   : > { %v3119_v56 = vpop.f32.mrf.mxu1  ;;  %v3042_v29 = vpop.f32.mrf.mxu0 }
0x1525   : > { %v3130_v39 = vmul.f32 0.044715, %v3126_v61  ;;  %v3127_v40 = vmul.f32 %v3123_v8, %v3114_v35  ;;  %v3124_v42 = vmul.f32 %v3118_v38, %v3118_v38  ;;  %v3120_v43 = vadd.f32 %v3119_v56, %v2957_v30 }
0x1526   : > { %v3043_v54 = vadd.f32 %v3042_v29, %v2949_v17  ;;  %v8384_v17 = vld [vmem:[%s9005_s19 + $0x8] sm:$0xff] }
0x1527   : > { %v3134_v45 = vadd.f32 %v3130_v39, %v3112_v32  ;;  %v3131_v46 = vmul.f32 0.044715, %v3127_v40  ;;  %v3128_v47 = vmul.f32 %v3124_v42, %v3118_v38  ;;  %v3125_v48 = vmul.f32 %v3120_v43, %v3120_v43  ;;  %v3291_v39 = vld [vmem:[%s9009_s18 + $0x18] sm:$0xff]  ;;  %v3290_v40 = vld [vmem:[%s9009_s18 + $0x10] sm:$0xff]  ;;  %v3289_v42 = vld [vmem:[%s9009_s18 + $0x8] sm:$0xff] }
0x1528   : > { %v3411_v29 = vld [vmem:[#allocation22 + $0x48] sm:$0xff] }
0x1529   : > { %v3138_v34 = vmul.f32 0.7978846, %v3134_v45  ;;  %v3135_v57 = vadd.f32 %v3131_v46, %v3114_v35  ;;  %v3132_v58 = vmul.f32 0.044715, %v3128_v47  ;;  %v3129_v52 = vmul.f32 %v3125_v48, %v3120_v43  ;;  %v8338_v45 = vld [vmem:[%s9005_s19 + $0x38] sm:$0xff] }
0x152a   : > { %v5670_v47 = vld [vmem:[#allocation19] ss:$0 sm:$0xff] }
0x152b   : > { %6564 = vtanh.f32 %v3138_v34  ;;  %v3139_v60 = vmul.f32 0.7978846, %v3135_v57  ;;  %v3136_v49 = vadd.f32 %v3132_v58, %v3118_v38  ;;  %v3133_v18 = vmul.f32 0.044715, %v3129_v52  ;;  %v6478_v57 = vpop.permute.xlu1 %6477 }
0x152c   : > { %v6480_v3 = vunpack.i.h.bf16 %v6478_v57 }
0x152d   : > { %6566 = vtanh.f32 %v3139_v60  ;;  %v3140_v62 = vmul.f32 0.7978846, %v3136_v49  ;;  %v3137_v63 = vadd.f32 %v3133_v18, %v3120_v43  ;;  %v6479_v60 = vunpack.i.l.bf16 %v6478_v57 }
0x152f   : > { %6568 = vtanh.f32 %v3140_v62  ;;  %v3141_v2 = vmul.f32 0.7978846, %v3137_v63 }
0x1531   : > { %6570 = vtanh.f32 %v3141_v2 }
0x1538   : > { %v6565_v5 = vpop.eup %6564 }
0x1539   : > { %v3146_v7 = vadd.f32 1.0, %v6565_v5 }
0x153a   : > { %v6567_v10 = vpop.eup %6566 }
0x153b   : > { %v3150_v12 = vmul.f32 0.5, %v3146_v7  ;;  %v3147_v19 = vadd.f32 1.0, %v6567_v10  ;;  %v8370_v10 = vld [vmem:[%s9005_s19 + $0x18] sm:$0xff] }
0x153c   : > { %v6569_v20 = vpop.eup %6568 }
0x153d   : > { %v3151_v24 = vmul.f32 0.5, %v3147_v19  ;;  %v3148_v1 = vadd.f32 1.0, %v6569_v20  ;;  %v3154_v25 = vmul.f32 %v3150_v12, %v3112_v32  ;;  %v3294_v32 = vld [vmem:[%s9009_s18 + $0x30] sm:$0xff]  ;;  %v8391_v19 = vld [vmem:[%s9005_s19] sm:$0xff] }
0x153e   : > { %v6571_v53 = vpop.eup %6570  ;;  %6096 = vmatprep.subr.mxu1 %v3294_v32  ;;  %v8377_v12 = vld [vmem:[%s9005_s19 + $0x10] sm:$0xff] }
0x153f   : > { %v3155_v14 = vmul.f32 %v3151_v24, %v3114_v35  ;;  %v3152_v15 = vmul.f32 0.5, %v3148_v1  ;;  %v3149_v11 = vadd.f32 1.0, %v6571_v53  ;;  %v3158_v31 = vmul.f32 %v3154_v25, %v3035_v26  ;;  %6097 = vmatpush3.msra.mxu1 %v3294_v32  ;;  %v3293_v35 = vld [vmem:[%s9009_s18 + $0x28] sm:$0xff]  ;;  %v3417_v53 = vld [vmem:[#allocation22 + $0x78] sm:$0xff] }
0x1540   : > { %6098 = vmatprep.subr.mxu1 %v3293_v35  ;;  %3452 = vmatprep.subr.mxu0 %v3417_v53  ;;  %v3413_v26 = vld [vmem:[#allocation22 + $0x58] sm:$0xff] }
0x1541   : > { %v3159_v30 = vmul.f32 %v3155_v14, %v3037_v50  ;;  %v3153_v33 = vmul.f32 0.5, %v3149_v11  ;;  %v3156_v51 = vmul.f32 %v3152_v15, %v3118_v38  ;;  %6099 = vmatpush3.msra.mxu1 %v3293_v35  ;;  %v3292_v38 = vld [vmem:[%s9009_s18 + $0x20] sm:$0xff]  ;;  %v3416_v50 = vld [vmem:[#allocation22 + $0x70] sm:$0xff]  ;;  %v3415_v14 = vld [vmem:[#allocation22 + $0x68] sm:$0xff] }
0x1542   : > { %6100 = vmatprep.subr.mxu1 %v3292_v38  ;;  %v3414_v15 = vld [vmem:[#allocation22 + $0x60] sm:$0xff]  ;;  %v3412_v11 = vld [vmem:[#allocation22 + $0x50] sm:$0xff] }
0x1543   : > { %3265 = vmatprep.mubr.f32.mxu0 %v3159_v30  ;;  %v3157_v61 = vmul.f32 %v3153_v33, %v3120_v43  ;;  %v3160_v56 = vmul.f32 %v3156_v51, %v3041_v27  ;;  %6101 = vmatpush3.msra.mxu1 %v3292_v38  ;;  %v3288_v43 = vld [vmem:[%s9009_s18] sm:$0xff]  ;;  %v3408_v33 = vld [vmem:[#allocation22 + $0x30] sm:$0xff]  ;;  %v3407_v51 = vld [vmem:[#allocation22 + $0x28] sm:$0xff] }
0x1544   : > { %3266 = vmatmul.mubr.f32.vlgmr.msra.gmra.mxu0 %v3158_v31  ;;  %6102 = vmatprep.subr.mxu1 %v3291_v39  ;;  %v3410_v30 = vld [vmem:[#allocation22 + $0x40] sm:$0xff]  ;;  %v3409_v31 = vld [vmem:[#allocation22 + $0x38] sm:$0xff]  ;;  %v3404_v27 = vld [vmem:[#allocation22 + $0x10] sm:$0xff] }
0x1545   : > { %v3161_v8 = vmul.f32 %v3157_v61, %v3043_v54  ;;  %6103 = vmatpush3.msra.mxu1 %v3291_v39  ;;  %3453 = vmatpush1.msra.mxu0 %v3416_v50  ;;  %v3406_v54 = vld [vmem:[#allocation22 + $0x20] sm:$0xff]  ;;  %v3405_v61 = vld [vmem:[#allocation22 + $0x18] sm:$0xff] }
0x1546   : > { %6104 = vmatprep.subr.mxu1 %v3290_v40  ;;  %3454 = vmatprep.subr.mxu0 %v3415_v14 }
0x1547   : > { %3270 = vmatprep.mubr.f32.mxu0 %v3161_v8  ;;  %6105 = vmatpush3.msra.mxu1 %v3290_v40  ;;  %v3403_v8 = vld [vmem:[#allocation22 + $0x8] sm:$0xff] }
0x1548   : > { %3271 = vmatmul.mubr.f32.gmra.mxu0 %v3160_v56  ;;  %6106 = vmatprep.subr.mxu1 %v3289_v42  ;;  %v3402_v56 = vld [vmem:[#allocation22] sm:$0xff] }
0x1549   : > { %3500 = vmatprep.mubr.f32.mxu0 %v7254_v13  ;;  %6107 = vmatpush3.msra.mxu1 %v3289_v42  ;;  %v5671_v42 = vld [vmem:[#allocation20] ss:$0 sm:$0xff] }
0x154a   : > { %6108 = vmatprep.subr.mxu1 %v3288_v43  ;;  %3455 = vmatpush1.msra.mxu0 %v3414_v15 }
0x154b   : > { %6109 = vmatpush3.msra.mxu1 %v3288_v43  ;;  %3456 = vmatprep.subr.mxu0 %v3413_v26 }
0x154c   : > { %6113 = vmatprep.subr.mxu1 %v8338_v45  ;;  %3457 = vmatpush1.msra.mxu0 %v3412_v11 }
0x154d   : > { %3458 = vmatprep.subr.mxu0 %v3411_v29 }
0x154e   : > { %3459 = vmatpush1.msra.mxu0 %v3410_v30 }
0x154f   : > { %3460 = vmatprep.subr.mxu0 %v3409_v31 }
0x1550   : > { %3461 = vmatpush1.msra.mxu0 %v3408_v33 }
0x1551   : > { %3462 = vmatprep.subr.mxu0 %v3407_v51 }
0x1552   : > { %3463 = vmatpush1.msra.mxu0 %v3406_v54 }
0x1553   : > { %3464 = vmatprep.subr.mxu0 %v3405_v61 }
0x1554   : > { %3465 = vmatpush1.msra.mxu0 %v3404_v27 }
0x1555   : > { %3466 = vmatprep.subr.mxu0 %v3403_v8 }
0x1556   : > { %3467 = vmatpush1.msra.mxu0 %v3402_v56 }
0x1557   : > { %6132 = vmatprep.subr.mxu0 %v8338_v45 }
0x1604   : > { %v5826_v46 = vpop.f32.mrf.mxu0 }
0x1606   : > { %v5827_v48 = vpop.f32.mrf.mxu0 }
0x1607   : > { %v5828_v34 = vadd.f32 %v5827_v48, %v5826_v46 }
0x1608   : > { %v5829_v52 = vpop.f32.mrf.mxu0 }
0x1609   : > { %v3268_v58 = vadd.f32 %v5828_v34, %v5670_v47 }
0x160a   : > { %v5830_v18 = vpop.f32.mrf.mxu0 }
0x160b   : > { %v3276_v49 = vadd.f32 %v3268_v58, %v8067_v41  ;;  %v5831_v62 = vadd.f32 %v5830_v18, %v5829_v52  ;;  %v8356_v41 = vld [vmem:[%s9005_s19 + $0x28] sm:$0xff] }
0x160d   : > { %v3286_v63 = vsel %vm1077_vm0, %v3276_v49, %v6479_v60  ;;  %v3273_v2 = vadd.f32 %v5831_v62, %v5670_v47 }
0x160e   : > { %6110 = vmatprep.mubr.f32.mxu1 %v3286_v63 }
0x160f   : > { %v3277_v5 = vadd.f32 %v3273_v2, %v8064_v0  ;;  %v8363_v0 = vld [vmem:[%s9005_s19 + $0x20] sm:$0xff] }
0x1611   : > { %v3287_v7 = vsel %vm1077_vm0, %v3277_v5, %v6480_v3  ;;  %v6656_v3 = vld [vmem:[#allocation5 + $0x8] sm:$0xff] }
0x1612   : > { %6111 = vmatmul.mubr.f32.vlgmr.msra.gmra.mxu1 %v3287_v7  ;;  %v6657_v7 = vld [vmem:[%s9006_s15 + $0x8] sm:$0xff] }
0x1613   : > { %6114 = vmatpush3.msra.mxu1 %v8338_v45 }
0x1614   : > { %6115 = vmatprep.subr.mxu1 %v8349_v9 }
0x1615   : > { %6116 = vmatpush3.msra.mxu1 %v8349_v9 }
0x1616   : > { %6117 = vmatprep.subr.mxu1 %v8356_v41 }
0x1617   : > { %6118 = vmatpush3.msra.mxu1 %v8356_v41 }
0x1618   : > { %6119 = vmatprep.subr.mxu1 %v8363_v0 }
0x1619   : > { %6120 = vmatpush3.msra.mxu1 %v8363_v0 }
0x161a   : > { %6121 = vmatprep.subr.mxu1 %v8370_v10 }
0x161b   : > { %6122 = vmatpush3.msra.mxu1 %v8370_v10 }
0x161c   : > { %6123 = vmatprep.subr.mxu1 %v8377_v12 }
0x161d   : > { %6124 = vmatpush3.msra.mxu1 %v8377_v12 }
0x161e   : > { %6125 = vmatprep.subr.mxu1 %v8384_v17 }
0x161f   : > { %6126 = vmatpush3.msra.mxu1 %v8384_v17 }
0x1620   : > { %6127 = vmatprep.subr.mxu1 %v8391_v19 }
0x1621   : > { %6128 = vmatpush3.msra.mxu1 %v8391_v19 }
0x16d2   : > { %v8395_v20 = vpop.f32.mrf.mxu1 }
0x16d3   : > { %v3381_v1 = vmul.f32 %v8395_v20, %v8395_v20 }
0x16d4   : > { %v8397_v21 = vpop.f32.mrf.mxu1 }
0x16d5   : > { %v3380_v37 = vmul.f32 %v8397_v21, %v8397_v21  ;;  %v3385_v25 = vsel %vm1077_vm0, %v3381_v1, 0.0 }
0x16d7   : > { %v3382_v24 = vsel %vm1077_vm0, %v3380_v37, 0.0 }
0x16d8   : > { %3383 = vadd.xlane.f32.xlu0 %v3382_v24 }
0x16dc   : > { %3386 = vadd.xlane.f32.xlu0 %v3385_v25 }
0x1761   : > { %v3384_v32 = vpop.xlane.xlu0 %3383 }
0x1762   : > { %v3388_v35 = vmax.f32 %v3384_v32, 1e-24 }
0x1764   : > { %6572 = vrsqrt.f32 %v3388_v35 }
0x1765   : > { %v3387_v38 = vpop.xlane.xlu0 %3386 }
0x1766   : > { %v3389_v39 = vmax.f32 %v3387_v38, 1e-24 }
0x1768   : > { %6574 = vrsqrt.f32 %v3389_v39 }
0x1771   : > { %v6573_v40 = vpop.eup %6572 }
0x1772   : > { %v3392_v43 = vmul.f32 %v6573_v40, %v8397_v21 }
0x1774   : > { %v3400_v46 = vmul.f32 %v5671_v42, %v3392_v43 }
0x1775   : > { %v6575_v47 = vpop.eup %6574 }
0x1776   : > { %5672 = vmatmul.mubr.msk.f32.vlgmr.msra.gmra.mxu0 %vm1077_vm0, %v3400_v46  ;;  %v3393_v48 = vmul.f32 %v6575_v47, %v8395_v20 }
0x1777   : > { %3506 = vmatprep.mubr.f32.mxu0 %v7254_v13  ;;  %6133 = vmatpush3.msra.mxu0 %v8338_v45  ;;  %v3418_v45 = vld [vmem:[#allocation23] sm:$0x3] }
0x1778   : > { %v3401_v34 = vmul.f32 %v5671_v42, %v3393_v48  ;;  %6134 = vmatprep.subr.mxu0 %v8349_v9  ;;  %v3423_v57 = vrot.slane %v3418_v45, %v7847_v23 }
0x1779   : > { %6135 = vmatpush3.msra.mxu0 %v8349_v9 }
0x177a   : > { %5673 = vmatmul.mubr.msk.f32.gmra.mxu0 %vm1077_vm0, %v3401_v34  ;;  %6136 = vmatprep.subr.mxu0 %v8356_v41 }
0x177b   : > { %6137 = vmatpush3.msra.mxu0 %v8356_v41 }
0x177c   : > { %6138 = vmatprep.subr.mxu0 %v8363_v0 }
0x177d   : > { %6139 = vmatpush3.msra.mxu0 %v8363_v0 }
0x177e   : > { %6140 = vmatprep.subr.mxu0 %v8370_v10 }
0x177f   : > { %6141 = vmatpush3.msra.mxu0 %v8370_v10  ;;  %v6658_v10 = vld [vmem:[#allocation5] sm:$0xff] }
0x1780   : > { %6142 = vmatprep.subr.mxu0 %v8377_v12 }
0x1781   : > { %6143 = vmatpush3.msra.mxu0 %v8377_v12 }
0x1782   : > { %6144 = vmatprep.subr.mxu0 %v8384_v17 }
0x1783   : > { %6145 = vmatpush3.msra.mxu0 %v8384_v17  ;;  %v6659_v17 = vld [vmem:[%s9006_s15] sm:$0xff] }
0x1784   : > { %6146 = vmatprep.subr.mxu0 %v8391_v19 }
0x1785   : > { %6147 = vmatpush3.msra.mxu0 %v8391_v19 }
0x1836   : > { %v3502_v58 = vpop.f32.mrf.mxu0 }
0x1837   : > { %v3503_v52 = vadd.f32 %v3502_v58, %v3423_v57 }
0x1838   : > { %v3504_v60 = vpop.f32.mrf.mxu0 }
0x1839   : > { %3614 = vrot.lane.b32.xlu1 %v3503_v52, %s9010_s3  ;;  %6129 = vmatprep.mubr.msk.f32.mxu1 %vm1077_vm0, %v3503_v52  ;;  %v3525_v12 = vmul.f32 %v6658_v10, %v3503_v52  ;;  %v3612_v11 = vmul.f32 %v3503_v52, %v7919_v6 }
0x183a   : > { %v3508_v49 = vpop.f32.mrf.mxu0 }
0x183b   : > { %v3509_v18 = vadd.f32 %v3508_v49, %v3423_v57 }
0x183c   : > { %v3510_v24 = vpop.f32.mrf.mxu0 }
0x183d   : > { %3616 = vrot.lane.b32.xlu0 %v3509_v18, %s9010_s3  ;;  %6130 = vmatmul.mubr.msk.f32.vlgmr.msra.gmra.mxu1 %vm1077_vm0, %v3509_v18  ;;  %v3526_v5 = vmul.f32 %v6656_v3, %v3509_v18  ;;  %v3613_v14 = vmul.f32 %v3509_v18, %v7916_v4  ;;  %v3427_v4 = vrot.slane %v3418_v45, %v7887_v44 }
0x183f   : > { %v8460_v51 = vadd.f32 %v3510_v24, %v3427_v4  ;;  %v8465_v6 = vadd.f32 %v3504_v60, %v3427_v4 }
0x1841   : > { %v5674_v24 = vmul.f32 -1.442695, %v8465_v6 }
0x18ab   : > { %v3615_v62 = vpop.permute.xlu1 %3614 }
0x18ac   : > { %6148 = vmatprep.mubr.msk.f32.mxu0 %vm1077_vm0, %v3615_v62 }
0x18af   : > { %v3617_v63 = vpop.permute.xlu0 %3616 }
0x18b0   : > { %6149 = vmatmul.mubr.msk.f32.vlgmr.msra.gmra.mxu0 %vm1077_vm0, %v3617_v63 }
0x18fd   : > { %v6131_v2 = vpop.f32.mrf.mxu1 }
0x18fe   : > { %v3609_v9 = vmul.f32 %v6657_v7, %v6131_v2 }
0x18ff   : > { %v3599_v41 = vpop.f32.mrf.mxu1 }
0x1900   : > { %v8436_v0 = vadd.f32 %v3609_v9, %v3526_v5  ;;  %v3608_v19 = vmul.f32 %v6659_v17, %v3599_v41 }
0x1902   : > { %v8441_v37 = vadd.f32 %v3608_v19, %v3525_v12 }
0x1904   : > { %6155 = vmatprep.mubr.msk.f32.mxu1 %vm1698_vm4, %v8441_v37 }
0x1970   : > { %v6150_v1 = vpop.f32.mrf.mxu0 }
0x1971   : > { %v3698_v25 = vmul.f32 %v6657_v7, %v6150_v1 }
0x1972   : > { %v3688_v53 = vpop.f32.mrf.mxu0 }
0x1973   : > { %3703 = vrot.lane.b32.xlu1 %v3698_v25, %s9010_s3  ;;  %v3697_v50 = vmul.f32 %v6659_v17, %v3688_v53  ;;  %v5675_v25 = vmul.f32 -1.442695, %v8460_v51 }
0x1977   : > { %3701 = vrot.lane.b32.xlu1 %v3697_v50, %s9010_s3 }
0x19e5   : > { %v3704_v15 = vpop.permute.xlu1 %3703 }
0x19e6   : > { %v8448_v26 = vadd.f32 %v3704_v15, %v3613_v14 }
0x19e8   : > { %3721 = vrot.lane.b32.xlu1 %v8448_v26, %s9010_s3 }
0x19e9   : > { %v3702_v29 = vpop.permute.xlu1 %3701 }
0x19ea   : > { %v8453_v30 = vadd.f32 %v3702_v29, %v3612_v11 }
0x19ec   : > { %3719 = vrot.lane.b32.xlu1 %v8453_v30, %s9010_s3  ;;  %s9015_s3 = smov 16  }
0x1a5a   : > { %v3722_v31 = vpop.permute.xlu1 %3721 }
0x1a5b   : > { %6151 = vmatprep.subr.msk.mxu1 %vm1698_vm4, %v3722_v31 }
0x1a5c   : > { %6152 = vmatpush3.xpose.msk.msra.mxu1 %vm1698_vm4, %v3722_v31 }
0x1a5e   : > { %v3720_v33 = vpop.permute.xlu1 %3719 }
0x1a5f   : > { %6153 = vmatprep.subr.msk.mxu1 %vm1698_vm4, %v3720_v33 }
0x1a60   : > { %6154 = vmatpush3.xpose.msk.msra.mxu1 %vm1698_vm4, %v3720_v33 }
0x1a61   : > { %6158 = vmatprep.subr.mxu1 %v8460_v51 }
0x1a63   : > { %6156 = vmatmul.mubr.msk.f32.vlgmr.msra.gmra.mxu1 %vm1698_vm4, %v8436_v0 }
0x1a64   : > { %6159 = vmatpush3.msra.mxu1 %v8460_v51 }
0x1a65   : > { %6160 = vmatprep.subr.mxu1 %v8465_v6 }
0x1a66   : > { %6161 = vmatpush3.msra.mxu1 %v8465_v6 }
0x1b23   : > { %v6157_v54 = vpop.f32.mrf.mxu1 }
0x1b24   : > { %v3809_v61 = vmul.f32 0.02, %v6157_v54 }
0x1b25   : > { %v3799_v27 = vpop.f32.mrf.mxu1 }
0x1b26   : > { %6576 = vtanh.f32 %v3809_v61  ;;  %v3808_v8 = vmul.f32 0.02, %v3799_v27 }
0x1b28   : > { %6578 = vtanh.f32 %v3808_v8 }
0x1b33   : > { %v6577_v56 = vpop.eup %6576 }
0x1b34   : > { %v3813_v32 = vmul.f32 50.0, %v6577_v56 }
0x1b35   : > { %v6579_v35 = vpop.eup %6578 }
0x1b36   : > { %v3817_v38 = vsel %vm1698_vm4, %v3813_v32, -inf  ;;  %v3812_v39 = vmul.f32 50.0, %v6579_v35 }
0x1b37   : > { %3818 = vmax.xlane.f32.xlu0 %v3817_v38 }
0x1b38   : > { %v3814_v40 = vsel %vm1698_vm4, %v3812_v39, -inf }
0x1b39   : > { %3815 = vmax.xlane.f32.xlu1 %v3814_v40 }
0x1b4a   : > { %3935 = vrot.lane.b32.xlu1 %v8448_v26, %s9011_s26 }
0x1b4e   : > { %3929 = vrot.lane.b32.xlu1 %v8441_v37, %s9012_s6 }
0x1bc0   : > { %v3819_v42 = vpop.xlane.xlu0 %3818 }
0x1bc1   : > { %v3821_v43 = vsub.f32 %v3813_v32, %v3819_v42 }
0x1bc2   : > { %v3816_v46 = vpop.xlane.xlu1 %3815 }
0x1bc3   : > { %v3824_v47 = vmul.f32 1.442695, %v3821_v43  ;;  %v3820_v48 = vsub.f32 %v3812_v39, %v3816_v46 }
0x1bc5   : > { %6580 = vpow2.f32 %v3824_v47  ;;  %v3822_v34 = vmul.f32 1.442695, %v3820_v48  ;;  %v3712_v48 = vld [vmem:[#allocation25 + $0x18] sm:$0xff] }
0x1bc6   : > { %v3936_v45 = vpop.permute.xlu1 %3935 }
0x1bc7   : > { %6582 = vpow2.f32 %v3822_v34  ;;  %6165 = vmatprep.subr.msk.mxu1 %vm1698_vm4, %v3936_v45 }
0x1bca   : > { %v3930_v49 = vpop.permute.xlu1 %3929 }
0x1bd2   : > { %v6581_v57 = vpop.eup %6580 }
0x1bd3   : > { %v3829_v58 = vsel %vm1698_vm4, %v6581_v57, 0.0 }
0x1bd4   : > { %v6583_v52 = vpop.eup %6582  ;;  %3830 = vadd.xlane.f32.xlu0 %v3829_v58 }
0x1bd5   : > { %v3826_v60 = vsel %vm1698_vm4, %v6583_v52, 0.0 }
0x1bd6   : > { %3827 = vadd.xlane.f32.xlu1 %v3826_v60 }
0x1be7   : > { %3931 = vrot.lane.b32.xlu1 %v8436_v0, %s9012_s6 }
0x1bea   : > { %3933 = vrot.lane.b32.xlu0 %v8453_v30, %s9011_s26  ;;  %s5341_s26 = sshll.u32 %s1059_s12, 4  ;;  %s8826_s26 = int_to_ptr.vmem [resolvable:$true] %s5341_s26 }
0x1beb   : > { %p7137_p4 = scmp.lt.s32.totalorder %s8826_s26, %s7135_s16 }
0x1c5d   : > { %v3831_v18 = vpop.xlane.xlu0 %3830 }
0x1c5e   : > { %6584 = vrcp.f32 %v3831_v18 }
0x1c5f   : > { %v3828_v62 = vpop.xlane.xlu1 %3827 }
0x1c60   : > { %6586 = vrcp.f32 %v3828_v62 }
0x1c61   : > { %v3934_v7 = vpop.permute.xlu0 %3933 }
0x1c63   : > { %v3932_v9 = vpop.permute.xlu1 %3931 }
0x1c6b   : > { %v6585_v63 = vpop.eup %6584 }
0x1c6c   : > { %v3835_v5 = vmul.f32 %v6585_v63, %v6581_v57 }
0x1c6d   : > { %v6587_v2 = vpop.eup %6586 }
0x1c6e   : > { %v3834_v3 = vmul.f32 %v6587_v2, %v6583_v52  ;;  %v3711_v52 = vld [vmem:[#allocation25 + $0x10] sm:$0xff] }
0x1c70   : > { %6162 = vmatprep.mubr.msk.f32.mxu1 %vm1698_vm4, %v3834_v3 }
0x1c71   : > { %6163 = vmatmul.mubr.msk.f32.vlgmr.msra.gmra.mxu1 %vm1698_vm4, %v3835_v5 }
0x1c72   : > { %6166 = vmatpush3.xpose.msk.msra.mxu1 %vm1698_vm4, %v3936_v45  ;;  %6169 = vmatprep.mubr.msk.f32.mxu1 %vm1698_vm4, %v3930_v49 }
0x1c73   : > { %6167 = vmatprep.subr.msk.mxu1 %vm1698_vm4, %v3934_v7 }
0x1c76   : > { %6168 = vmatpush3.xpose.msk.msra.mxu1 %vm1698_vm4, %v3934_v7 }
0x1c79   : > { %6170 = vmatmul.mubr.msk.f32.vlgmr.msra.gmra.mxu1 %vm1698_vm4, %v3932_v9 }
0x1d31   : > { %v8492_v41 = vpop.f32.mrf.mxu1 }
0x1d33   : > { %v8494_v10 = vpop.f32.mrf.mxu1 }
0x1d39   : > { %v6171_v12 = vpop.f32.mrf.mxu1 }
0x1d3a   : > { %v4021_v17 = vmul.f32 0.02, %v6171_v12 }
0x1d3b   : > { %v4011_v19 = vpop.f32.mrf.mxu1 }
0x1d3c   : > { %6588 = vtanh.f32 %v4021_v17  ;;  %v4020_v1 = vmul.f32 0.02, %v4011_v19 }
0x1d3e   : > { %6590 = vtanh.f32 %v4020_v1 }
0x1d3f   : > { %6592 = vpow2.f32 %v5674_v24 }
0x1d40   : > { %6594 = vpow2.f32 %v5675_v25 }
0x1d49   : > { %v6589_v53 = vpop.eup %6588 }
0x1d4a   : > { %v4025_v50 = vmul.f32 50.0, %v6589_v53 }
0x1d4b   : > { %v6591_v14 = vpop.eup %6590 }
0x1d4c   : > { %v4029_v15 = vsel %vm1698_vm4, %v4025_v50, -inf  ;;  %v4024_v11 = vmul.f32 50.0, %v6591_v14  ;;  %v6593_v29 = vpop.eup %6592 }
0x1d4d   : > { %4030 = vmax.xlane.f32.xlu1 %v4029_v15  ;;  %v3519_v4 = vadd.f32 1.0, %v6593_v29  ;;  %v6595_v33 = vpop.eup %6594 }
0x1d4e   : > { %v4026_v31 = vsel %vm1698_vm4, %v4024_v11, -inf  ;;  %v3520_v54 = vadd.f32 1.0, %v6595_v33  ;;  %v3710_v33 = vld [vmem:[#allocation25 + $0x8] sm:$0xff] }
0x1d4f   : > { %4027 = vmax.xlane.f32.xlu0 %v4026_v31  ;;  %6596 = vrcp.f32 %v3519_v4  ;;  %6186 = vmatprep.subr.mxu1 %v3710_v33 }
0x1d50   : > { %6598 = vrcp.f32 %v3520_v54  ;;  %6187 = vmatpush3.msra.mxu1 %v3710_v33  ;;  %v3709_v54 = vld [vmem:[#allocation25] sm:$0xff] }
0x1d51   : > { %6188 = vmatprep.subr.mxu1 %v3709_v54 }
0x1d52   : > { %6189 = vmatpush3.msra.mxu1 %v3709_v54 }
0x1d5c   : > { %v8502_v61 = vpop.eup %6596 }
0x1d5d   : > { %v8505_v27 = vpop.eup %6598 }
0x1d5e   : > { %4052 = vrot.lane.b32.xlu1 %v8460_v51, %s9012_s6 }
0x1d62   : > { %4138 = vperm.xlu1 %6481, %v8502_v61  }
0x1d66   : > { %4142 = vperm.xlu1 %6481, %v8505_v27  }
0x1d6a   : > { %4313 = vrot.lane.b32.xlu1 %v8453_v30, %s9013_s29 }
0x1d6b   : > { %6482 = vset.pattern.permute.xlu1 %v7263_v55 }
0x1d6e   : > { %4311 = vrot.lane.b32.xlu1 %v8436_v0, %s9014_s14 }
0x1d72   : > { %4612 = vrot.lane.b32.xlu1 %v8453_v30, %s9015_s3 }
0x1d76   : > { %4610 = vrot.lane.b32.xlu1 %v8436_v0, %s9016_s24 }
0x1dd6   : > { %v4031_v8 = vpop.xlane.xlu1 %4030 }
0x1dd7   : > { %v4033_v56 = vsub.f32 %v4025_v50, %v4031_v8 }
0x1dd8   : > { %v4028_v32 = vpop.xlane.xlu0 %4027 }
0x1dd9   : > { %v4036_v35 = vmul.f32 1.442695, %v4033_v56  ;;  %v4032_v38 = vsub.f32 %v4024_v11, %v4028_v32 }
0x1dda   : > { %v4053_v39 = vpop.permute.xlu1 %4052 }
0x1ddb   : > { %6600 = vpow2.f32 %v4036_v35  ;;  %v4034_v40 = vmul.f32 1.442695, %v4032_v38  ;;  %6172 = vmatprep.subr.mxu0 %v4053_v39 }
0x1ddc   : > { %6173 = vmatpush3.msra.mxu0 %v4053_v39 }
0x1ddd   : > { %6602 = vpow2.f32 %v4034_v40 }
0x1de8   : > { %v6601_v55 = vpop.eup %6600 }
0x1de9   : > { %v4041_v42 = vsel %vm1698_vm4, %v6601_v55, 0.0 }
0x1dea   : > { %v6603_v43 = vpop.eup %6602  ;;  %4042 = vadd.xlane.f32.xlu0 %v4041_v42 }
0x1deb   : > { %v4038_v30 = vsel %vm1698_vm4, %v6603_v43, 0.0 }
0x1dee   : > { %4039 = vadd.xlane.f32.xlu0 %v4038_v30 }
0x1e04   : > { %4050 = vrot.lane.b32.xlu0 %v8465_v6, %s9012_s6 }
0x1e08   : > { %4315 = vrot.lane.b32.xlu0 %v8448_v26, %s9013_s29  ;;  %s9020_s29 = sld [smem:[#allocation66_spill]] }
0x1e0c   : > { %4309 = vrot.lane.b32.xlu0 %v8441_v37, %s9014_s14 }
0x1e10   : > { %4614 = vrot.lane.b32.xlu0 %v8448_v26, %s9015_s3  ;;  %v4139_v26 = vpop.permute.xlu1 %4138  ;;  %s9018_s3 = sld [smem:[#allocation64_spill]] }
0x1e14   : > { %4608 = vrot.lane.b32.xlu0 %v8441_v37, %s9016_s24  ;;  %v4143_v60 = vpop.permute.xlu1 %4142 }
0x1e18   : > { %v4314_v63 = vpop.permute.xlu1 %4313 }
0x1e1c   : > { %v4312_v7 = vpop.permute.xlu1 %4311 }
0x1e20   : > { %v4613_v12 = vpop.permute.xlu1 %4612 }
0x1e24   : > { %v4611_v17 = vpop.permute.xlu1 %4610 }
0x1e73   : > { %v4043_v0 = vpop.xlane.xlu0 %4042 }
0x1e74   : > { %6604 = vrcp.f32 %v4043_v0 }
0x1e77   : > { %v4040_v46 = vpop.xlane.xlu0 %4039 }
0x1e78   : > { %6606 = vrcp.f32 %v4040_v46 }
0x1e7b   : > { %v4051_v47 = vpop.permute.xlu0 %4050 }
0x1e7c   : > { %6174 = vmatprep.subr.mxu0 %v4051_v47 }
0x1e7d   : > { %6175 = vmatpush3.msra.mxu0 %v4051_v47 }
0x1e7e   : > { %6179 = vmatprep.subr.mxu0 %v3712_v48 }
0x1e7f   : > { %v4316_v37 = vpop.permute.xlu0 %4315 }
0x1e81   : > { %v6605_v34 = vpop.eup %6604 }
0x1e82   : > { %v4047_v58 = vmul.f32 %v6605_v34, %v6601_v55 }
0x1e83   : > { %v4310_v18 = vpop.permute.xlu0 %4309 }
0x1e85   : > { %v6607_v45 = vpop.eup %6606 }
0x1e86   : > { %v4046_v57 = vmul.f32 %v6607_v45, %v6603_v43 }
0x1e87   : > { %v4615_v5 = vpop.permute.xlu0 %4614 }
0x1e88   : > { %6176 = vmatprep.mubr.msk.f32.mxu0 %vm1698_vm4, %v4046_v57 }
0x1e89   : > { %6177 = vmatmul.mubr.msk.f32.vlgmr.msra.gmra.mxu0 %vm1698_vm4, %v4047_v58 }
0x1e8a   : > { %6180 = vmatpush3.msra.mxu0 %v3712_v48 }
0x1e8b   : > { %6181 = vmatprep.subr.mxu0 %v3711_v52  ;;  %v4609_v9 = vpop.permute.xlu0 %4608 }
0x1e8c   : > { %6182 = vmatpush3.msra.mxu0 %v3711_v52 }
0x1e8d   : > { %6193 = vmatprep.subr.msk.mxu0 %vm1698_vm4, %v4316_v37 }
0x1f49   : > { %v6178_v49 = vpop.f32.mrf.mxu0 }
0x1f4a   : > { %v4146_v3 = vmul.f32 %v6178_v49, %v4143_v60 }
0x1f4b   : > { %v4128_v62 = vpop.f32.mrf.mxu0 }
0x1f4c   : > { %v4145_v2 = vmul.f32 %v4139_v26, %v4128_v62 }
0x1f4e   : > { %6183 = vmatprep.mubr.msk.f32.mxu0 %vm1698_vm4, %v4145_v2 }
0x1f4f   : > { %6184 = vmatmul.mubr.msk.f32.vlgmr.msra.gmra.mxu0 %vm1698_vm4, %v4146_v3 }
0x1f50   : > { %6194 = vmatpush3.xpose.msk.msra.mxu0 %vm1698_vm4, %v4316_v37  ;;  %6197 = vmatprep.mubr.msk.f32.mxu0 %vm1698_vm4, %v4310_v18 }
0x1f51   : > { %6195 = vmatprep.subr.msk.mxu0 %vm1698_vm4, %v4314_v63 }
0x1f54   : > { %6196 = vmatpush3.xpose.msk.msra.mxu0 %vm1698_vm4, %v4314_v63  ;;  %v3714_v63 = vld [vmem:[#allocation25 + $0x28] sm:$0xff] }
0x1f55   : > { %6214 = vmatprep.subr.msk.mxu0 %vm1698_vm4, %v4615_v5 }
0x1f57   : > { %6198 = vmatmul.mubr.msk.f32.vlgmr.msra.gmra.mxu0 %vm1698_vm4, %v4312_v7 }
0x1f58   : > { %6215 = vmatpush3.xpose.msk.msra.mxu0 %vm1698_vm4, %v4615_v5  ;;  %6218 = vmatprep.mubr.msk.f32.mxu0 %vm1698_vm4, %v4609_v9  ;;  %v3713_v9 = vld [vmem:[#allocation25 + $0x20] sm:$0xff] }
0x1f59   : > { %6216 = vmatprep.subr.msk.mxu0 %vm1698_vm4, %v4613_v12 }
0x1f5c   : > { %6217 = vmatpush3.xpose.msk.msra.mxu0 %vm1698_vm4, %v4613_v12 }
0x1f5f   : > { %6219 = vmatmul.mubr.msk.f32.vlgmr.msra.gmra.mxu0 %vm1698_vm4, %v4611_v17 }
0x1f60   : > { %5056 = vmatprep.mubr.f32.mxu0 %v7254_v13 }
0x200f   : > { %v8546_v19 = vpop.f32.mrf.mxu0 }
0x2011   : > { %v8548_v24 = vpop.f32.mrf.mxu0 }
0x2017   : > { %v6199_v1 = vpop.f32.mrf.mxu0 }
0x2018   : > { %v4401_v25 = vmul.f32 0.02, %v6199_v1 }
0x2019   : > { %v4391_v53 = vpop.f32.mrf.mxu0 }
0x201a   : > { %6608 = vtanh.f32 %v4401_v25  ;;  %v4400_v50 = vmul.f32 0.02, %v4391_v53 }
0x201c   : > { %6610 = vtanh.f32 %v4400_v50 }
0x201f   : > { %v6220_v8 = vpop.f32.mrf.mxu0 }
0x2020   : > { %v4700_v58 = vmul.f32 0.02, %v6220_v8 }
0x2021   : > { %v4690_v56 = vpop.f32.mrf.mxu0 }
0x2022   : > { %v4699_v32 = vmul.f32 0.02, %v4690_v56 }
0x2024   : > { %6612 = vtanh.f32 %v4699_v32 }
0x2027   : > { %v6609_v14 = vpop.eup %6608 }
0x2028   : > { %v4405_v15 = vmul.f32 50.0, %v6609_v14 }
0x2029   : > { %v6611_v11 = vpop.eup %6610 }
0x202a   : > { %v4409_v29 = vsel %vm1698_vm4, %v4405_v15, -inf  ;;  %v4404_v31 = vmul.f32 50.0, %v6611_v11 }
0x202b   : > { %4410 = vmax.xlane.f32.xlu1 %v4409_v29 }
0x202c   : > { %v4406_v4 = vsel %vm1698_vm4, %v4404_v31, -inf }
0x202d   : > { %4407 = vmax.xlane.f32.xlu0 %v4406_v4 }
0x2031   : > { %v6613_v35 = vpop.eup %6612 }
0x2032   : > { %v8558_v38 = vmul.f32 50.0, %v6613_v35 }
0x2034   : > { %v4705_v39 = vsel %vm1698_vm4, %v8558_v38, -inf }
0x203c   : > { %3919 = vperm.xlu1 %6482, %v8502_v61  }
0x2040   : > { %4430 = vrot.lane.b32.xlu1 %v8460_v51, %s9014_s14 }
0x2041   : > { %6484 = vset.pattern.permute.xlu1 %v7264_v16 }
0x2044   : > { %4428 = vrot.lane.b32.xlu1 %v8465_v6, %s9014_s14  ;;  %s8824_s14 = scalar_lea.hbm %s9020_s29, %s5725_s10 }
0x2068   : > { %4706 = vmax.xlane.f32.xlu1 %v4705_v39 }
0x2079   : > { %4516 = vperm.xlu1 %6484, %v8502_v61  }
0x207d   : > { %4729 = vrot.lane.b32.xlu1 %v8460_v51, %s9016_s24 }
0x207e   : > { %6486 = vset.pattern.permute.xlu1 %v7265_v36 }
0x20b4   : > { %v4411_v40 = vpop.xlane.xlu1 %4410 }
0x20b5   : > { %v4413_v55 = vsub.f32 %v4405_v15, %v4411_v40  ;;  %v3716_v40 = vld [vmem:[#allocation25 + $0x38] sm:$0xff] }
0x20b6   : > { %v4408_v42 = vpop.xlane.xlu0 %4407 }
0x20b7   : > { %v4416_v43 = vmul.f32 1.442695, %v4413_v55  ;;  %v4412_v30 = vsub.f32 %v4404_v31, %v4408_v42  ;;  %v3715_v55 = vld [vmem:[#allocation25 + $0x30] sm:$0xff] }
0x20b8   : > { %v3920_v0 = vpop.permute.xlu1 %3919 }
0x20b9   : > { %6614 = vpow2.f32 %v4416_v43  ;;  %v4414_v46 = vmul.f32 1.442695, %v4412_v30  ;;  %v3927_v47 = vmul.f32 %v3920_v0, %v8494_v10 }
0x20bb   : > { %6616 = vpow2.f32 %v4414_v46  ;;  %6190 = vmatprep.mubr.msk.f32.mxu1 %vm1698_vm4, %v3927_v47 }
0x20bc   : > { %v4431_v48 = vpop.permute.xlu1 %4430  ;;  %6618 = vtanh.f32 %v4700_v58 }
0x20bd   : > { %6200 = vmatprep.subr.mxu1 %v4431_v48 }
0x20c0   : > { %v4429_v49 = vpop.permute.xlu1 %4428 }
0x20c6   : > { %v6615_v34 = vpop.eup %6614 }
0x20c7   : > { %v4421_v51 = vsel %vm1698_vm4, %v6615_v34, 0.0 }
0x20c8   : > { %v6617_v45 = vpop.eup %6616  ;;  %4422 = vadd.xlane.f32.xlu0 %v4421_v51 }
0x20c9   : > { %v4418_v57 = vsel %vm1698_vm4, %v6617_v45, 0.0  ;;  %v6619_v10 = vpop.eup %6618 }
0x20ca   : > { %v4704_v52 = vmul.f32 50.0, %v6619_v10 }
0x20cc   : > { %4419 = vadd.xlane.f32.xlu0 %v4418_v57  ;;  %v4708_v37 = vsel %vm1698_vm4, %v4704_v52, -inf }
0x20e2   : > { %3924 = vperm.xlu0 %6483, %v8505_v27  }
0x20e6   : > { %6485 = vset.pattern.permute.xlu0 %v7264_v16 }
0x20f1   : > { %v4707_v62 = vpop.xlane.xlu1 %4706 }
0x20f2   : > { %v4711_v12 = vsub.f32 %v8558_v38, %v4707_v62 }
0x20f4   : > { %v4713_v25 = vmul.f32 1.442695, %v4711_v12  ;;  %v4954_v12 = vld [vmem:[%s9017_s2 + $0xb0] sm:$0xff] }
0x20f5   : > { %v4517_v5 = vpop.permute.xlu1 %4516 }
0x2101   : > { %4709 = vmax.xlane.f32.xlu0 %v4708_v37 }
0x2117   : > { %4520 = vperm.xlu0 %6485, %v8505_v27  }
0x211b   : > { %6487 = vset.pattern.permute.xlu0 %v7265_v36 }
0x2151   : > { %v4423_v26 = vpop.xlane.xlu0 %4422 }
0x2152   : > { %6620 = vrcp.f32 %v4423_v26 }
0x2155   : > { %v4420_v60 = vpop.xlane.xlu0 %4419 }
0x2156   : > { %6622 = vrcp.f32 %v4420_v60 }
0x215d   : > { %v3925_v18 = vpop.permute.xlu0 %3924 }
0x215e   : > { %v3928_v16 = vmul.f32 %v8492_v41, %v3925_v18  ;;  %v4730_v41 = vpop.permute.xlu1 %4729 }
0x215f   : > { %v6621_v2 = vpop.eup %6620 }
0x2160   : > { %6191 = vmatmul.mubr.msk.f32.vlgmr.msra.gmra.mxu1 %vm1698_vm4, %v3928_v16  ;;  %v4427_v36 = vmul.f32 %v6621_v2, %v6615_v34  ;;  %v4960_v16 = vld [vmem:[%s9017_s2 + $0xe0] sm:$0xff]  ;;  %v4957_v2 = vld [vmem:[%s9017_s2 + $0xc8] sm:$0xff] }
0x2161   : > { %6201 = vmatpush3.msra.mxu1 %v4431_v48 }
0x2162   : > { %6202 = vmatprep.subr.mxu1 %v4429_v49 }
0x2163   : > { %v6623_v3 = vpop.eup %6622  ;;  %6203 = vmatpush3.msra.mxu1 %v4429_v49 }
0x2164   : > { %v4426_v7 = vmul.f32 %v6623_v3, %v6617_v45  ;;  %6207 = vmatprep.subr.mxu1 %v3714_v63  ;;  %v4959_v3 = vld [vmem:[%s9017_s2 + $0xd8] sm:$0xff] }
0x2166   : > { %6204 = vmatprep.mubr.msk.f32.mxu1 %vm1698_vm4, %v4426_v7  ;;  %v4958_v7 = vld [vmem:[%s9017_s2 + $0xd0] sm:$0xff] }
0x2167   : > { %6205 = vmatmul.mubr.msk.f32.vlgmr.msra.gmra.mxu1 %vm1698_vm4, %v4427_v36  ;;  %v4953_v36 = vld [vmem:[%s9017_s2 + $0xa8] sm:$0xff] }
0x2168   : > { %6208 = vmatpush3.msra.mxu1 %v3714_v63  ;;  %v4962_v63 = vld [vmem:[%s9017_s2 + $0xf0] sm:$0xff] }
0x2169   : > { %6209 = vmatprep.subr.mxu1 %v3713_v9 }
0x216a   : > { %6210 = vmatpush3.msra.mxu1 %v3713_v9  ;;  %v4955_v9 = vld [vmem:[%s9017_s2 + $0xb8] sm:$0xff] }
0x216b   : > { %6221 = vmatprep.subr.mxu1 %v4730_v41 }
0x218a   : > { %v4710_v17 = vpop.xlane.xlu0 %4709 }
0x218b   : > { %v4712_v1 = vsub.f32 %v4704_v52, %v4710_v17  ;;  %v4949_v17 = vld [vmem:[%s9017_s2 + $0x88] sm:$0xff] }
0x218d   : > { %v4715_v53 = vmul.f32 1.442695, %v4712_v1  ;;  %v4951_v1 = vld [vmem:[%s9017_s2 + $0x98] sm:$0xff] }
0x218f   : > { %6624 = vpow2.f32 %v4715_v53  ;;  %v4950_v53 = vld [vmem:[%s9017_s2 + $0x90] sm:$0xff] }
0x2190   : > { %6626 = vpow2.f32 %v4713_v25  ;;  %v4948_v25 = vld [vmem:[%s9017_s2 + $0x80] sm:$0xff] }
0x2192   : > { %v4521_v8 = vpop.permute.xlu0 %4520 }
0x219c   : > { %v6625_v50 = vpop.eup %6624 }
0x219d   : > { %v4720_v14 = vsel %vm1698_vm4, %v6625_v50, 0.0  ;;  %v6627_v15 = vpop.eup %6626 }
0x219e   : > { %4721 = vadd.xlane.f32.xlu1 %v4720_v14  ;;  %v4717_v11 = vsel %vm1698_vm4, %v6627_v15, 0.0  ;;  %v4947_v14 = vld [vmem:[%s9017_s2 + $0x78] sm:$0xff] }
0x21a2   : > { %4718 = vadd.xlane.f32.xlu1 %v4717_v11  ;;  %v4946_v11 = vld [vmem:[%s9017_s2 + $0x70] sm:$0xff] }
0x21b3   : > { %4727 = vrot.lane.b32.xlu1 %v8465_v6, %s9016_s24  ;;  %s7130_s24 = scalar_lea.vmem %s8826_s26, 256 }
0x21b4   : > { %p7131_p8 = scmp.ne.s32.totalorder %s8826_s26, %s7130_s24 }
0x21b6   : > { %p7132_p11 = pnand %p7131_p8, %p9021_p10 }
0x21b7   : > { %4815 = vperm.xlu1 %6486, %v8502_v61  }
0x21b8   : > { %p7133_p1 = pneg %p7132_p11 }
0x21bb   : > { %4819 = vperm.xlu1 %6486, %v8505_v27  }
0x2220   : > { %v6192_v29 = vpop.f32.mrf.mxu1 }
0x2221   : > { %v4306_v42 = vadd.f32 %v6192_v29, %v8546_v19  ;;  %v4941_v29 = vld [vmem:[%s9017_s2 + $0x48] sm:$0xff] }
0x2222   : > { %v4300_v31 = vpop.f32.mrf.mxu1 }
0x2223   : > { %v4301_v30 = vadd.f32 %v4300_v31, %v8548_v24  ;;  %v4943_v31 = vld [vmem:[%s9017_s2 + $0x58] sm:$0xff] }
0x2227   : > { %v6206_v4 = vpop.f32.mrf.mxu1  ;;  %v4722_v33 = vpop.xlane.xlu1 %4721 }
0x2228   : > { %v4524_v32 = vmul.f32 %v6206_v4, %v4521_v8  ;;  %6628 = vrcp.f32 %v4722_v33  ;;  %v4940_v4 = vld [vmem:[%s9017_s2 + $0x40] sm:$0xff]  ;;  %v4942_v33 = vld [vmem:[%s9017_s2 + $0x50] sm:$0xff]  ;;  %v4939_v8 = vld [vmem:[%s9017_s2 + $0x38] sm:$0xff] }
0x2229   : > { %v4506_v54 = vpop.f32.mrf.mxu1 }
0x222a   : > { %v4523_v56 = vmul.f32 %v4517_v5, %v4506_v54  ;;  %v4956_v5 = vld [vmem:[%s9017_s2 + $0xc0] sm:$0xff]  ;;  %v4937_v54 = vld [vmem:[%s9017_s2 + $0x28] sm:$0xff] }
0x222b   : > { %v4719_v35 = vpop.xlane.xlu1 %4718 }
0x222c   : > { %6630 = vrcp.f32 %v4719_v35  ;;  %6211 = vmatprep.mubr.msk.f32.mxu1 %vm1698_vm4, %v4523_v56  ;;  %v4936_v56 = vld [vmem:[%s9017_s2 + $0x20] sm:$0xff]  ;;  %v4933_v35 = vld [vmem:[%s9017_s2 + $0x8] sm:$0xff] }
0x222d   : > { %6212 = vmatmul.mubr.msk.f32.vlgmr.msra.gmra.mxu1 %vm1698_vm4, %v4524_v32  ;;  %v4938_v32 = vld [vmem:[%s9017_s2 + $0x30] sm:$0xff] }
0x222e   : > { %6222 = vmatpush3.msra.mxu1 %v4730_v41  ;;  %v4952_v41 = vld [vmem:[%s9017_s2 + $0xa0] sm:$0xff] }
0x222f   : > { %v4728_v6 = vpop.permute.xlu1 %4727 }
0x2230   : > { %6223 = vmatprep.subr.mxu1 %v4728_v6 }
0x2231   : > { %6224 = vmatpush3.msra.mxu1 %v4728_v6  ;;  %v4935_v6 = vld [vmem:[%s9017_s2 + $0x18] sm:$0xff] }
0x2232   : > { %6228 = vmatprep.subr.mxu1 %v3716_v40 }
0x2233   : > { %v4816_v48 = vpop.permute.xlu1 %4815 }
0x2235   : > { %v6629_v61 = vpop.eup %6628 }
0x2236   : > { %v4726_v39 = vmul.f32 %v6629_v61, %v6625_v50  ;;  %v4945_v50 = vld [vmem:[%s9017_s2 + $0x68] sm:$0xff]  ;;  %v4932_v61 = vld [vmem:[%s9017_s2] sm:$0xff] }
0x2237   : > { %v4820_v45 = vpop.permute.xlu1 %4819 }
0x2239   : > { %v6631_v27 = vpop.eup %6630 }
0x223a   : > { %v4725_v38 = vmul.f32 %v6631_v27, %v6627_v15  ;;  %v4944_v15 = vld [vmem:[%s9017_s2 + $0x60] sm:$0xff]  ;;  %v4934_v27 = vld [vmem:[%s9017_s2 + $0x10] sm:$0xff] }
0x223c   : > { %6225 = vmatprep.mubr.msk.f32.mxu1 %vm1698_vm4, %v4725_v38 }
0x223d   : > { %6226 = vmatmul.mubr.msk.f32.vlgmr.msra.gmra.mxu1 %vm1698_vm4, %v4726_v39 }
0x223e   : > { %6229 = vmatpush3.msra.mxu1 %v3716_v40 }
0x223f   : > { %6230 = vmatprep.subr.mxu1 %v3715_v55 }
0x2240   : > { %6231 = vmatpush3.msra.mxu1 %v3715_v55 }
0x22ed   : > { %v6213_v43 = vpop.f32.mrf.mxu1 }
0x22ee   : > { %v4607_v0 = vadd.f32 %v6213_v43, %v4306_v42 }
0x22ef   : > { %v4597_v46 = vpop.f32.mrf.mxu1 }
0x22f0   : > { %v4606_v47 = vadd.f32 %v4597_v46, %v4301_v30 }
0x22fd   : > { %v6227_v34 = vpop.f32.mrf.mxu1 }
0x22fe   : > { %v4823_v58 = vmul.f32 %v6227_v34, %v4820_v45  ;;  %v5217_v34 = vld [vmem:[%s9018_s3 + $0xf8] sm:$0xff]  ;;  %v5216_v45 = vld [vmem:[%s9018_s3 + $0xf0] sm:$0xff] }
0x22ff   : > { %v4805_v51 = vpop.f32.mrf.mxu1 }
0x2300   : > { %v4822_v57 = vmul.f32 %v4816_v48, %v4805_v51  ;;  %v5201_v51 = vld [vmem:[%s9018_s3 + $0x78] sm:$0xff] }
0x2302   : > { %6232 = vmatprep.mubr.msk.f32.mxu1 %vm1698_vm4, %v4822_v57  ;;  %v5215_v57 = vld [vmem:[%s9018_s3 + $0xe8] sm:$0xff] }
0x2303   : > { %6233 = vmatmul.mubr.msk.f32.vlgmr.msra.gmra.mxu1 %vm1698_vm4, %v4823_v58  ;;  %v5199_v58 = vld [vmem:[%s9018_s3 + $0x68] sm:$0xff] }
0x2304   : > { %5133 = vmatprep.mubr.f32.mxu1 %v7254_v13 }
0x23c3   : > { %v6234_v10 = vpop.f32.mrf.mxu1 }
0x23c4   : > { %v4906_v19 = vadd.f32 %v6234_v10, %v4607_v0  ;;  %v5712_v0 = vld [vmem:[#allocation26] ss:$0 sm:$0xff] }
0x23c5   : > { %v4896_v52 = vpop.f32.mrf.mxu1  ;;  %v5214_v10 = vld [vmem:[%s9018_s3 + $0xe0] sm:$0xff] }
0x23c6   : > { %v8596_v24 = vadd.f32 %v8395_v20, %v4906_v19  ;;  %v4905_v37 = vadd.f32 %v4896_v52, %v4606_v47  ;;  %v4961_v20 = vld [vmem:[%s9017_s2 + $0xe8] sm:$0xff]  ;;  %v5198_v19 = vld [vmem:[%s9018_s3 + $0x60] sm:$0xff]  ;;  %v5213_v52 = vld [vmem:[%s9018_s3 + $0xd8] sm:$0xff] }
0x23c7   : > { %5008 = vmatprep.subr.mxu0 %v4961_v20  ;;  %v5210_v20 = vld [vmem:[%s9018_s3 + $0xc0] sm:$0xff] }
0x23c8   : > { %v8599_v26 = vadd.f32 %v4905_v37, %v8397_v21  ;;  %v4911_v60 = vmul.f32 %v8596_v24, %v8596_v24  ;;  %v4963_v21 = vld [vmem:[%s9017_s2 + $0xf8] sm:$0xff]  ;;  %5009 = vmatpush1.msra.mxu0 %v4960_v16  ;;  %s7136_s2 = scalar_lea.vmem %s7135_s16, 512 }
0x23c9   : > { %5085 = vmatprep.subr.mxu1 %v4963_v21  ;;  %5010 = vmatprep.subr.mxu0 %v4957_v2  ;;  %v5197_v37 = vld [vmem:[%s9018_s3 + $0x58] sm:$0xff]  ;;  %v5194_v21 = vld [vmem:[%s9018_s3 + $0x40] sm:$0xff]  ;;  %v5208_v2 = vld [vmem:[%s9018_s3 + $0xb0] sm:$0xff]  ;;  %p7138_p12 = scmp.lt.s32.totalorder %s7136_s2, %s7130_s24 }
0x23ca   : > { %v4915_v49 = vsel %vm1077_vm0, %v4911_v60, 0.0  ;;  %v4910_v18 = vmul.f32 %v8599_v26, %v8599_v26  ;;  %5086 = vmatpush1.msra.mxu1 %v4962_v63  ;;  %5011 = vmatpush1.msra.mxu0 %v4956_v5  ;;  %v5212_v60 = vld [vmem:[%s9018_s3 + $0xd0] sm:$0xff]  ;;  %v5209_v16 = vld [vmem:[%s9018_s3 + $0xb8] sm:$0xff]  ;;  %v5207_v5 = vld [vmem:[%s9018_s3 + $0xa8] sm:$0xff] }
0x23cb   : > { %4916 = vadd.xlane.f32.xlu0 %v4915_v49  ;;  %5087 = vmatprep.subr.mxu1 %v4959_v3  ;;  %v5196_v49 = vld [vmem:[%s9018_s3 + $0x50] sm:$0xff]  ;;  %v5193_v63 = vld [vmem:[%s9018_s3 + $0x38] sm:$0xff]  ;;  %p7139_p2 = por %p7138_p12, %p7137_p4 }
0x23cc   : > { %v4912_v62 = vsel %vm1077_vm0, %v4910_v18, 0.0  ;;  %5088 = vmatpush1.msra.mxu1 %v4958_v7  ;;  %5012 = vmatprep.subr.mxu0 %v4953_v36  ;;  %v5211_v18 = vld [vmem:[%s9018_s3 + $0xc8] sm:$0xff]  ;;  %v5192_v3 = vld [vmem:[%s9018_s3 + $0x30] sm:$0xff]  ;;  %v5206_v36 = vld [vmem:[%s9018_s3 + $0xa0] sm:$0xff] }
0x23cd   : > { %4913 = vadd.xlane.f32.xlu1 %v4912_v62  ;;  %5089 = vmatprep.subr.mxu1 %v4955_v9  ;;  %v5195_v62 = vld [vmem:[%s9018_s3 + $0x48] sm:$0xff]  ;;  %v5190_v9 = vld [vmem:[%s9018_s3 + $0x20] sm:$0xff]  ;;  %p7140_p5 = pnand %p7139_p2, %p7133_p1 }
0x23ce   : > { %5013 = vmatpush1.msra.mxu0 %v4952_v41  ;;  %5090 = vmatpush1.msra.mxu1 %v4954_v12  ;;  %v5191_v7 = vld [vmem:[%s9018_s3 + $0x28] sm:$0xff]  ;;  %v5205_v41 = vld [vmem:[%s9018_s3 + $0x98] sm:$0xff] }
0x23cf   : > { %5014 = vmatprep.subr.mxu0 %v4949_v17  ;;  %5091 = vmatprep.subr.mxu1 %v4951_v1  ;;  %v5189_v12 = vld [vmem:[%s9018_s3 + $0x18] sm:$0xff]  ;;  %v5204_v17 = vld [vmem:[%s9018_s3 + $0x90] sm:$0xff] }
0x23d0   : > { %5015 = vmatpush1.msra.mxu0 %v4948_v25  ;;  %5092 = vmatpush1.msra.mxu1 %v4950_v53  ;;  %v5188_v1 = vld [vmem:[%s9018_s3 + $0x10] sm:$0xff]  ;;  %v5203_v25 = vld [vmem:[%s9018_s3 + $0x88] sm:$0xff] }
0x23d1   : > { %5016 = vmatprep.subr.mxu0 %v4945_v50  ;;  %5093 = vmatprep.subr.mxu1 %v4947_v14  ;;  %v5187_v53 = vld [vmem:[%s9018_s3 + $0x8] sm:$0xff]  ;;  %v5202_v50 = vld [vmem:[%s9018_s3 + $0x80] sm:$0xff] }
0x23d2   : > { %5017 = vmatpush1.msra.mxu0 %v4944_v15  ;;  %5094 = vmatpush1.msra.mxu1 %v4946_v11  ;;  %v5186_v14 = vld [vmem:[%s9018_s3] sm:$0xff] }
0x23d3   : > { %5018 = vmatprep.subr.mxu0 %v4941_v29  ;;  %5095 = vmatprep.subr.mxu1 %v4943_v31  ;;  %v4964_v15 = vld [vmem:[#allocation28] sm:$0xf] }
0x23d4   : > { %5019 = vmatpush1.msra.mxu0 %v4940_v4  ;;  %5096 = vmatpush1.msra.mxu1 %v4942_v33  ;;  %v4977_v11 = vrot.slane %v4964_v15, %v2952_v59  ;;  %v4981_v29 = vrot.slane %v4964_v15, %v2956_v28 }
0x23d5   : > { %5020 = vmatprep.subr.mxu0 %v4937_v54  ;;  %5097 = vmatprep.subr.mxu1 %v4939_v8 }
0x23d6   : > { %5021 = vmatpush1.msra.mxu0 %v4936_v56  ;;  %5098 = vmatpush1.msra.mxu1 %v4938_v32 }
0x23d7   : > { %5022 = vmatprep.subr.mxu0 %v4933_v35  ;;  %5099 = vmatprep.subr.mxu1 %v4935_v6 }
0x23d8   : > { %5023 = vmatpush1.msra.mxu0 %v4932_v61  ;;  %5100 = vmatpush1.msra.mxu1 %v4934_v27 }
0x23d9   : > { %5918 = vmatprep.subr.mxu0 %v5217_v34 }
0x2454   : > { %v4917_v38 = vpop.xlane.xlu0 %4916 }
0x2455   : > { %v4919_v39 = vmax.f32 %v4917_v38, 1e-24 }
0x2456   : > { %v4914_v40 = vpop.xlane.xlu1 %4913 }
0x2457   : > { %v4918_v55 = vmax.f32 %v4914_v40, 1e-24  ;;  %6632 = vrsqrt.f32 %v4919_v39 }
0x2459   : > { %6634 = vrsqrt.f32 %v4918_v55 }
0x2464   : > { %v6633_v42 = vpop.eup %6632 }
0x2465   : > { %v4923_v47 = vmul.f32 %v6633_v42, %v8596_v24 }
0x2466   : > { %v6635_v43 = vpop.eup %6634 }
0x2467   : > { %v4922_v30 = vmul.f32 %v6635_v43, %v8599_v26  ;;  %v4931_v48 = vmul.f32 %v5712_v0, %v4923_v47 }
0x2469   : > { %v4930_v46 = vmul.f32 %v5712_v0, %v4922_v30 }
0x246b   : > { %5713 = vmatmul.mubr.msk.f32.vlgmr.msra.gmra.mxu0 %vm1077_vm0, %v4930_v46  ;;  %5715 = vmatmul.mubr.msk.f32.vlgmr.msra.gmra.mxu1 %vm1077_vm0, %v4930_v46 }
0x246c   : > { %5062 = vmatprep.mubr.f32.mxu0 %v7254_v13  ;;  %5139 = vmatprep.mubr.f32.mxu1 %v7254_v13  ;;  %v5200_v13 = vld [vmem:[%s9018_s3 + $0x70] sm:$0xff] }
0x246d   : > { %5919 = vmatpush3.msra.mxu0 %v5201_v51 }
0x246e   : > { %5920 = vmatprep.subr.mxu0 %v5216_v45 }
0x246f   : > { %5714 = vmatmul.mubr.msk.f32.gmra.mxu0 %vm1077_vm0, %v4931_v48  ;;  %5716 = vmatmul.mubr.msk.f32.gmra.mxu1 %vm1077_vm0, %v4931_v48 }
0x2470   : > { %5921 = vmatpush3.msra.mxu0 %v5200_v13 }
0x2471   : > { %5922 = vmatprep.subr.mxu0 %v5215_v57 }
0x2472   : > { %5923 = vmatpush3.msra.mxu0 %v5199_v58 }
0x2473   : > { %5924 = vmatprep.subr.mxu0 %v5214_v10 }
0x2474   : > { %5925 = vmatpush3.msra.mxu0 %v5198_v19 }
0x2475   : > { %5926 = vmatprep.subr.mxu0 %v5213_v52 }
0x2476   : > { %5927 = vmatpush3.msra.mxu0 %v5197_v37  ;;  %v4973_v37 = vrot.slane %v4964_v15, %v7887_v44 }
0x2477   : > { %5928 = vmatprep.subr.mxu0 %v5212_v60 }
0x2478   : > { %5929 = vmatpush3.msra.mxu0 %v5196_v49 }
0x2479   : > { %5930 = vmatprep.subr.mxu0 %v5211_v18  ;;  %v4969_v18 = vrot.slane %v4964_v15, %v7847_v23  ;;  %v5717_v15 = vld [vmem:[#allocation29] ss:$0 sm:$0xff] }
0x247a   : > { %5931 = vmatpush3.msra.mxu0 %v5195_v62 }
0x247b   : > { %5932 = vmatprep.subr.mxu0 %v5210_v20 }
0x247c   : > { %5933 = vmatpush3.msra.mxu0 %v5194_v21 }
0x247d   : > { %5934 = vmatprep.subr.mxu0 %v5209_v16 }
0x247e   : > { %5935 = vmatpush3.msra.mxu0 %v5193_v63 }
0x247f   : > { %5936 = vmatprep.subr.mxu0 %v5208_v2 }
0x2480   : > { %5937 = vmatpush3.msra.mxu0 %v5192_v3 }
0x2481   : > { %5938 = vmatprep.subr.mxu0 %v5207_v5 }
0x2482   : > { %5939 = vmatpush3.msra.mxu0 %v5191_v7 }
0x2483   : > { %5940 = vmatprep.subr.mxu0 %v5206_v36 }
0x2484   : > { %5941 = vmatpush3.msra.mxu0 %v5190_v9 }
0x2485   : > { %5942 = vmatprep.subr.mxu0 %v5205_v41 }
0x2486   : > { %5943 = vmatpush3.msra.mxu0 %v5189_v12 }
0x2487   : > { %5944 = vmatprep.subr.mxu0 %v5204_v17 }
0x2488   : > { %5945 = vmatpush3.msra.mxu0 %v5188_v1 }
0x2489   : > { %5946 = vmatprep.subr.mxu0 %v5203_v25 }
0x248a   : > { %5947 = vmatpush3.msra.mxu0 %v5187_v53 }
0x248b   : > { %5948 = vmatprep.subr.mxu0 %v5202_v50 }
0x248c   : > { %5949 = vmatpush3.msra.mxu0 %v5186_v14 }
0x252b   : > { %v5135_v31 = vpop.f32.mrf.mxu1  ;;  %v5058_v13 = vpop.f32.mrf.mxu0 }
0x252c   : > { %v5136_v4 = vadd.f32 %v5135_v31, %v4977_v11  ;;  %v5059_v7 = vadd.f32 %v5058_v13, %v4969_v18 }
0x252d   : > { %v5137_v33 = vpop.f32.mrf.mxu1  ;;  %v5060_v10 = vpop.f32.mrf.mxu0 }
0x252e   : > { %v5146_v54 = vmul.f32 %v5136_v4, %v5136_v4  ;;  %v5138_v8 = vadd.f32 %v5137_v33, %v4981_v29  ;;  %v5061_v2 = vadd.f32 %v5060_v10, %v4973_v37 }
0x252f   : > { %v5141_v56 = vpop.f32.mrf.mxu1  ;;  %v5064_v62 = vpop.f32.mrf.mxu0 }
0x2530   : > { %v5150_v32 = vmul.f32 %v5146_v54, %v5136_v4  ;;  %v5147_v35 = vmul.f32 %v5138_v8, %v5138_v8  ;;  %v5142_v6 = vadd.f32 %v5141_v56, %v4977_v11  ;;  %v5065_v23 = vadd.f32 %v5064_v62, %v4969_v18 }
0x2531   : > { %v5143_v61 = vpop.f32.mrf.mxu1  ;;  %v5066_v9 = vpop.f32.mrf.mxu0 }
0x2532   : > { %v5154_v27 = vmul.f32 0.044715, %v5150_v32  ;;  %v5151_v38 = vmul.f32 %v5147_v35, %v5138_v8  ;;  %v5148_v39 = vmul.f32 %v5142_v6, %v5142_v6  ;;  %v5144_v40 = vadd.f32 %v5143_v61, %v4981_v29 }
0x2533   : > { %v5067_v1 = vadd.f32 %v5066_v9, %v4973_v37 }
0x2534   : > { %v5158_v55 = vadd.f32 %v5154_v27, %v5136_v4  ;;  %v5155_v42 = vmul.f32 0.044715, %v5151_v38  ;;  %v5152_v59 = vmul.f32 %v5148_v39, %v5142_v6  ;;  %v5149_v43 = vmul.f32 %v5144_v40, %v5144_v40 }
0x2536   : > { %v5162_v22 = vmul.f32 0.7978846, %v5158_v55  ;;  %v5159_v28 = vadd.f32 %v5155_v42, %v5138_v8  ;;  %v5156_v30 = vmul.f32 0.044715, %v5152_v59  ;;  %v5153_v0 = vmul.f32 %v5149_v43, %v5144_v40  ;;  %v5718_v42 = vld [vmem:[#allocation8] ss:$0 sm:$0xff] }
0x2538   : > { %6636 = vtanh.f32 %v5162_v22  ;;  %v5163_v46 = vmul.f32 0.7978846, %v5159_v28  ;;  %v5160_v47 = vadd.f32 %v5156_v30, %v5142_v6  ;;  %v5157_v48 = vmul.f32 0.044715, %v5153_v0 }
0x253a   : > { %6638 = vtanh.f32 %v5163_v46  ;;  %v5164_v34 = vmul.f32 0.7978846, %v5160_v47  ;;  %v5161_v51 = vadd.f32 %v5157_v48, %v5144_v40 }
0x253c   : > { %6640 = vtanh.f32 %v5164_v34  ;;  %v5165_v45 = vmul.f32 0.7978846, %v5161_v51 }
0x253e   : > { %6642 = vtanh.f32 %v5165_v45 }
0x2545   : > { %v6637_v57 = vpop.eup %6636 }
0x2546   : > { %v5170_v58 = vadd.f32 1.0, %v6637_v57 }
0x2547   : > { %v6639_v19 = vpop.eup %6638 }
0x2548   : > { %v5174_v52 = vmul.f32 0.5, %v5170_v58  ;;  %v5171_v60 = vadd.f32 1.0, %v6639_v19 }
0x2549   : > { %v6641_v49 = vpop.eup %6640 }
0x254a   : > { %v5175_v20 = vmul.f32 0.5, %v5171_v60  ;;  %v5172_v21 = vadd.f32 1.0, %v6641_v49  ;;  %v5178_v16 = vmul.f32 %v5174_v52, %v5136_v4 }
0x254b   : > { %v6643_v63 = vpop.eup %6642 }
0x254c   : > { %v5179_v3 = vmul.f32 %v5175_v20, %v5138_v8  ;;  %v5176_v5 = vmul.f32 0.5, %v5172_v21  ;;  %v5173_v36 = vadd.f32 1.0, %v6643_v63  ;;  %v5182_v12 = vmul.f32 %v5178_v16, %v5059_v7 }
0x254e   : > { %v5183_v41 = vmul.f32 %v5179_v3, %v5061_v2  ;;  %v5177_v17 = vmul.f32 0.5, %v5173_v36  ;;  %v5180_v44 = vmul.f32 %v5176_v5, %v5142_v6 }
0x2550   : > { %5289 = vmatprep.mubr.f32.mxu0 %v5183_v41  ;;  %v5181_v25 = vmul.f32 %v5177_v17, %v5144_v40  ;;  %v5184_v50 = vmul.f32 %v5180_v44, %v5065_v23 }
0x2551   : > { %5290 = vmatmul.mubr.f32.vlgmr.msra.gmra.mxu0 %v5182_v12 }
0x2552   : > { %v5185_v53 = vmul.f32 %v5181_v25, %v5067_v1 }
0x2554   : > { %5294 = vmatprep.mubr.f32.mxu0 %v5185_v53 }
0x2555   : > { %5295 = vmatmul.mubr.f32.gmra.mxu0 %v5184_v50 }
0x2611   : > { %v5950_v14 = vpop.f32.mrf.mxu0 }
0x2613   : > { %v5951_v11 = vpop.f32.mrf.mxu0 }
0x2614   : > { %v5952_v29 = vadd.f32 %v5951_v11, %v5950_v14 }
0x2615   : > { %v5953_v4 = vpop.f32.mrf.mxu0 }
0x2616   : > { %v5292_v31 = vadd.f32 %v5952_v29, %v5717_v15 }
0x2617   : > { %v5954_v54 = vpop.f32.mrf.mxu0 }
0x2618   : > { %v5300_v33 = vadd.f32 %v5292_v31, %v8599_v26  ;;  %v5955_v8 = vadd.f32 %v5954_v54, %v5953_v4 }
0x261a   : > { %v5303_v56 = vmul.f32 %v5300_v33, %v5300_v33  ;;  %v5297_v32 = vadd.f32 %v5955_v8, %v5717_v15 }
0x261c   : > { %v5305_v35 = vsel %vm1077_vm0, %v5303_v56, 0.0  ;;  %v5301_v6 = vadd.f32 %v5297_v32, %v8596_v24 }
0x261d   : > { %5306 = vadd.xlane.f32.xlu1 %v5305_v35 }
0x261e   : > { %v5304_v61 = vmul.f32 %v5301_v6, %v5301_v6 }
0x2620   : > { %v5308_v27 = vsel %vm1077_vm0, %v5304_v61, 0.0 }
0x2621   : > { %5309 = vadd.xlane.f32.xlu1 %v5308_v27 }
0x26a6   : > { %v5307_v38 = vpop.xlane.xlu1 %5306 }
0x26a7   : > { %v5311_v39 = vmax.f32 %v5307_v38, 1e-24 }
0x26a9   : > { %6644 = vrsqrt.f32 %v5311_v39 }
0x26aa   : > { %v5310_v40 = vpop.xlane.xlu1 %5309 }
0x26ab   : > { %v5312_v26 = vmax.f32 %v5310_v40, 1e-24 }
0x26ad   : > { %6646 = vrsqrt.f32 %v5312_v26 }
0x26b6   : > { %v6645_v55 = vpop.eup %6644 }
0x26b7   : > { %v5315_v59 = vmul.f32 %v6645_v55, %v5300_v33 }
0x26b9   : > { %v5323_v43 = vmul.f32 %v5718_v42, %v5315_v59 }
0x26ba   : > { %v6647_v24 = vpop.eup %6646 }
0x26bb   : > { %5325 = vst.msk [vmem:[%s1059_s12] sm:$0xff] %vm1077_vm0, %v5323_v43  ;;  %v5316_v22 = vmul.f32 %v6647_v24, %v5301_v6 }
0x26bd   : > { %v5324_v28 = vmul.f32 %v5718_v42, %v5316_v22 }
0x26bf   : > { %5326 = vst.msk [vmem:[%s1059_s12 + $0x8] sm:$0xff] %vm1077_vm0, %v5324_v28 }
0x26c0   : > { %7143 = shalt.err (!%p7140_p5)
}
0x26c1   : > { %s7144_s10 = scalar_lea.hbm %s8824_s14, 256  ;;  %s7148_s0 = scalar_lea.hbm %s9020_s29, 512 }
0x26c2   : > { %p7145_p7 = scmp.ne.s32.totalorder %s8824_s14, %s7144_s10  ;;  %p7149_p0 = scmp.lt.s32.totalorder %s8824_s14, %s9020_s29 }
0x26c3   : > { %p7150_p13 = scmp.lt.s32.totalorder %s7148_s0, %s7144_s10 }
0x26c4   : > { %p7146_p3 = pnand %p7145_p7, %p9021_p10 }
0x26c5   : > { %p7151_p9 = por %p7150_p13, %p7149_p0 }
0x26c6   : > { %p7147_p6 = pneg %p7146_p3 }
0x26c8   : > { %p7152_p8 = pnand %p7151_p9, %p7147_p6 }
0x26ca   : > { %7155 = shalt.err (!%p7152_p8)
}
0x26cb   : > { %s7267_s24 = smov 128   ;;  %s7268_s16 = smov 8  }
0x26cc   : > { %s9022_s2 = scalar_lea.sflag [#allocation4], %s7666_s17 }
0x26cd   : > { %6305 = dma.vmem_to_hbm [thread:$0]  (%p9021_p10), %s8826_s26, 256, %s8824_s14, %s9022_s2, %s7267_s24, %s7267_s24, %s7268_s16  }
0x26ce PF: > { %s5356_s12 = sand.u32 1, %s7218_s7   ;;  %p9023_p11 = scmp.ne.s32.totalorder %s8981_s9, 0 }
0x26cf   : > { %p9024_p1 = scmp.ge.s32.totalorder %s7230_s30, 2  ;;  %s5357_s3 = scalar_lea.sflag [#allocation4], %s5356_s12 }
0x26d1   : > { %p6364_p4 = pnand %p9024_p1, %p9023_p11 }
0x26d3   : > { %p6365_p12 = pneg %p6364_p4 }
0x26d5   : > { %7213 = dma.done.wait (%p6365_p12), %s5357_s3, 256  }
0x26d6   : > { %7215 = vsyncadd (%p6365_p12), %s5357_s3, 4294967040  ;;  %p49_p2 = scmp.ge.s32.totalorder %s7597_s1, 4   ;;  %s9025_s7 = smov %s7222_s4 }
0x26d7   : > { %s9026_s4 = smov %s7226_s8  ;;  %s9027_s8 = smov %s7609_s11 }
0x26d8   : > { %s9028_s30 = smov %s7597_s1  ;;  %51 = sbr.rel (!%p49_p2) target bundleno = 39 (0x27), region = 241 }
0x26dd   :  { %5362 = vsyncpa [#allocation3], 1 }
0x26de   :  { %5364 = vsyncpa [#allocation3 + $0x1], 1 }
0x26df   :  { %5365 = vsyncpa [#allocation6], 1 }
0x26e0   :  { %5366 = vsyncpa [#allocation9], 1 }
0x26e1   :  { %5367 = vsyncpa [#allocation12], 1 }
0x26e2   :  { %5368 = vsyncpa [#allocation15], 1 }
0x26e3   :  { %5369 = vsyncpa [#allocation18], 1 }
0x26e4   :  { %5370 = vsyncpa [#allocation21], 1 }
0x26e5   :  { %5371 = vsyncpa [#allocation24], 1 }
0x26e6   :  { %5372 = vsyncpa [#allocation27], 1 }
0x26e7   :  { %5373 = vsyncpa [#allocation30], 1 }
0x26e8   :  { %5374 = vsyncpa [#allocation4], 1 }
0x26e9   :  { %5376 = vsyncpa [#allocation4 + $0x1], 1 }

</bundles_post_ra>
